<compile_context>
chip_gen: v7x
topology: tpu7x:2x2x1
jax: 0.10.0
libtpu: 0.0.40
codegen_flags: <defaults>
</compile_context>

<pallas_src>
import functools

import jax
import jax.numpy as jnp
from jax.experimental import pallas as pl
from jax.experimental.pallas import tpu as pltpu


def _round_up(x, m):
    return (x + m - 1) // m * m


# ----------------------------------------------------------------------------
# Pallas kernel: one m-tile of  act(A @ B + bias)
#   a_ref:(tm,K) bf16   b_ref:(K,Np) bf16   bias_ref:(1,Np) f32
# ----------------------------------------------------------------------------
def _fused_matmul_kernel(a_ref, b_ref, bias_ref, o_ref, *, activation):
    acc = jnp.dot(a_ref[...], b_ref[...], preferred_element_type=jnp.float32)
    acc = acc + bias_ref[...]                    # (1,Np) broadcasts to (tm,Np)
    if activation == "relu":
        acc = jnp.maximum(acc, 0.0)
    elif activation == "tanh":
        acc = jnp.tanh(acc)
    o_ref[...] = acc.astype(o_ref.dtype)


def fused_matmul_bias_act(A, B, bias_row, activation, out_dtype):
    """act(A @ B + bias).

    A: (M, K) bf16.  B: (K, Np) bf16 with Np a multiple of 128.
    bias_row: (1, Np) f32.  Returns (M, Np) out_dtype.
    """
    M, K = A.shape
    _, Np = B.shape
    # >=2 parallel grid steps once M is big enough, so v7x's two TensorCores
    # both get work; otherwise a single full-M block (per-step overhead wins).
    steps = 2 if M >= 128 else 1
    tm = M // steps

    return pl.pallas_call(
        functools.partial(_fused_matmul_kernel, activation=activation),
        out_shape=jax.ShapeDtypeStruct((M, Np), out_dtype),
        grid_spec=pltpu.PrefetchScalarGridSpec(
            num_scalar_prefetch=0,
            grid=(steps,),
            in_specs=[
                pl.BlockSpec((tm, K), lambda i: (i, 0)),    # A m-tile
                pl.BlockSpec((K, Np), lambda i: (0, 0)),    # whole (tiny) B
                pl.BlockSpec((1, Np), lambda i: (0, 0)),    # bias row
            ],
            out_specs=pl.BlockSpec((tm, Np), lambda i: (i, 0)),
        ),
        compiler_params=pltpu.CompilerParams(
            dimension_semantics=("parallel",)),
    )(A, B, bias_row)


# ----------------------------------------------------------------------------
# Layer wrappers (NHWC activations, bf16 between layers).
# ----------------------------------------------------------------------------
def _first_layer(x, B, bias_row, cout, act, out_dtype):
    """ConvTranspose2d(k=4, s=1, p=0) on a 1x1 input == plain matmul."""
    N, _, _, cin = x.shape
    A = x.reshape(N, cin)                                    # (N, Cin) bf16
    out = fused_matmul_bias_act(A, B, bias_row, act, out_dtype)
    return out[:, :16 * cout].reshape(N, 4, 4, cout)         # NHWC (kh,kw,co)


def _subpixel_layer(x, B, bias_row, cout, act, out_dtype):
    """ConvTranspose2d(k=4, s=2, p=1) as ONE shared 9-tap im2col matmul
    producing all 4 output parities concatenated along lanes."""
    N, H, W, cin = x.shape
    xp = jnp.pad(x, ((0, 0), (1, 1), (1, 1), (0, 0)))        # bf16 stays bf16
    taps = [xp[:, ph:ph + H, pw:pw + W, :]
            for ph in range(3) for pw in range(3)]
    A = jnp.concatenate(taps, axis=-1).reshape(N * H * W, 9 * cin)
    out = fused_matmul_bias_act(A, B, bias_row, act, out_dtype)  # (M, Np)
    out = out[:, :4 * cout].reshape(N, H, W, 2, 2, cout)         # (rh,rw) last
    out = out.transpose(0, 1, 3, 2, 4, 5).reshape(N, 2 * H, 2 * W, cout)
    return out


# ----------------------------------------------------------------------------
# Parameter construction: raw PyTorch-layout weights + precomputed kernel
# operands (sub-pixel split, shared-9-tap wide-N layout, lane-padded, bf16).
# ----------------------------------------------------------------------------
def init_generator(key, z_dim, channels_img, n_features):
    cfg = [
        (z_dim,           n_features * 16, 1, 0, "relu"),
        (n_features * 16, n_features * 8,  2, 1, "relu"),
        (n_features * 8,  n_features * 4,  2, 1, "relu"),
        (n_features * 4,  n_features * 2,  2, 1, "relu"),
        (n_features * 2,  channels_img,    2, 1, "tanh"),
    ]
    raw, params, static = [], [], []
    for cin, cout, stride, pad, act in cfg:
        key, wk, bk = jax.random.split(key, 3)
        scale = (1.0 / (4.0 * cin)) ** 0.5
        w = scale * jax.random.normal(wk, (cin, cout, 4, 4), jnp.float32)
        b = 0.05 * jax.random.normal(bk, (cout,), jnp.float32)
        raw.append((w, b))

        if stride == 1:
            # y[n,(kh*4+kw)*Cout+co] = sum_ci x[n,ci] * w[ci,co,kh,kw]
            Bm = jnp.transpose(w, (0, 2, 3, 1)).reshape(cin, 16 * cout)
            brow = jnp.tile(b, 16)
        else:
            # Shared 9-tap im2col, 4 parities along lanes:
            #   B[(ph*3+pw)*Cin+ci, (rh*2+rw)*Cout+co] = w[ci,co,3+rh-2ph,3+rw-2pw]
            #   (nonzero only when rh <= ph <= rh+1 and rw <= pw <= rw+1)
            blocks = []
            for ph in range(3):
                for pw in range(3):
                    cols = []
                    for rh in range(2):
                        for rw in range(2):
                            if rh <= ph <= rh + 1 and rw <= pw <= rw + 1:
                                kh = 3 + rh - 2 * ph
                                kw = 3 + rw - 2 * pw
                                cols.append(w[:, :, kh, kw])          # (Cin,Cout)
                            else:
                                cols.append(jnp.zeros((cin, cout), jnp.float32))
                    blocks.append(jnp.concatenate(cols, axis=1))      # (Cin,4Cout)
            Bm = jnp.concatenate(blocks, axis=0)                      # (9Cin,4Cout)
            brow = jnp.tile(b, 4)

        ncols = Bm.shape[-1]
        np_ = _round_up(ncols, 128)                                   # lane-dense
        Bm = jnp.pad(Bm, ((0, 0), (0, np_ - ncols))).astype(jnp.bfloat16)
        brow = jnp.pad(brow, (0, np_ - ncols)).reshape(1, np_).astype(jnp.float32)
        params.append({"B": Bm, "bias": brow})
        static.append((stride, act, cout))
    return params, tuple(static), raw, tuple(c[2:] for c in cfg)


def generator_forward(params, static, x_nchw):
    x = jnp.transpose(x_nchw, (0, 2, 3, 1)).astype(jnp.bfloat16)  # NCHW->NHWC
    n_layers = len(params)
    for idx, (p, (stride, act, cout)) in enumerate(zip(params, static)):
        out_dtype = jnp.float32 if idx == n_layers - 1 else jnp.bfloat16
        if stride == 1:
            x = _first_layer(x, p["B"], p["bias"], cout, act, out_dtype)
        else:
            x = _subpixel_layer(x, p["B"], p["bias"], cout, act, out_dtype)
    return jnp.transpose(x, (0, 3, 1, 2))                         # NHWC->NCHW


# ----------------------------------------------------------------------------
# Plain-JAX reference (PyTorch ConvTranspose2d semantics) for validation.
# ----------------------------------------------------------------------------
def _conv_transpose_ref(x, w, b, stride, padding):
    k = w.shape[2]
    wf = jnp.transpose(jnp.flip(w, (2, 3)), (1, 0, 2, 3))   # (Cout,Cin,K,K)
    y = jax.lax.conv_general_dilated(
        x, wf, window_strides=(1, 1),
        padding=[(k - 1 - padding, k - 1 - padding)] * 2,
        lhs_dilation=(stride, stride),
        dimension_numbers=("NCHW", "OIHW", "NCHW"))
    return y + b.reshape(1, -1, 1, 1)


def generator_ref(raw, layer_cfg, x):
    h = x
    for (w, b), (stride, pad, act) in zip(raw, layer_cfg):
        h = _conv_transpose_ref(h, w, b, stride, pad)
        h = jnp.maximum(h, 0.0) if act == "relu" else jnp.tanh(h)
    return h


if __name__ == "__main__":
    key = jax.random.PRNGKey(0)
    batch, z_dim, channels_img, n_features = 2, 32, 3, 8

    pkey, xkey = jax.random.split(key)
    params, static, raw, layer_cfg = init_generator(
        pkey, z_dim, channels_img, n_features)
    x = jax.random.normal(xkey, (batch, z_dim, 1, 1), jnp.float32)

    fwd = jax.jit(lambda p, xx: generator_forward(p, static, xx))
    out = jax.block_until_ready(fwd(params, x))

    assert out.shape == (batch, channels_img, 64, 64), out.shape
    assert bool(jnp.all(jnp.isfinite(out)))
    assert bool(jnp.all(jnp.abs(out) <= 1.0 + 1e-6))        # tanh output range

    # numerical check vs. f32 XLA reference (bf16 matmul operands -> loose tol)
    ref = jax.block_until_ready(generator_ref(raw, layer_cfg, x))
    err = float(jnp.max(jnp.abs(out - ref)))
    assert err < 6e-2, f"max abs error vs reference: {err}"

    print("KERNEL_OK")
</pallas_src>

<mosaic_0001>
module attributes {stable_mosaic.version = 11 : i64} {
  func.func @_fused_matmul_kernel(%arg0: i32, %arg1: memref<2x32xbf16, #tpu.memory_space<vmem>>, %arg2: memref<32x2048xbf16, #tpu.memory_space<vmem>>, %arg3: memref<1x2048xf32, #tpu.memory_space<vmem>>, %arg4: memref<2x2048xbf16, #tpu.memory_space<vmem>>) attributes {dimension_semantics = [#tpu.dimension_semantics<parallel>], iteration_bounds = array<i64: 1>, scalar_prefetch = 0 : i64, scratch_operands = 0 : i64, tpu.core_type = #tpu.core_type<tc>, window_params = [{transform_indices = @transform_0, window_bounds = array<i64: 2, 32>}, {pipeline_mode = #tpu.pipeline_mode<synchronous>, transform_indices = @transform_1, window_bounds = array<i64: 32, 2048>}, {pipeline_mode = #tpu.pipeline_mode<synchronous>, transform_indices = @transform_2, window_bounds = array<i64: 1, 2048>}, {transform_indices = @transform_3, window_bounds = array<i64: 2, 2048>}]} {
    %c0 = arith.constant 0 : index
    %c0_0 = arith.constant 0 : index
    %0 = vector.load %arg1[%c0, %c0_0] : memref<2x32xbf16, #tpu.memory_space<vmem>>, vector<2x32xbf16>
    %c0_1 = arith.constant 0 : index
    %c0_2 = arith.constant 0 : index
    %1 = vector.load %arg2[%c0_1, %c0_2] : memref<32x2048xbf16, #tpu.memory_space<vmem>>, vector<32x2048xbf16>
    %cst = arith.constant dense<0.000000e+00> : vector<2x2048xf32>
    %2 = tpu.matmul %0, %1, %cst {dimension_numbers = #tpu.dot_dimension_numbers<[1], [0], [0], [1], [0, 0, 1, 1], [], []>} : vector<2x32xbf16>, vector<32x2048xbf16>, vector<2x2048xf32> -> vector<2x2048xf32>
    %c0_3 = arith.constant 0 : index
    %c0_4 = arith.constant 0 : index
    %3 = vector.load %arg3[%c0_3, %c0_4] : memref<1x2048xf32, #tpu.memory_space<vmem>>, vector<1x2048xf32>
    %4 = vector.broadcast %3 : vector<1x2048xf32> to vector<2x2048xf32>
    %5 = arith.addf %2, %4 : vector<2x2048xf32>
    %cst_5 = arith.constant 0.000000e+00 : f32
    %6 = vector.broadcast %cst_5 : f32 to vector<2x2048xf32>
    %7 = arith.maximumf %5, %6 : vector<2x2048xf32>
    %8 = arith.truncf %7 : vector<2x2048xf32> to vector<2x2048xbf16>
    %c0_6 = arith.constant 0 : index
    %c0_7 = arith.constant 0 : index
    %9 = vector.load %arg4[%c0_6, %c0_7] : memref<2x2048xbf16, #tpu.memory_space<vmem>>, vector<2x2048xbf16>
    tpu.vector_store %arg4[%c0_6, %c0_7], %8 {strides = array<i32>} : memref<2x2048xbf16, #tpu.memory_space<vmem>>, vector<2x2048xbf16>,
    return
  }
  func.func @transform_0(%arg0: i32) -> (i32, i32) {
    %c0_i32 = arith.constant 0 : i32
    %c0_i32_0 = arith.constant 0 : i32
    return %arg0, %c0_i32 : i32, i32
  }
  func.func @transform_1(%arg0: i32) -> (i32, i32) {
    %c0_i32 = arith.constant 0 : i32
    %c0_i32_0 = arith.constant 0 : i32
    %c0_i32_1 = arith.constant 0 : i32
    return %c0_i32, %c0_i32_0 : i32, i32
  }
  func.func @transform_2(%arg0: i32) -> (i32, i32) {
    %c0_i32 = arith.constant 0 : i32
    %c0_i32_0 = arith.constant 0 : i32
    %c0_i32_1 = arith.constant 0 : i32
    return %c0_i32, %c0_i32_0 : i32, i32
  }
  func.func @transform_3(%arg0: i32) -> (i32, i32) {
    %c0_i32 = arith.constant 0 : i32
    %c0_i32_0 = arith.constant 0 : i32
    return %arg0, %c0_i32 : i32, i32
  }
}

module attributes {stable_mosaic.version = 11 : i64} {
  func.func @_fused_matmul_kernel(%arg0: i32, %arg1: memref<32x1152xbf16, #tpu.memory_space<vmem>>, %arg2: memref<1152x256xbf16, #tpu.memory_space<vmem>>, %arg3: memref<1x256xf32, #tpu.memory_space<vmem>>, %arg4: memref<32x256xbf16, #tpu.memory_space<vmem>>) attributes {dimension_semantics = [#tpu.dimension_semantics<parallel>], iteration_bounds = array<i64: 1>, scalar_prefetch = 0 : i64, scratch_operands = 0 : i64, tpu.core_type = #tpu.core_type<tc>, window_params = [{transform_indices = @transform_0, window_bounds = array<i64: 32, 1152>}, {pipeline_mode = #tpu.pipeline_mode<synchronous>, transform_indices = @transform_1, window_bounds = array<i64: 1152, 256>}, {pipeline_mode = #tpu.pipeline_mode<synchronous>, transform_indices = @transform_2, window_bounds = array<i64: 1, 256>}, {transform_indices = @transform_3, window_bounds = array<i64: 32, 256>}]} {
    %c0 = arith.constant 0 : index
    %c0_0 = arith.constant 0 : index
    %0 = vector.load %arg1[%c0, %c0_0] : memref<32x1152xbf16, #tpu.memory_space<vmem>>, vector<32x1152xbf16>
    %c0_1 = arith.constant 0 : index
    %c0_2 = arith.constant 0 : index
    %1 = vector.load %arg2[%c0_1, %c0_2] : memref<1152x256xbf16, #tpu.memory_space<vmem>>, vector<1152x256xbf16>
    %cst = arith.constant dense<0.000000e+00> : vector<32x256xf32>
    %2 = tpu.matmul %0, %1, %cst {dimension_numbers = #tpu.dot_dimension_numbers<[1], [0], [0], [1], [0, 0, 1, 1], [], []>} : vector<32x1152xbf16>, vector<1152x256xbf16>, vector<32x256xf32> -> vector<32x256xf32>
    %c0_3 = arith.constant 0 : index
    %c0_4 = arith.constant 0 : index
    %3 = vector.load %arg3[%c0_3, %c0_4] : memref<1x256xf32, #tpu.memory_space<vmem>>, vector<1x256xf32>
    %4 = vector.broadcast %3 : vector<1x256xf32> to vector<32x256xf32>
    %5 = arith.addf %2, %4 : vector<32x256xf32>
    %cst_5 = arith.constant 0.000000e+00 : f32
    %6 = vector.broadcast %cst_5 : f32 to vector<32x256xf32>
    %7 = arith.maximumf %5, %6 : vector<32x256xf32>
    %8 = arith.truncf %7 : vector<32x256xf32> to vector<32x256xbf16>
    %c0_6 = arith.constant 0 : index
    %c0_7 = arith.constant 0 : index
    %9 = vector.load %arg4[%c0_6, %c0_7] : memref<32x256xbf16, #tpu.memory_space<vmem>>, vector<32x256xbf16>
    tpu.vector_store %arg4[%c0_6, %c0_7], %8 {strides = array<i32>} : memref<32x256xbf16, #tpu.memory_space<vmem>>, vector<32x256xbf16>,
    return
  }
  func.func @transform_0(%arg0: i32) -> (i32, i32) {
    %c0_i32 = arith.constant 0 : i32
    %c0_i32_0 = arith.constant 0 : i32
    return %arg0, %c0_i32 : i32, i32
  }
  func.func @transform_1(%arg0: i32) -> (i32, i32) {
    %c0_i32 = arith.constant 0 : i32
    %c0_i32_0 = arith.constant 0 : i32
    %c0_i32_1 = arith.constant 0 : i32
    return %c0_i32, %c0_i32_0 : i32, i32
  }
  func.func @transform_2(%arg0: i32) -> (i32, i32) {
    %c0_i32 = arith.constant 0 : i32
    %c0_i32_0 = arith.constant 0 : i32
    %c0_i32_1 = arith.constant 0 : i32
    return %c0_i32, %c0_i32_0 : i32, i32
  }
  func.func @transform_3(%arg0: i32) -> (i32, i32) {
    %c0_i32 = arith.constant 0 : i32
    %c0_i32_0 = arith.constant 0 : i32
    return %arg0, %c0_i32 : i32, i32
  }
}

module attributes {stable_mosaic.version = 11 : i64} {
  func.func @_fused_matmul_kernel(%arg0: i32, %arg1: memref<64x576xbf16, #tpu.memory_space<vmem>>, %arg2: memref<576x128xbf16, #tpu.memory_space<vmem>>, %arg3: memref<1x128xf32, #tpu.memory_space<vmem>>, %arg4: memref<64x128xbf16, #tpu.memory_space<vmem>>) attributes {dimension_semantics = [#tpu.dimension_semantics<parallel>], iteration_bounds = array<i64: 2>, scalar_prefetch = 0 : i64, scratch_operands = 0 : i64, tpu.core_type = #tpu.core_type<tc>, window_params = [{transform_indices = @transform_0, window_bounds = array<i64: 64, 576>}, {pipeline_mode = #tpu.pipeline_mode<synchronous>, transform_indices = @transform_1, window_bounds = array<i64: 576, 128>}, {pipeline_mode = #tpu.pipeline_mode<synchronous>, transform_indices = @transform_2, window_bounds = array<i64: 1, 128>}, {transform_indices = @transform_3, window_bounds = array<i64: 64, 128>}]} {
    %c0 = arith.constant 0 : index
    %c0_0 = arith.constant 0 : index
    %0 = vector.load %arg1[%c0, %c0_0] : memref<64x576xbf16, #tpu.memory_space<vmem>>, vector<64x576xbf16>
    %c0_1 = arith.constant 0 : index
    %c0_2 = arith.constant 0 : index
    %1 = vector.load %arg2[%c0_1, %c0_2] : memref<576x128xbf16, #tpu.memory_space<vmem>>, vector<576x128xbf16>
    %cst = arith.constant dense<0.000000e+00> : vector<64x128xf32>
    %2 = tpu.matmul %0, %1, %cst {dimension_numbers = #tpu.dot_dimension_numbers<[1], [0], [0], [1], [0, 0, 1, 1], [], []>} : vector<64x576xbf16>, vector<576x128xbf16>, vector<64x128xf32> -> vector<64x128xf32>
    %c0_3 = arith.constant 0 : index
    %c0_4 = arith.constant 0 : index
    %3 = vector.load %arg3[%c0_3, %c0_4] : memref<1x128xf32, #tpu.memory_space<vmem>>, vector<1x128xf32>
    %4 = vector.broadcast %3 : vector<1x128xf32> to vector<64x128xf32>
    %5 = arith.addf %2, %4 : vector<64x128xf32>
    %cst_5 = arith.constant 0.000000e+00 : f32
    %6 = vector.broadcast %cst_5 : f32 to vector<64x128xf32>
    %7 = arith.maximumf %5, %6 : vector<64x128xf32>
    %8 = arith.truncf %7 : vector<64x128xf32> to vector<64x128xbf16>
    %c0_6 = arith.constant 0 : index
    %c0_7 = arith.constant 0 : index
    %9 = vector.load %arg4[%c0_6, %c0_7] : memref<64x128xbf16, #tpu.memory_space<vmem>>, vector<64x128xbf16>
    tpu.vector_store %arg4[%c0_6, %c0_7], %8 {strides = array<i32>} : memref<64x128xbf16, #tpu.memory_space<vmem>>, vector<64x128xbf16>,
    return
  }
  func.func @transform_0(%arg0: i32) -> (i32, i32) {
    %c0_i32 = arith.constant 0 : i32
    %c0_i32_0 = arith.constant 0 : i32
    return %arg0, %c0_i32 : i32, i32
  }
  func.func @transform_1(%arg0: i32) -> (i32, i32) {
    %c0_i32 = arith.constant 0 : i32
    %c0_i32_0 = arith.constant 0 : i32
    %c0_i32_1 = arith.constant 0 : i32
    return %c0_i32, %c0_i32_0 : i32, i32
  }
  func.func @transform_2(%arg0: i32) -> (i32, i32) {
    %c0_i32 = arith.constant 0 : i32
    %c0_i32_0 = arith.constant 0 : i32
    %c0_i32_1 = arith.constant 0 : i32
    return %c0_i32, %c0_i32_0 : i32, i32
  }
  func.func @transform_3(%arg0: i32) -> (i32, i32) {
    %c0_i32 = arith.constant 0 : i32
    %c0_i32_0 = arith.constant 0 : i32
    return %arg0, %c0_i32 : i32, i32
  }
}

module attributes {stable_mosaic.version = 11 : i64} {
  func.func @_fused_matmul_kernel(%arg0: i32, %arg1: memref<256x288xbf16, #tpu.memory_space<vmem>>, %arg2: memref<288x128xbf16, #tpu.memory_space<vmem>>, %arg3: memref<1x128xf32, #tpu.memory_space<vmem>>, %arg4: memref<256x128xbf16, #tpu.memory_space<vmem>>) attributes {dimension_semantics = [#tpu.dimension_semantics<parallel>], iteration_bounds = array<i64: 2>, scalar_prefetch = 0 : i64, scratch_operands = 0 : i64, tpu.core_type = #tpu.core_type<tc>, window_params = [{transform_indices = @transform_0, window_bounds = array<i64: 256, 288>}, {pipeline_mode = #tpu.pipeline_mode<synchronous>, transform_indices = @transform_1, window_bounds = array<i64: 288, 128>}, {pipeline_mode = #tpu.pipeline_mode<synchronous>, transform_indices = @transform_2, window_bounds = array<i64: 1, 128>}, {transform_indices = @transform_3, window_bounds = array<i64: 256, 128>}]} {
    %c0 = arith.constant 0 : index
    %c0_0 = arith.constant 0 : index
    %0 = vector.load %arg1[%c0, %c0_0] : memref<256x288xbf16, #tpu.memory_space<vmem>>, vector<256x288xbf16>
    %c0_1 = arith.constant 0 : index
    %c0_2 = arith.constant 0 : index
    %1 = vector.load %arg2[%c0_1, %c0_2] : memref<288x128xbf16, #tpu.memory_space<vmem>>, vector<288x128xbf16>
    %cst = arith.constant dense<0.000000e+00> : vector<256x128xf32>
    %2 = tpu.matmul %0, %1, %cst {dimension_numbers = #tpu.dot_dimension_numbers<[1], [0], [0], [1], [0, 0, 1, 1], [], []>} : vector<256x288xbf16>, vector<288x128xbf16>, vector<256x128xf32> -> vector<256x128xf32>
    %c0_3 = arith.constant 0 : index
    %c0_4 = arith.constant 0 : index
    %3 = vector.load %arg3[%c0_3, %c0_4] : memref<1x128xf32, #tpu.memory_space<vmem>>, vector<1x128xf32>
    %4 = vector.broadcast %3 : vector<1x128xf32> to vector<256x128xf32>
    %5 = arith.addf %2, %4 : vector<256x128xf32>
    %cst_5 = arith.constant 0.000000e+00 : f32
    %6 = vector.broadcast %cst_5 : f32 to vector<256x128xf32>
    %7 = arith.maximumf %5, %6 : vector<256x128xf32>
    %8 = arith.truncf %7 : vector<256x128xf32> to vector<256x128xbf16>
    %c0_6 = arith.constant 0 : index
    %c0_7 = arith.constant 0 : index
    %9 = vector.load %arg4[%c0_6, %c0_7] : memref<256x128xbf16, #tpu.memory_space<vmem>>, vector<256x128xbf16>
    tpu.vector_store %arg4[%c0_6, %c0_7], %8 {strides = array<i32>} : memref<256x128xbf16, #tpu.memory_space<vmem>>, vector<256x128xbf16>,
    return
  }
  func.func @transform_0(%arg0: i32) -> (i32, i32) {
    %c0_i32 = arith.constant 0 : i32
    %c0_i32_0 = arith.constant 0 : i32
    return %arg0, %c0_i32 : i32, i32
  }
  func.func @transform_1(%arg0: i32) -> (i32, i32) {
    %c0_i32 = arith.constant 0 : i32
    %c0_i32_0 = arith.constant 0 : i32
    %c0_i32_1 = arith.constant 0 : i32
    return %c0_i32, %c0_i32_0 : i32, i32
  }
  func.func @transform_2(%arg0: i32) -> (i32, i32) {
    %c0_i32 = arith.constant 0 : i32
    %c0_i32_0 = arith.constant 0 : i32
    %c0_i32_1 = arith.constant 0 : i32
    return %c0_i32, %c0_i32_0 : i32, i32
  }
  func.func @transform_3(%arg0: i32) -> (i32, i32) {
    %c0_i32 = arith.constant 0 : i32
    %c0_i32_0 = arith.constant 0 : i32
    return %arg0, %c0_i32 : i32, i32
  }
}

module attributes {stable_mosaic.version = 11 : i64} {
  func.func @_fused_matmul_kernel(%arg0: i32, %arg1: memref<1024x144xbf16, #tpu.memory_space<vmem>>, %arg2: memref<144x128xbf16, #tpu.memory_space<vmem>>, %arg3: memref<1x128xf32, #tpu.memory_space<vmem>>, %arg4: memref<1024x128xf32, #tpu.memory_space<vmem>>) attributes {dimension_semantics = [#tpu.dimension_semantics<parallel>], iteration_bounds = array<i64: 2>, scalar_prefetch = 0 : i64, scratch_operands = 0 : i64, tpu.core_type = #tpu.core_type<tc>, window_params = [{transform_indices = @transform_0, window_bounds = array<i64: 1024, 144>}, {pipeline_mode = #tpu.pipeline_mode<synchronous>, transform_indices = @transform_1, window_bounds = array<i64: 144, 128>}, {pipeline_mode = #tpu.pipeline_mode<synchronous>, transform_indices = @transform_2, window_bounds = array<i64: 1, 128>}, {transform_indices = @transform_3, window_bounds = array<i64: 1024, 128>}]} {
    %c0 = arith.constant 0 : index
    %c0_0 = arith.constant 0 : index
    %0 = vector.load %arg1[%c0, %c0_0] : memref<1024x144xbf16, #tpu.memory_space<vmem>>, vector<1024x144xbf16>
    %c0_1 = arith.constant 0 : index
    %c0_2 = arith.constant 0 : index
    %1 = vector.load %arg2[%c0_1, %c0_2] : memref<144x128xbf16, #tpu.memory_space<vmem>>, vector<144x128xbf16>
    %cst = arith.constant dense<0.000000e+00> : vector<1024x128xf32>
    %2 = tpu.matmul %0, %1, %cst {dimension_numbers = #tpu.dot_dimension_numbers<[1], [0], [0], [1], [0, 0, 1, 1], [], []>} : vector<1024x144xbf16>, vector<144x128xbf16>, vector<1024x128xf32> -> vector<1024x128xf32>
    %c0_3 = arith.constant 0 : index
    %c0_4 = arith.constant 0 : index
    %3 = vector.load %arg3[%c0_3, %c0_4] : memref<1x128xf32, #tpu.memory_space<vmem>>, vector<1x128xf32>
    %4 = vector.broadcast %3 : vector<1x128xf32> to vector<1024x128xf32>
    %5 = arith.addf %2, %4 : vector<1024x128xf32>
    %6 = math.tanh %5 : vector<1024x128xf32>
    %c0_5 = arith.constant 0 : index
    %c0_6 = arith.constant 0 : index
    %7 = vector.load %arg4[%c0_5, %c0_6] : memref<1024x128xf32, #tpu.memory_space<vmem>>, vector<1024x128xf32>
    tpu.vector_store %arg4[%c0_5, %c0_6], %6 {strides = array<i32>} : memref<1024x128xf32, #tpu.memory_space<vmem>>, vector<1024x128xf32>,
    return
  }
  func.func @transform_0(%arg0: i32) -> (i32, i32) {
    %c0_i32 = arith.constant 0 : i32
    %c0_i32_0 = arith.constant 0 : i32
    return %arg0, %c0_i32 : i32, i32
  }
  func.func @transform_1(%arg0: i32) -> (i32, i32) {
    %c0_i32 = arith.constant 0 : i32
    %c0_i32_0 = arith.constant 0 : i32
    %c0_i32_1 = arith.constant 0 : i32
    return %c0_i32, %c0_i32_0 : i32, i32
  }
  func.func @transform_2(%arg0: i32) -> (i32, i32) {
    %c0_i32 = arith.constant 0 : i32
    %c0_i32_0 = arith.constant 0 : i32
    %c0_i32_1 = arith.constant 0 : i32
    return %c0_i32, %c0_i32_0 : i32, i32
  }
  func.func @transform_3(%arg0: i32) -> (i32, i32) {
    %c0_i32 = arith.constant 0 : i32
    %c0_i32_0 = arith.constant 0 : i32
    return %arg0, %c0_i32 : i32, i32
  }
}

</mosaic_0001>

<bundles_post_ra>
// kernel: _lambda_.5
= control target key start
LH: loop header
LB: loop body
LE: loop exit
PB: predicated region body
PF: predicated region fallthrough
CT: control target
= control target key end

     0   :  { %8 = vsyncpa [#allocation3], 0  ;;  %s1034_s0 = inlined_call_operand.vmem [shape: bf16[2,32], index: 0, kind: input, shape index: {}]   ;;  %s1035_s1 = inlined_call_operand.hbm [shape: bf16[32,2048], index: 1, kind: input, shape index: {}]   ;;  %s1036_s2 = inlined_call_operand.hbm [shape: f32[1,2048], index: 2, kind: input, shape index: {}]   ;;  %s1037_s3 = inlined_call_operand.vmem [shape: bf16[2,2048], index: 3, kind: output, shape index: {}]  }
   0x1   :  { %9 = vsyncpa [#allocation5], 0  ;;  %s908_s12 = smov [#allocation2]   ;;  %s860_s16 = scalar_lea.hbm %s1035_s1, 4096 }
   0x2   :  { %s17_s13 = sshll.u32 %s908_s12, 4  ;;  %p861_p0 = scmp.ne.s32.totalorder %s1035_s1, %s860_s16  ;;  %s18_s13 = int_to_ptr.vmem [resolvable:$true] %s17_s13 }
   0x3   :  { %p864_p1 = scmp.lt.u32.totalorder %s860_s16, %s1035_s1 }
   0x5   :  { %p866_p2 = pnand %p864_p1, %p861_p0 }
   0x7   :  { %869 = shalt.err (!%p866_p2)
}
   0x8   :  { %s870_s21 = scalar_lea.vmem %s18_s13, 4096  ;;  %p875_p4 = scmp.lt.s32.totalorder %s18_s13, %s18_s13 }
   0x9   :  { %p871_p3 = scmp.ne.s32.totalorder %s18_s13, %s870_s21  ;;  %p876_p5 = scmp.lt.s32.totalorder %s870_s21, %s870_s21 }
   0xb   :  { %p877_p6 = por %p876_p5, %p875_p4 }
   0xd   :  { %p878_p7 = pnand %p877_p6, %p871_p3 }
   0xf   :  { %881 = shalt.err (!%p878_p7)
}
  0x10   :  { %s909_s22 = smov 1024   ;;  %s910_s23 = smov 64  }
  0x11   :  { %23 = dma.hbm_to_vmem [thread:$0]  %s1035_s1, 4096, %s18_s13, [#allocation3], %s909_s22, %s909_s22, %s910_s23  }
  0x12   :  { %s911_s26 = smov [#allocation4]   ;;  %s882_s30 = scalar_lea.hbm %s1036_s2, 256 }
  0x13   :  { %s30_s27 = sshll.u32 %s911_s26, 4  ;;  %p883_p8 = scmp.ne.s32.totalorder %s1036_s2, %s882_s30  ;;  %s31_s27 = int_to_ptr.vmem [resolvable:$true] %s30_s27 }
  0x14   :  { %p886_p9 = scmp.lt.u32.totalorder %s882_s30, %s1036_s2 }
  0x16   :  { %p888_p10 = pnand %p886_p9, %p883_p8 }
  0x18   :  { %891 = shalt.err (!%p888_p10)
}
  0x19   :  { %s892_s8 = scalar_lea.vmem %s31_s27, 256  ;;  %p897_p12 = scmp.lt.s32.totalorder %s31_s27, %s31_s27 }
  0x1a   :  { %p893_p11 = scmp.ne.s32.totalorder %s31_s27, %s892_s8  ;;  %p898_p13 = scmp.lt.s32.totalorder %s892_s8, %s892_s8 }
  0x1c   :  { %p899_p0 = por %p898_p13, %p897_p12 }
  0x1e   :  { %p900_p1 = pnand %p899_p0, %p893_p11 }
  0x20   :  { %903 = shalt.err (!%p900_p1)
}
  0x21   :  { %33 = dma.hbm_to_vmem [thread:$0]  %s1036_s2, 256, %s31_s27, [#allocation5]  }
  0x22   :  { %904 = dma.done.wait [#allocation3], 4096  }
  0x23   :  { %905 = vsyncadd [#allocation3], 4294963200 }
  0x24   :  { %906 = dma.done.wait [#allocation5], 256  }
  0x25   :  { %907 = vsyncadd [#allocation5], 4294967040  ;;  %v912_v0 = vmov 0   ;;  %v42_v1 = vld [vmem:[#allocation2] sm:$0xff]  ;;  %v43_v3 = vld [vmem:[#allocation2 + $0x8] sm:$0xff]  ;;  %vm318_vm0 = vcmask 261120  }
  0x26   :  { %354 = vmatprep.mubr.bf16.mxu0 %v912_v0  ;;  %395 = vmatprep.mubr.bf16.mxu1 %v912_v0  ;;  %v50_v2 = vld [vmem:[#allocation2 + $0x40] sm:$0xff]  ;;  %v51_v5 = vld [vmem:[#allocation2 + $0x48] sm:$0xff]  ;;  %v44_v15 = vld [vmem:[#allocation2 + $0x10] sm:$0xff] }
  0x27   :  { %v807_v4 = vcombine.high %v42_v1, %v50_v2  ;;  %v806_v6 = vcombine.low %v42_v1, %v50_v2  ;;  %v58_v7 = vld [vmem:[#allocation2 + $0x80] sm:$0xff]  ;;  %v809_v9 = vcombine.high %v43_v3, %v51_v5  ;;  %v808_v10 = vcombine.low %v43_v3, %v51_v5  ;;  %v59_v12 = vld [vmem:[#allocation2 + $0x88] sm:$0xff]  ;;  %v52_v16 = vld [vmem:[#allocation2 + $0x50] sm:$0xff] }
  0x28   :  { %v66_v8 = vld [vmem:[#allocation2 + $0xc0] sm:$0xff]  ;;  %v67_v13 = vld [vmem:[#allocation2 + $0xc8] sm:$0xff]  ;;  %v45_v17 = vld [vmem:[#allocation2 + $0x18] sm:$0xff]  ;;  %v811_v21 = vcombine.high %v44_v15, %v52_v16  ;;  %v810_v28 = vcombine.low %v44_v15, %v52_v16  ;;  %v78_v3 = vlaneseq }
  0x29   :  { %v823_v11 = vcombine.high %v58_v7, %v66_v8  ;;  %322 = vmatprep.subr.bf16.mxu0 %v807_v4  ;;  %v825_v14 = vcombine.high %v59_v12, %v67_v13  ;;  %363 = vmatprep.subr.bf16.mxu1 %v809_v9  ;;  %v822_v18 = vcombine.low %v58_v7, %v66_v8  ;;  %v53_v19 = vld [vmem:[#allocation2 + $0x58] sm:$0xff]  ;;  %v60_v23 = vld [vmem:[#allocation2 + $0x90] sm:$0xff]  ;;  %v963_v27 = vld [vmem:[%s1034_s0] sm:$0x1]  ;;  %v913_v9 = vmov 1966171168  }
  0x2a   :  { %323 = vmatpush1.bf16.msra.mxu0 %v806_v6  ;;  %364 = vmatpush1.bf16.msra.mxu1 %v808_v10  ;;  %v824_v20 = vcombine.low %v59_v12, %v67_v13  ;;  %v813_v22 = vcombine.high %v45_v17, %v53_v19  ;;  %v68_v24 = vld [vmem:[#allocation2 + $0xd0] sm:$0xff]  ;;  %v61_v25 = vld [vmem:[#allocation2 + $0x98] sm:$0xff]  ;;  %v812_v29 = vcombine.low %v45_v17, %v53_v19  ;;  %v46_v32 = vld [vmem:[#allocation2 + $0x20] sm:$0xff]  ;;  %v987_v4 = vshrl.u32 %v78_v3, 7 }
  0x2b   :  { %324 = vmatprep.subr.bf16.mxu0 %v823_v11  ;;  %365 = vmatprep.subr.bf16.mxu1 %v825_v14  ;;  %v69_v26 = vld [vmem:[#allocation2 + $0xd8] sm:$0xff]  ;;  %v827_v30 = vcombine.high %v60_v23, %v68_v24  ;;  %v54_v33 = vld [vmem:[#allocation2 + $0x60] sm:$0xff]  ;;  %v47_v34 = vld [vmem:[#allocation2 + $0x28] sm:$0xff]  ;;  %v826_v36 = vcombine.low %v60_v23, %v68_v24  ;;  %v703_v10 = vunpack.c.l.s4 %v913_v9 }
  0x2c   :  { %v829_v31 = vcombine.high %v61_v25, %v69_v26  ;;  %v55_v35 = vld [vmem:[#allocation2 + $0x68] sm:$0xff]  ;;  %v828_v37 = vcombine.low %v61_v25, %v69_v26  ;;  %v815_v38 = vcombine.high %v46_v32, %v54_v33  ;;  %v62_v40 = vld [vmem:[#allocation2 + $0xa0] sm:$0xff]  ;;  %v814_v44 = vcombine.low %v46_v32, %v54_v33  ;;  %v48_v48 = vld [vmem:[#allocation2 + $0x30] sm:$0xff] }
  0x2d   :  { %v817_v39 = vcombine.high %v47_v34, %v55_v35  ;;  %v70_v41 = vld [vmem:[#allocation2 + $0xe0] sm:$0xff]  ;;  %v63_v42 = vld [vmem:[#allocation2 + $0xa8] sm:$0xff]  ;;  %v816_v45 = vcombine.low %v47_v34, %v55_v35  ;;  %v56_v49 = vld [vmem:[#allocation2 + $0x70] sm:$0xff]  ;;  %v80_v5 = vsub.s32 0, %v987_v4  ;;  %v88_v7 = vsub.s32 2, %v987_v4 }
  0x2e   :  { %325 = vmatpush1.bf16.msra.mxu0 %v822_v18  ;;  %366 = vmatpush1.bf16.msra.mxu1 %v824_v20  ;;  %v71_v43 = vld [vmem:[#allocation2 + $0xe8] sm:$0xff]  ;;  %v831_v46 = vcombine.high %v62_v40, %v70_v41  ;;  %v49_v50 = vld [vmem:[#allocation2 + $0x38] sm:$0xff]  ;;  %v830_v52 = vcombine.low %v62_v40, %v70_v41  ;;  %v819_v54 = vcombine.high %v48_v48, %v56_v49  ;;  %v64_v56 = vld [vmem:[#allocation2 + $0xb0] sm:$0xff]  ;;  %v84_v8 = vsub.s32 1, %v987_v4 }
  0x2f   :  { %404 = vmatprep.subr.bf16.mxu0 %v811_v21  ;;  %445 = vmatprep.subr.bf16.mxu1 %v813_v22  ;;  %v833_v47 = vcombine.high %v63_v42, %v71_v43  ;;  %v57_v51 = vld [vmem:[#allocation2 + $0x78] sm:$0xff]  ;;  %v832_v53 = vcombine.low %v63_v42, %v71_v43  ;;  %v72_v57 = vld [vmem:[#allocation2 + $0xf0] sm:$0xff]  ;;  %v818_v60 = vcombine.low %v48_v48, %v56_v49  ;;  %v74_v6 = vld [vmem:[#allocation4] sm:$0xff]  ;;  %v704_v16 = vunpack.c.0.s8 %v703_v10 }
  0x30   :  { %v821_v55 = vcombine.high %v49_v50, %v57_v51  ;;  %v65_v58 = vld [vmem:[#allocation2 + $0xb8] sm:$0xff]  ;;  %v820_v61 = vcombine.low %v49_v50, %v57_v51  ;;  %v835_v62 = vcombine.high %v64_v56, %v72_v57  ;;  %v834_v1 = vcombine.low %v64_v56, %v72_v57 }
  0x31   :  { %838 = vmatmul.mubr.msk.bf16.vlgmr.msra.gmra.mrb[0].mxu0 %vm318_vm0, %v963_v27  ;;  %839 = vmatmul.mubr.msk.bf16.vlgmr.msra.gmra.mrb[0].mxu1 %vm318_vm0, %v963_v27  ;;  %v73_v59 = vld [vmem:[#allocation2 + $0xf8] sm:$0xff]  ;;  %v81_v11 = vrot.slane %v74_v6, %v80_v5  ;;  %v89_v12 = vrot.slane %v74_v6, %v88_v7  ;;  %v85_v13 = vrot.slane %v74_v6, %v84_v8  ;;  %v96_v20 = vsub.s32 4, %v987_v4 }
  0x32   :  { %405 = vmatpush1.bf16.msra.mxu0 %v810_v28  ;;  %446 = vmatpush1.bf16.msra.mxu1 %v812_v29  ;;  %v837_v63 = vcombine.high %v65_v58, %v73_v59  ;;  %v836_v2 = vcombine.low %v65_v58, %v73_v59  ;;  %v104_v25 = vsub.s32 6, %v987_v4  ;;  %v100_v26 = vsub.s32 5, %v987_v4 }
  0x33   :  { %406 = vmatprep.subr.bf16.mxu0 %v827_v30  ;;  %447 = vmatprep.subr.bf16.mxu1 %v829_v31  ;;  %v108_v31 = vsub.s32 7, %v987_v4  ;;  %v998_v34 = vsub.s32 %v704_v16, %v987_v4 }
  0x34   :  { %436 = vmatprep.mubr.bf16.mxu0 %v912_v0  ;;  %477 = vmatprep.mubr.bf16.mxu1 %v912_v0  ;;  %v101_v40 = vrot.slane %v74_v6, %v100_v26 }
  0x35   :  { %v109_v42 = vrot.slane %v74_v6, %v108_v31 }
  0x36   :  { %407 = vmatpush1.bf16.msra.mxu0 %v826_v36  ;;  %448 = vmatpush1.bf16.msra.mxu1 %v828_v37  ;;  %v97_v37 = vrot.slane %v74_v6, %v96_v20 }
  0x37   :  { %486 = vmatprep.subr.bf16.mxu0 %v815_v38  ;;  %527 = vmatprep.subr.bf16.mxu1 %v817_v39  ;;  %v105_v39 = vrot.slane %v74_v6, %v104_v25 }
  0x39   :  { %840 = vmatmul.mubr.msk.bf16.vlgmr.msra.gmra.mrb[4].mxu0 %vm318_vm0, %v963_v27  ;;  %841 = vmatmul.mubr.msk.bf16.vlgmr.msra.gmra.mrb[4].mxu1 %vm318_vm0, %v963_v27 }
  0x3a   :  { %487 = vmatpush1.bf16.msra.mxu0 %v814_v44  ;;  %528 = vmatpush1.bf16.msra.mxu1 %v816_v45 }
  0x3b   :  { %488 = vmatprep.subr.bf16.mxu0 %v831_v46  ;;  %529 = vmatprep.subr.bf16.mxu1 %v833_v47 }
  0x3c   :  { %518 = vmatprep.mubr.bf16.mxu0 %v912_v0  ;;  %559 = vmatprep.mubr.bf16.mxu1 %v912_v0 }
  0x3e   :  { %489 = vmatpush1.bf16.msra.mxu0 %v830_v52  ;;  %530 = vmatpush1.bf16.msra.mxu1 %v832_v53  ;;  %v75_v53 = vld [vmem:[#allocation4 + $0x8] sm:$0xff] }
  0x3f   :  { %568 = vmatprep.subr.bf16.mxu0 %v819_v54  ;;  %609 = vmatprep.subr.bf16.mxu1 %v821_v55  ;;  %v117_v3 = vrot.slane %v75_v53, %v84_v8 }
  0x41   :  { %842 = vmatmul.mubr.msk.bf16.vlgmr.msra.gmra.mrb[8].mxu0 %vm318_vm0, %v963_v27  ;;  %843 = vmatmul.mubr.msk.bf16.vlgmr.msra.gmra.mrb[8].mxu1 %vm318_vm0, %v963_v27 }
  0x42   :  { %569 = vmatpush1.bf16.msra.mxu0 %v818_v60  ;;  %610 = vmatpush1.bf16.msra.mxu1 %v820_v61 }
  0x43   :  { %570 = vmatprep.subr.bf16.mxu0 %v835_v62  ;;  %611 = vmatprep.subr.bf16.mxu1 %v837_v63  ;;  %v113_v63 = vrot.slane %v75_v53, %v80_v5 }
  0x44   :  { %600 = vmatprep.mubr.bf16.mxu0 %v912_v0  ;;  %641 = vmatprep.mubr.bf16.mxu1 %v912_v0  ;;  %v92_v0 = vsub.s32 3, %v987_v4 }
  0x46   :  { %571 = vmatpush1.bf16.msra.mxu0 %v834_v1  ;;  %612 = vmatpush1.bf16.msra.mxu1 %v836_v2  ;;  %v93_v14 = vrot.slane %v74_v6, %v92_v0  ;;  %v121_v2 = vrot.slane %v75_v53, %v88_v7  ;;  %v125_v9 = vrot.slane %v75_v53, %v92_v0 }
  0x49   :  { %844 = vmatmul.mubr.msk.bf16.vlgmr.msra.gmra.mrb[12].mxu0 %vm318_vm0, %v963_v27  ;;  %845 = vmatmul.mubr.msk.bf16.vlgmr.msra.gmra.mrb[12].mxu1 %vm318_vm0, %v963_v27 }
 0x104   :  { %v356_v15 = vpop.f32.mrb[0].mxu0  ;;  %v397_v18 = vpop.f32.mrb[0].mxu1 }
 0x105   :  { %v357_v17 = vadd.f32 %v356_v15, %v81_v11  ;;  %v358_v19 = vpop.f32.mrb[1].mxu0  ;;  %v398_v21 = vadd.f32 %v397_v18, %v89_v12  ;;  %v399_v23 = vpop.f32.mrb[1].mxu1 }
 0x106   :  { %v359_v22 = vadd.f32 %v358_v19, %v85_v13  ;;  %v360_v24 = vpop.f32.mrb[2].mxu0  ;;  %v400_v28 = vadd.f32 %v399_v23, %v93_v14  ;;  %v401_v29 = vpop.f32.mrb[2].mxu1 }
 0x107   :  { %v650_v27 = vmax.f32 %v357_v17, 0.0  ;;  %v361_v30 = vpop.f32.mrb[3].mxu0  ;;  %v652_v32 = vmax.f32 %v398_v21, 0.0  ;;  %v402_v35 = vpop.f32.mrb[3].mxu1 }
 0x108   :  { %v651_v33 = vmax.f32 %v359_v22, 0.0  ;;  %v653_v36 = vmax.f32 %v400_v28, 0.0  ;;  %v129_v30 = vrot.slane %v75_v53, %v96_v20  ;;  %v133_v35 = vrot.slane %v75_v53, %v100_v26 }
 0x10a   :  { %v846_v38 = vpack.c.bf16 %v651_v33, %v650_v27  ;;  %v847_v41 = vpack.c.bf16 %v653_v36, %v652_v32  ;;  %v137_v33 = vrot.slane %v75_v53, %v104_v25 }
 0x10c   :  { %v708_v43 = vrot.slane %v846_v38, %v998_v34  ;;  %v438_v44 = vpop.f32.mrb[4].mxu0  ;;  %v715_v45 = vrot.slane %v847_v41, %v998_v34  ;;  %v479_v47 = vpop.f32.mrb[4].mxu1  ;;  %v141_v38 = vrot.slane %v75_v53, %v108_v31 }
 0x10d   :  { %v439_v46 = vadd.f32 %v438_v44, %v97_v37  ;;  %v440_v48 = vpop.f32.mrb[5].mxu0  ;;  %v480_v49 = vadd.f32 %v479_v47, %v105_v39  ;;  %v481_v51 = vpop.f32.mrb[5].mxu1 }
 0x10e   :  { %v441_v50 = vadd.f32 %v440_v48, %v101_v40  ;;  %v442_v52 = vpop.f32.mrb[6].mxu0  ;;  %v730_v54 = vcombine.low %v708_v43, %v715_v45  ;;  %v482_v56 = vadd.f32 %v481_v51, %v109_v42  ;;  %v483_v57 = vpop.f32.mrb[6].mxu1 }
 0x10f   :  { %v654_v55 = vmax.f32 %v439_v46, 0.0  ;;  %v443_v58 = vpop.f32.mrb[7].mxu0  ;;  %v656_v59 = vmax.f32 %v480_v49, 0.0  ;;  %v484_v61 = vpop.f32.mrb[7].mxu1 }
 0x110   :  { %v655_v60 = vmax.f32 %v441_v50, 0.0  ;;  %v657_v62 = vmax.f32 %v482_v56, 0.0  ;;  %v738_v27 = vrot.slane %v730_v54, %v998_v34 }
 0x112   :  { %v848_v1 = vpack.c.bf16 %v655_v60, %v654_v55  ;;  %v849_v6 = vpack.c.bf16 %v657_v62, %v656_v59 }
 0x114   :  { %v722_v10 = vrot.slane %v848_v1, %v998_v34  ;;  %v520_v11 = vpop.f32.mrb[8].mxu0  ;;  %v729_v12 = vrot.slane %v849_v6, %v998_v34  ;;  %v561_v14 = vpop.f32.mrb[8].mxu1 }
 0x115   :  { %v521_v13 = vadd.f32 %v520_v11, %v113_v63  ;;  %v522_v15 = vpop.f32.mrb[9].mxu0  ;;  %v562_v16 = vadd.f32 %v561_v14, %v121_v2  ;;  %v563_v18 = vpop.f32.mrb[9].mxu1 }
 0x116   :  { %v523_v17 = vadd.f32 %v522_v15, %v117_v3  ;;  %v524_v19 = vpop.f32.mrb[10].mxu0  ;;  %v731_v21 = vcombine.low %v722_v10, %v729_v12  ;;  %v564_v5 = vadd.f32 %v563_v18, %v125_v9  ;;  %v565_v23 = vpop.f32.mrb[10].mxu1 }
 0x117   :  { %v658_v22 = vmax.f32 %v521_v13, 0.0  ;;  %v525_v7 = vpop.f32.mrb[11].mxu0  ;;  %v660_v8 = vmax.f32 %v562_v16, 0.0  ;;  %v566_v0 = vpop.f32.mrb[11].mxu1 }
 0x118   :  { %v659_v24 = vmax.f32 %v523_v17, 0.0  ;;  %v745_v28 = vrot.slane %v731_v21, %v998_v34  ;;  %v661_v29 = vmax.f32 %v564_v5, 0.0 }
 0x11a   :  { %v850_v32 = vpack.c.bf16 %v659_v24, %v658_v22  ;;  %v746_v36 = vcombine.low %v738_v27, %v745_v28  ;;  %v851_v37 = vpack.c.bf16 %v661_v29, %v660_v8 }
 0x11c   :  { %v757_v39 = vrot.slane %v850_v32, %v998_v34  ;;  %v602_v40 = vpop.f32.mrb[12].mxu0  ;;  %798 = vst [vmem:[%s1037_s3] sm:$0xff] %v746_v36  ;;  %v764_v20 = vrot.slane %v851_v37, %v998_v34  ;;  %v643_v42 = vpop.f32.mrb[12].mxu1 }
 0x11d   :  { %v603_v41 = vadd.f32 %v602_v40, %v129_v30  ;;  %v604_v25 = vpop.f32.mrb[13].mxu0  ;;  %v644_v43 = vadd.f32 %v643_v42, %v137_v33  ;;  %v645_v26 = vpop.f32.mrb[13].mxu1 }
 0x11e   :  { %v605_v44 = vadd.f32 %v604_v25, %v133_v35  ;;  %v606_v45 = vpop.f32.mrb[14].mxu0  ;;  %v779_v46 = vcombine.low %v757_v39, %v764_v20  ;;  %v646_v4 = vadd.f32 %v645_v26, %v141_v38  ;;  %v647_v31 = vpop.f32.mrb[14].mxu1 }
 0x11f   :  { %v662_v47 = vmax.f32 %v603_v41, 0.0  ;;  %v607_v48 = vpop.f32.mrb[15].mxu0  ;;  %v664_v49 = vmax.f32 %v644_v43, 0.0  ;;  %v648_v51 = vpop.f32.mrb[15].mxu1 }
 0x120   :  { %v663_v50 = vmax.f32 %v605_v44, 0.0  ;;  %v665_v52 = vmax.f32 %v646_v4, 0.0  ;;  %v787_v58 = vrot.slane %v779_v46, %v998_v34 }
 0x122   :  { %v852_v53 = vpack.c.bf16 %v663_v50, %v662_v47  ;;  %v853_v54 = vpack.c.bf16 %v665_v52, %v664_v49 }
 0x124   :  { %v771_v55 = vrot.slane %v852_v53, %v998_v34  ;;  %v778_v56 = vrot.slane %v853_v54, %v998_v34 }
 0x126   :  { %v780_v57 = vcombine.low %v771_v55, %v778_v56 }
 0x128   :  { %v794_v59 = vrot.slane %v780_v57, %v998_v34 }
 0x12a   :  { %v795_v60 = vcombine.low %v787_v58, %v794_v59 }
 0x12c   :  { %799 = vst [vmem:[%s1037_s3 + $0x8] sm:$0xff] %v795_v60 }
 0x12d   :  { %804 = vsyncpa [#allocation3], 1 }
 0x12e   :  { %805 = vsyncpa [#allocation5], 1 }

// kernel: _lambda_.6
= control target key start
LH: loop header
LB: loop body
LE: loop exit
PB: predicated region body
PF: predicated region fallthrough
CT: control target
= control target key end

     0   :  { %8 = vsyncpa [#allocation3], 0  ;;  %s1972_s0 = inlined_call_operand.vmem [shape: bf16[32,1152], index: 0, kind: input, shape index: {}]   ;;  %s1973_s1 = inlined_call_operand.hbm [shape: bf16[1152,256], index: 1, kind: input, shape index: {}]   ;;  %s1974_s2 = inlined_call_operand.hbm [shape: f32[1,256], index: 2, kind: input, shape index: {}]   ;;  %s1975_s3 = inlined_call_operand.vmem [shape: bf16[32,256], index: 3, kind: output, shape index: {}]  }
   0x1   :  { %9 = vsyncpa [#allocation5], 0  ;;  %s1857_s12 = smov [#allocation2]   ;;  %s1809_s16 = scalar_lea.hbm %s1973_s1, 18432 }
   0x2   :  { %s17_s13 = sshll.u32 %s1857_s12, 4  ;;  %p1810_p0 = scmp.ne.s32.totalorder %s1973_s1, %s1809_s16  ;;  %s18_s13 = int_to_ptr.vmem [resolvable:$true] %s17_s13 }
   0x3   :  { %p1813_p1 = scmp.lt.u32.totalorder %s1809_s16, %s1973_s1 }
   0x5   :  { %p1815_p2 = pnand %p1813_p1, %p1810_p0 }
   0x7   :  { %1818 = shalt.err (!%p1815_p2)
}
   0x8   :  { %s1819_s21 = scalar_lea.vmem %s18_s13, 18432  ;;  %p1824_p4 = scmp.lt.s32.totalorder %s18_s13, %s18_s13 }
   0x9   :  { %p1820_p3 = scmp.ne.s32.totalorder %s18_s13, %s1819_s21  ;;  %p1825_p5 = scmp.lt.s32.totalorder %s1819_s21, %s1819_s21 }
   0xb   :  { %p1826_p6 = por %p1825_p5, %p1824_p4 }
   0xd   :  { %p1827_p7 = pnand %p1826_p6, %p1820_p3 }
   0xf   :  { %1830 = shalt.err (!%p1827_p7)
}
  0x10   :  { %s1858_s22 = smov 128   ;;  %s1859_s23 = smov 8  }
  0x11   :  { %23 = dma.hbm_to_vmem [thread:$0]  %s1973_s1, 18432, %s18_s13, [#allocation3], %s1858_s22, %s1858_s22, %s1859_s23  }
  0x12   :  { %s1860_s26 = smov [#allocation4]   ;;  %s1831_s30 = scalar_lea.hbm %s1974_s2, 32 }
  0x13   :  { %s30_s27 = sshll.u32 %s1860_s26, 4  ;;  %p1832_p8 = scmp.ne.s32.totalorder %s1974_s2, %s1831_s30  ;;  %s31_s27 = int_to_ptr.vmem [resolvable:$true] %s30_s27 }
  0x14   :  { %p1835_p9 = scmp.lt.u32.totalorder %s1831_s30, %s1974_s2 }
  0x16   :  { %p1837_p10 = pnand %p1835_p9, %p1832_p8 }
  0x18   :  { %1840 = shalt.err (!%p1837_p10)
}
  0x19   :  { %s1841_s8 = scalar_lea.vmem %s31_s27, 32  ;;  %p1846_p12 = scmp.lt.s32.totalorder %s31_s27, %s31_s27 }
  0x1a   :  { %p1842_p11 = scmp.ne.s32.totalorder %s31_s27, %s1841_s8  ;;  %p1847_p13 = scmp.lt.s32.totalorder %s1841_s8, %s1841_s8 }
  0x1c   :  { %p1848_p0 = por %p1847_p13, %p1846_p12 }
  0x1e   :  { %p1849_p1 = pnand %p1848_p0, %p1842_p11 }
  0x20   :  { %1852 = shalt.err (!%p1849_p1)
}
  0x21   :  { %33 = dma.hbm_to_vmem [thread:$0]  %s1974_s2, 32, %s31_s27, [#allocation5]  }
  0x22   :  { %1853 = dma.done.wait [#allocation3], 18432  }
  0x23   :  { %1854 = vsyncadd [#allocation3], 4294948864 }
  0x24   :  { %1855 = dma.done.wait [#allocation5], 32  }
  0x25   :  { %1856 = vsyncadd [#allocation5], 4294967264  ;;  %v1567_v0 = vld [vmem:[#allocation2 + $0x4] ss:$8 sps:$4 sm:$0xff]   ;;  %v1571_v2 = vld [vmem:[#allocation2] ss:$8 sps:$4 sm:$0xff]  }
  0x26   :  { %v1569_v1 = vld [vmem:[#allocation2 + $0x204] ss:$8 sps:$4 sm:$0xff]   ;;  %1029 = vmatprep.subr.bf16.mxu1 %v1567_v0  ;;  %v1572_v3 = vld [vmem:[#allocation2 + $0x200] ss:$8 sps:$4 sm:$0xff]   ;;  %v1573_v4 = vld [vmem:[#allocation2 + $0x14] ss:$8 sps:$4 sm:$0xff]  }
  0x27   :  { %1135 = vmatprep.subr.bf16.mxu0 %v1569_v1  ;;  %1030 = vmatpush1.bf16.msra.mxu1 %v1571_v2  ;;  %v1575_v5 = vld [vmem:[#allocation2 + $0x214] ss:$8 sps:$4 sm:$0xff]   ;;  %v1577_v6 = vld [vmem:[#allocation2 + $0x10] ss:$8 sps:$4 sm:$0xff]   ;;  %v1579_v8 = vld [vmem:[#allocation2 + $0x24] ss:$8 sps:$4 sm:$0xff]  }
  0x28   :  { %1136 = vmatpush1.bf16.msra.mxu0 %v1572_v3  ;;  %1031 = vmatprep.subr.bf16.mxu1 %v1573_v4  ;;  %v1578_v7 = vld [vmem:[#allocation2 + $0x210] ss:$8 sps:$4 sm:$0xff]   ;;  %v1581_v9 = vld [vmem:[#allocation2 + $0x224] ss:$8 sps:$4 sm:$0xff]   ;;  %v1583_v10 = vld [vmem:[#allocation2 + $0x20] ss:$8 sps:$4 sm:$0xff]  }
  0x29   :  { %1137 = vmatprep.subr.bf16.mxu0 %v1575_v5  ;;  %v1584_v11 = vld [vmem:[#allocation2 + $0x220] ss:$8 sps:$4 sm:$0xff]   ;;  %v1585_v12 = vld [vmem:[#allocation2 + $0x34] ss:$8 sps:$4 sm:$0xff]   ;;  %v1589_v14 = vld [vmem:[#allocation2 + $0x30] ss:$8 sps:$4 sm:$0xff]  }
  0x2a   :  { %v1587_v13 = vld [vmem:[#allocation2 + $0x234] ss:$8 sps:$4 sm:$0xff]   ;;  %v1590_v15 = vld [vmem:[#allocation2 + $0x230] ss:$8 sps:$4 sm:$0xff]   ;;  %v1591_v16 = vld [vmem:[#allocation2 + $0x44] ss:$8 sps:$4 sm:$0xff]  }
  0x2b   :  { %1032 = vmatpush1.bf16.msra.mxu1 %v1577_v6  ;;  %v1593_v17 = vld [vmem:[#allocation2 + $0x244] ss:$8 sps:$4 sm:$0xff]   ;;  %v1595_v18 = vld [vmem:[#allocation2 + $0x40] ss:$8 sps:$4 sm:$0xff]   ;;  %v1597_v20 = vld [vmem:[#allocation2 + $0x54] ss:$8 sps:$4 sm:$0xff]  }
  0x2c   :  { %1138 = vmatpush1.bf16.msra.mxu0 %v1578_v7  ;;  %1033 = vmatprep.subr.bf16.mxu1 %v1579_v8  ;;  %v1596_v19 = vld [vmem:[#allocation2 + $0x240] ss:$8 sps:$4 sm:$0xff]   ;;  %v1599_v21 = vld [vmem:[#allocation2 + $0x254] ss:$8 sps:$4 sm:$0xff]   ;;  %v1601_v22 = vld [vmem:[#allocation2 + $0x50] ss:$8 sps:$4 sm:$0xff]  }
  0x2d   :  { %1139 = vmatprep.subr.bf16.mxu0 %v1581_v9  ;;  %v1602_v23 = vld [vmem:[#allocation2 + $0x250] ss:$8 sps:$4 sm:$0xff]   ;;  %v1603_v24 = vld [vmem:[#allocation2 + $0x64] ss:$8 sps:$4 sm:$0xff]   ;;  %v1607_v26 = vld [vmem:[#allocation2 + $0x60] ss:$8 sps:$4 sm:$0xff]  }
  0x2e   :  { %v1605_v25 = vld [vmem:[#allocation2 + $0x264] ss:$8 sps:$4 sm:$0xff]   ;;  %v1608_v27 = vld [vmem:[#allocation2 + $0x260] ss:$8 sps:$4 sm:$0xff]   ;;  %v1609_v28 = vld [vmem:[#allocation2 + $0x74] ss:$8 sps:$4 sm:$0xff]  }
  0x2f   :  { %1034 = vmatpush1.bf16.msra.mxu1 %v1583_v10  ;;  %v1611_v29 = vld [vmem:[#allocation2 + $0x274] ss:$8 sps:$4 sm:$0xff]   ;;  %v1613_v30 = vld [vmem:[#allocation2 + $0x70] ss:$8 sps:$4 sm:$0xff]   ;;  %v1615_v32 = vld [vmem:[#allocation2 + $0x84] ss:$8 sps:$4 sm:$0xff]  }
  0x30   :  { %1140 = vmatpush1.bf16.msra.mxu0 %v1584_v11  ;;  %1035 = vmatprep.subr.bf16.mxu1 %v1585_v12  ;;  %v1614_v31 = vld [vmem:[#allocation2 + $0x270] ss:$8 sps:$4 sm:$0xff]   ;;  %v1617_v33 = vld [vmem:[#allocation2 + $0x284] ss:$8 sps:$4 sm:$0xff]   ;;  %v1619_v34 = vld [vmem:[#allocation2 + $0x80] ss:$8 sps:$4 sm:$0xff]  }
  0x31   :  { %1141 = vmatprep.subr.bf16.mxu0 %v1587_v13  ;;  %v1620_v35 = vld [vmem:[#allocation2 + $0x280] ss:$8 sps:$4 sm:$0xff]   ;;  %v1621_v36 = vld [vmem:[#allocation2 + $0x94] ss:$8 sps:$4 sm:$0xff]   ;;  %v1625_v38 = vld [vmem:[#allocation2 + $0x90] ss:$8 sps:$4 sm:$0xff]  }
  0x32   :  { %v1623_v37 = vld [vmem:[#allocation2 + $0x294] ss:$8 sps:$4 sm:$0xff]   ;;  %v1626_v39 = vld [vmem:[#allocation2 + $0x290] ss:$8 sps:$4 sm:$0xff]   ;;  %v1627_v40 = vld [vmem:[#allocation2 + $0xa4] ss:$8 sps:$4 sm:$0xff]  }
  0x33   :  { %1036 = vmatpush1.bf16.msra.mxu1 %v1589_v14  ;;  %v1629_v41 = vld [vmem:[#allocation2 + $0x2a4] ss:$8 sps:$4 sm:$0xff]   ;;  %v1631_v42 = vld [vmem:[#allocation2 + $0xa0] ss:$8 sps:$4 sm:$0xff]   ;;  %v1633_v44 = vld [vmem:[#allocation2 + $0xb4] ss:$8 sps:$4 sm:$0xff]  }
  0x34   :  { %1142 = vmatpush1.bf16.msra.mxu0 %v1590_v15  ;;  %1037 = vmatprep.subr.bf16.mxu1 %v1591_v16  ;;  %v1632_v43 = vld [vmem:[#allocation2 + $0x2a0] ss:$8 sps:$4 sm:$0xff]   ;;  %v1635_v45 = vld [vmem:[#allocation2 + $0x2b4] ss:$8 sps:$4 sm:$0xff]   ;;  %v1637_v46 = vld [vmem:[#allocation2 + $0xb0] ss:$8 sps:$4 sm:$0xff]  }
  0x35   :  { %1143 = vmatprep.subr.bf16.mxu0 %v1593_v17  ;;  %v1638_v47 = vld [vmem:[#allocation2 + $0x2b0] ss:$8 sps:$4 sm:$0xff]   ;;  %v1665_v48 = vld [vmem:[%s1972_s0 + $0x4] ss:$36 sps:$4 sm:$0xff]   ;;  %v1645_v54 = vld [vmem:[#allocation2 + $0xd4] ss:$8 sps:$4 sm:$0xff]  }
  0x36   :  { %v1639_v49 = vld [vmem:[#allocation2 + $0xc4] ss:$8 sps:$4 sm:$0xff]   ;;  %1061 = vmatprep.mubr.bf16.mxu1 %v1665_v48  ;;  %v1671_v51 = vld [vmem:[%s1972_s0 + $0x14] ss:$36 sps:$4 sm:$0xff]   ;;  %v1643_v52 = vld [vmem:[#allocation2 + $0xc0] ss:$8 sps:$4 sm:$0xff]  }
  0x37   :  { %1038 = vmatpush1.bf16.msra.mxu1 %v1595_v18  ;;  %v1641_v50 = vld [vmem:[#allocation2 + $0x2c4] ss:$8 sps:$4 sm:$0xff]   ;;  %v1644_v53 = vld [vmem:[#allocation2 + $0x2c0] ss:$8 sps:$4 sm:$0xff]   ;;  %v1647_v55 = vld [vmem:[#allocation2 + $0x2d4] ss:$8 sps:$4 sm:$0xff]   ;;  %1167 = vmatprep.mubr.bf16.mxu0 %v1671_v51 }
  0x38   :  { %1144 = vmatpush1.bf16.msra.mxu0 %v1596_v19  ;;  %1039 = vmatprep.subr.bf16.mxu1 %v1597_v20  ;;  %v1649_v56 = vld [vmem:[#allocation2 + $0xd0] ss:$8 sps:$4 sm:$0xff]   ;;  %v1651_v58 = vld [vmem:[#allocation2 + $0xe4] ss:$8 sps:$4 sm:$0xff]   ;;  %v1655_v60 = vld [vmem:[#allocation2 + $0xe0] ss:$8 sps:$4 sm:$0xff]  }
  0x39   :  { %1145 = vmatprep.subr.bf16.mxu0 %v1599_v21  ;;  %v1650_v57 = vld [vmem:[#allocation2 + $0x2d0] ss:$8 sps:$4 sm:$0xff]   ;;  %v1653_v59 = vld [vmem:[#allocation2 + $0x2e4] ss:$8 sps:$4 sm:$0xff]   ;;  %v1656_v61 = vld [vmem:[#allocation2 + $0x2e0] ss:$8 sps:$4 sm:$0xff]  }
  0x3a   :  { %v1657_v62 = vld [vmem:[#allocation2 + $0xf4] ss:$8 sps:$4 sm:$0xff]   ;;  %v1661_v0 = vld [vmem:[#allocation2 + $0xf0] ss:$8 sps:$4 sm:$0xff]   ;;  %v1668_v2 = vld [vmem:[#allocation2 + $0x104] ss:$8 sps:$4 sm:$0xff]  }
  0x3b   :  { %1040 = vmatpush1.bf16.msra.mxu1 %v1601_v22  ;;  %v1659_v63 = vld [vmem:[#allocation2 + $0x2f4] ss:$8 sps:$4 sm:$0xff]   ;;  %v1662_v1 = vld [vmem:[#allocation2 + $0x2f0] ss:$8 sps:$4 sm:$0xff]   ;;  %v1674_v3 = vld [vmem:[#allocation2 + $0x304] ss:$8 sps:$4 sm:$0xff]  }
  0x3c   :  { %1146 = vmatpush1.bf16.msra.mxu0 %v1602_v23  ;;  %1041 = vmatprep.subr.bf16.mxu1 %v1603_v24  ;;  %v1663_v4 = vld [vmem:[%s1972_s0] ss:$36 sps:$4 sm:$0xff]   ;;  %v1669_v6 = vld [vmem:[%s1972_s0 + $0x10] ss:$36 sps:$4 sm:$0xff]  }
  0x3d   :  { %1147 = vmatprep.subr.bf16.mxu0 %v1605_v25  ;;  %v1666_v5 = vld [vmem:[#allocation2 + $0x100] ss:$8 sps:$4 sm:$0xff]   ;;  %v1677_v8 = vld [vmem:[#allocation2 + $0x114] ss:$8 sps:$4 sm:$0xff]   ;;  %v1675_v10 = vld [vmem:[#allocation2 + $0x110] ss:$8 sps:$4 sm:$0xff]  }
  0x3e   :  { %v1672_v7 = vld [vmem:[#allocation2 + $0x300] ss:$8 sps:$4 sm:$0xff]   ;;  %v1680_v9 = vld [vmem:[#allocation2 + $0x314] ss:$8 sps:$4 sm:$0xff]   ;;  %v1678_v11 = vld [vmem:[#allocation2 + $0x310] ss:$8 sps:$4 sm:$0xff]  }
  0x3f   :  { %1042 = vmatpush1.bf16.msra.mxu1 %v1607_v26  ;;  %v1683_v12 = vld [vmem:[#allocation2 + $0x124] ss:$8 sps:$4 sm:$0xff]   ;;  %v1681_v14 = vld [vmem:[#allocation2 + $0x120] ss:$8 sps:$4 sm:$0xff]   ;;  %v1689_v16 = vld [vmem:[#allocation2 + $0x134] ss:$8 sps:$4 sm:$0xff]  }
  0x40   :  { %1148 = vmatpush1.bf16.msra.mxu0 %v1608_v27  ;;  %1043 = vmatprep.subr.bf16.mxu1 %v1609_v28  ;;  %v1686_v13 = vld [vmem:[#allocation2 + $0x324] ss:$8 sps:$4 sm:$0xff]   ;;  %v1684_v15 = vld [vmem:[#allocation2 + $0x320] ss:$8 sps:$4 sm:$0xff]   ;;  %v1692_v17 = vld [vmem:[#allocation2 + $0x334] ss:$8 sps:$4 sm:$0xff]  }
  0x41   :  { %1149 = vmatprep.subr.bf16.mxu0 %v1611_v29  ;;  %v1687_v18 = vld [vmem:[#allocation2 + $0x130] ss:$8 sps:$4 sm:$0xff]   ;;  %v1695_v20 = vld [vmem:[#allocation2 + $0x144] ss:$8 sps:$4 sm:$0xff]   ;;  %v1693_v22 = vld [vmem:[#allocation2 + $0x140] ss:$8 sps:$4 sm:$0xff]  }
  0x42   :  { %v1690_v19 = vld [vmem:[#allocation2 + $0x330] ss:$8 sps:$4 sm:$0xff]   ;;  %v1698_v21 = vld [vmem:[#allocation2 + $0x344] ss:$8 sps:$4 sm:$0xff]   ;;  %v1696_v23 = vld [vmem:[#allocation2 + $0x340] ss:$8 sps:$4 sm:$0xff]  }
  0x43   :  { %1044 = vmatpush1.bf16.msra.mxu1 %v1613_v30  ;;  %v1701_v24 = vld [vmem:[#allocation2 + $0x154] ss:$8 sps:$4 sm:$0xff]   ;;  %v1699_v26 = vld [vmem:[#allocation2 + $0x150] ss:$8 sps:$4 sm:$0xff]   ;;  %v1707_v28 = vld [vmem:[#allocation2 + $0x164] ss:$8 sps:$4 sm:$0xff]  }
  0x44   :  { %1150 = vmatpush1.bf16.msra.mxu0 %v1614_v31  ;;  %1045 = vmatprep.subr.bf16.mxu1 %v1615_v32  ;;  %v1704_v25 = vld [vmem:[#allocation2 + $0x354] ss:$8 sps:$4 sm:$0xff]   ;;  %v1702_v27 = vld [vmem:[#allocation2 + $0x350] ss:$8 sps:$4 sm:$0xff]   ;;  %v1757_v31 = vld [vmem:[%s1972_s0 + $0x48] ss:$36 sps:$4 sm:$0xff]  }
  0x45   :  { %1151 = vmatprep.subr.bf16.mxu0 %v1617_v33  ;;  %v1753_v29 = vld [vmem:[%s1972_s0 + $0x4c] ss:$36 sps:$4 sm:$0xff]   ;;  %v1755_v30 = vld [vmem:[%s1972_s0 + $0x5c] ss:$36 sps:$4 sm:$0xff]  }
  0x46   :  { %v1710_v32 = vld [vmem:[#allocation2 + $0x364] ss:$8 sps:$4 sm:$0xff]   ;;  %v1761_v33 = vld [vmem:[%s1972_s0 + $0x58] ss:$36 sps:$4 sm:$0xff]  }
  0x47   :  { %1046 = vmatpush1.bf16.msra.mxu1 %v1619_v34  ;;  %v1705_v34 = vld [vmem:[#allocation2 + $0x160] ss:$8 sps:$4 sm:$0xff]   ;;  %v1723_v48 = vld [vmem:[#allocation2 + $0x190] ss:$8 sps:$4 sm:$0xff]   ;;  %v1734_v51 = vld [vmem:[#allocation2 + $0x3a4] ss:$8 sps:$4 sm:$0xff]  }
  0x48   :  { %1152 = vmatpush1.bf16.msra.mxu0 %v1620_v35  ;;  %1047 = vmatprep.subr.bf16.mxu1 %v1621_v36  ;;  %v1708_v35 = vld [vmem:[#allocation2 + $0x360] ss:$8 sps:$4 sm:$0xff]   ;;  %v1713_v36 = vld [vmem:[#allocation2 + $0x174] ss:$8 sps:$4 sm:$0xff]  }
  0x49   :  { %1153 = vmatprep.subr.bf16.mxu0 %v1623_v37  ;;  %v1716_v37 = vld [vmem:[#allocation2 + $0x374] ss:$8 sps:$4 sm:$0xff]  }
  0x4b   :  { %1048 = vmatpush1.bf16.msra.mxu1 %v1625_v38  ;;  %v1711_v38 = vld [vmem:[#allocation2 + $0x170] ss:$8 sps:$4 sm:$0xff]  }
  0x4c   :  { %1154 = vmatpush1.bf16.msra.mxu0 %v1626_v39  ;;  %1049 = vmatprep.subr.bf16.mxu1 %v1627_v40  ;;  %v1714_v39 = vld [vmem:[#allocation2 + $0x370] ss:$8 sps:$4 sm:$0xff]   ;;  %v1719_v40 = vld [vmem:[#allocation2 + $0x184] ss:$8 sps:$4 sm:$0xff]  }
  0x4d   :  { %1155 = vmatprep.subr.bf16.mxu0 %v1629_v41  ;;  %v1773_v41 = vld [vmem:[%s1972_s0 + $0xc] ss:$36 sps:$4 sm:$0xff]  }
  0x4f   :  { %1050 = vmatpush1.bf16.msra.mxu1 %v1631_v42  ;;  %v1722_v42 = vld [vmem:[#allocation2 + $0x384] ss:$8 sps:$4 sm:$0xff]  }
  0x50   :  { %1156 = vmatpush1.bf16.msra.mxu0 %v1632_v43  ;;  %1051 = vmatprep.subr.bf16.mxu1 %v1633_v44  ;;  %v1776_v43 = vld [vmem:[%s1972_s0 + $0x1c] ss:$36 sps:$4 sm:$0xff]  }
  0x51   :  { %1157 = vmatprep.subr.bf16.mxu0 %v1635_v45  ;;  %v1717_v44 = vld [vmem:[#allocation2 + $0x180] ss:$8 sps:$4 sm:$0xff]  }
  0x52   :  { %v1720_v45 = vld [vmem:[#allocation2 + $0x380] ss:$8 sps:$4 sm:$0xff]  }
  0x53   :  { %1052 = vmatpush1.bf16.msra.mxu1 %v1637_v46  ;;  %v1725_v46 = vld [vmem:[#allocation2 + $0x194] ss:$8 sps:$4 sm:$0xff]  }
  0x54   :  { %1158 = vmatpush1.bf16.msra.mxu0 %v1638_v47  ;;  %1053 = vmatprep.subr.bf16.mxu1 %v1639_v49  ;;  %v1728_v47 = vld [vmem:[#allocation2 + $0x394] ss:$8 sps:$4 sm:$0xff]   ;;  %v1726_v49 = vld [vmem:[#allocation2 + $0x390] ss:$8 sps:$4 sm:$0xff]  }
  0x55   :  { %1159 = vmatprep.subr.bf16.mxu0 %v1641_v50  ;;  %v1731_v50 = vld [vmem:[#allocation2 + $0x1a4] ss:$8 sps:$4 sm:$0xff]  }
  0x57   :  { %1054 = vmatpush1.bf16.msra.mxu1 %v1643_v52  ;;  %v1729_v52 = vld [vmem:[#allocation2 + $0x1a0] ss:$8 sps:$4 sm:$0xff]  }
  0x58   :  { %1160 = vmatpush1.bf16.msra.mxu0 %v1644_v53  ;;  %1055 = vmatprep.subr.bf16.mxu1 %v1645_v54  ;;  %v1732_v53 = vld [vmem:[#allocation2 + $0x3a0] ss:$8 sps:$4 sm:$0xff]   ;;  %v1737_v54 = vld [vmem:[#allocation2 + $0x1b4] ss:$8 sps:$4 sm:$0xff]  }
  0x59   :  { %1161 = vmatprep.subr.bf16.mxu0 %v1647_v55  ;;  %v1740_v55 = vld [vmem:[#allocation2 + $0x3b4] ss:$8 sps:$4 sm:$0xff]  }
  0x5b   :  { %1056 = vmatpush1.bf16.msra.mxu1 %v1649_v56  ;;  %v1735_v56 = vld [vmem:[#allocation2 + $0x1b0] ss:$8 sps:$4 sm:$0xff]  }
  0x5c   :  { %1162 = vmatpush1.bf16.msra.mxu0 %v1650_v57  ;;  %1057 = vmatprep.subr.bf16.mxu1 %v1651_v58  ;;  %v1738_v57 = vld [vmem:[#allocation2 + $0x3b0] ss:$8 sps:$4 sm:$0xff]   ;;  %v1743_v58 = vld [vmem:[#allocation2 + $0x1c4] ss:$8 sps:$4 sm:$0xff]  }
  0x5d   :  { %1163 = vmatprep.subr.bf16.mxu0 %v1653_v59  ;;  %v1746_v59 = vld [vmem:[#allocation2 + $0x3c4] ss:$8 sps:$4 sm:$0xff]  }
  0x5f   :  { %1058 = vmatpush1.bf16.msra.mxu1 %v1655_v60  ;;  %v1741_v60 = vld [vmem:[#allocation2 + $0x1c0] ss:$8 sps:$4 sm:$0xff]  }
  0x60   :  { %1164 = vmatpush1.bf16.msra.mxu0 %v1656_v61  ;;  %1059 = vmatprep.subr.bf16.mxu1 %v1657_v62  ;;  %v1744_v61 = vld [vmem:[#allocation2 + $0x3c0] ss:$8 sps:$4 sm:$0xff]   ;;  %v1749_v62 = vld [vmem:[#allocation2 + $0x1d4] ss:$8 sps:$4 sm:$0xff]  }
  0x61   :  { %1165 = vmatprep.subr.bf16.mxu0 %v1659_v63  ;;  %v1752_v63 = vld [vmem:[#allocation2 + $0x3d4] ss:$8 sps:$4 sm:$0xff]  }
  0x63   :  { %1060 = vmatpush1.bf16.msra.mxu1 %v1661_v0  ;;  %v1747_v0 = vld [vmem:[#allocation2 + $0x1d0] ss:$8 sps:$4 sm:$0xff]  }
  0x64   :  { %1166 = vmatpush1.bf16.msra.mxu0 %v1662_v1  ;;  %1082 = vmatprep.subr.bf16.mxu1 %v1668_v2  ;;  %v1750_v1 = vld [vmem:[#allocation2 + $0x3d0] ss:$8 sps:$4 sm:$0xff]   ;;  %v1760_v2 = vld [vmem:[#allocation2 + $0x1e4] ss:$8 sps:$4 sm:$0xff]  }
  0x65   :  { %1188 = vmatprep.subr.bf16.mxu0 %v1674_v3  ;;  %v1764_v3 = vld [vmem:[#allocation2 + $0x3e4] ss:$8 sps:$4 sm:$0xff]  }
  0x66   :  { %1062 = vmatmul.mubr.bf16.vlgmr.msra.gmra.mrb[0].mxu1 %v1663_v4  ;;  %v1758_v4 = vld [vmem:[#allocation2 + $0x1e0] ss:$8 sps:$4 sm:$0xff]  }
  0x67   :  { %1168 = vmatmul.mubr.bf16.vlgmr.msra.gmra.mrb[0].mxu0 %v1669_v6  ;;  %1083 = vmatpush1.bf16.msra.mxu1 %v1666_v5  ;;  %v1762_v5 = vld [vmem:[#allocation2 + $0x3e0] ss:$8 sps:$4 sm:$0xff]   ;;  %v1767_v6 = vld [vmem:[#allocation2 + $0x1f4] ss:$8 sps:$4 sm:$0xff]  }
  0x68   :  { %1189 = vmatpush1.bf16.msra.mxu0 %v1672_v7  ;;  %1084 = vmatprep.subr.bf16.mxu1 %v1677_v8  ;;  %v1770_v7 = vld [vmem:[#allocation2 + $0x3f4] ss:$8 sps:$4 sm:$0xff]   ;;  %v1765_v8 = vld [vmem:[#allocation2 + $0x1f0] ss:$8 sps:$4 sm:$0xff]  }
  0x69   :  { %1190 = vmatprep.subr.bf16.mxu0 %v1680_v9  ;;  %1071 = vmatprep.mubr.bf16.mxu1 %v1753_v29  ;;  %v1768_v9 = vld [vmem:[#allocation2 + $0x3f0] ss:$8 sps:$4 sm:$0xff]   ;;  %v1803_v29 = vld [vmem:[#allocation2 + $0x464] ss:$8 sps:$4 sm:$0xff]  }
  0x6a   :  { %1177 = vmatprep.mubr.bf16.mxu0 %v1755_v30  ;;  %v1801_v30 = vld [vmem:[#allocation2 + $0x460] ss:$8 sps:$4 sm:$0xff]  }
  0x6b   :  { %1085 = vmatpush1.bf16.msra.mxu1 %v1675_v10  ;;  %v1779_v10 = vld [vmem:[#allocation2 + $0x404] ss:$8 sps:$4 sm:$0xff]  }
  0x6c   :  { %1191 = vmatpush1.bf16.msra.mxu0 %v1678_v11  ;;  %1086 = vmatprep.subr.bf16.mxu1 %v1683_v12  ;;  %v1771_v11 = vld [vmem:[%s1972_s0 + $0x8] ss:$36 sps:$4 sm:$0xff]   ;;  %v1774_v12 = vld [vmem:[%s1972_s0 + $0x18] ss:$36 sps:$4 sm:$0xff]  }
  0x6d   :  { %1192 = vmatprep.subr.bf16.mxu0 %v1686_v13  ;;  %v1777_v13 = vld [vmem:[#allocation2 + $0x400] ss:$8 sps:$4 sm:$0xff]  }
  0x6e   :  { %1072 = vmatmul.mubr.bf16.gmra.mrb[4].mxu1 %v1757_v31  ;;  %v1806_v31 = vld [vmem:[#allocation2 + $0x474] ss:$8 sps:$4 sm:$0xff]  }
  0x6f   :  { %1087 = vmatpush1.bf16.msra.mxu1 %v1681_v14  ;;  %1178 = vmatmul.mubr.bf16.gmra.mrb[4].mxu0 %v1761_v33  ;;  %v1782_v14 = vld [vmem:[#allocation2 + $0x414] ss:$8 sps:$4 sm:$0xff]   ;;  %v1807_v33 = vld [vmem:[%s1972_s0 + $0x20] ss:$36 sps:$4 sm:$0xff]  }
  0x70   :  { %1193 = vmatpush1.bf16.msra.mxu0 %v1684_v15  ;;  %1088 = vmatprep.subr.bf16.mxu1 %v1689_v16  ;;  %v1783_v15 = vld [vmem:[%s1972_s0 + $0x54] ss:$36 sps:$4 sm:$0xff]   ;;  %v1785_v16 = vld [vmem:[%s1972_s0 + $0x64] ss:$36 sps:$4 sm:$0xff]  }
  0x71   :  { %1194 = vmatprep.subr.bf16.mxu0 %v1692_v17  ;;  %1114 = vmatprep.mubr.bf16.mxu1 %v1773_v41  ;;  %v1780_v17 = vld [vmem:[#allocation2 + $0x410] ss:$8 sps:$4 sm:$0xff]  }
  0x72   :  { %1220 = vmatprep.mubr.bf16.mxu0 %v1776_v43 }
  0x73   :  { %1089 = vmatpush1.bf16.msra.mxu1 %v1687_v18  ;;  %v1791_v18 = vld [vmem:[#allocation2 + $0x424] ss:$8 sps:$4 sm:$0xff]  }
  0x74   :  { %1195 = vmatpush1.bf16.msra.mxu0 %v1690_v19  ;;  %1090 = vmatprep.subr.bf16.mxu1 %v1695_v20  ;;  %v1787_v19 = vld [vmem:[%s1972_s0 + $0x50] ss:$36 sps:$4 sm:$0xff]   ;;  %v1788_v20 = vld [vmem:[%s1972_s0 + $0x60] ss:$36 sps:$4 sm:$0xff]  }
  0x75   :  { %1196 = vmatprep.subr.bf16.mxu0 %v1698_v21  ;;  %v1789_v21 = vld [vmem:[#allocation2 + $0x420] ss:$8 sps:$4 sm:$0xff]  }
  0x77   :  { %1091 = vmatpush1.bf16.msra.mxu1 %v1693_v22  ;;  %v1794_v22 = vld [vmem:[#allocation2 + $0x434] ss:$8 sps:$4 sm:$0xff]  }
  0x78   :  { %1197 = vmatpush1.bf16.msra.mxu0 %v1696_v23  ;;  %1092 = vmatprep.subr.bf16.mxu1 %v1701_v24  ;;  %v1792_v23 = vld [vmem:[#allocation2 + $0x430] ss:$8 sps:$4 sm:$0xff]   ;;  %v1797_v24 = vld [vmem:[#allocation2 + $0x444] ss:$8 sps:$4 sm:$0xff]  }
  0x79   :  { %1198 = vmatprep.subr.bf16.mxu0 %v1704_v25  ;;  %v1861_v25 = vmov 0  }
  0x7b   :  { %1093 = vmatpush1.bf16.msra.mxu1 %v1699_v26  ;;  %v1795_v26 = vld [vmem:[#allocation2 + $0x440] ss:$8 sps:$4 sm:$0xff]  }
  0x7c   :  { %1199 = vmatpush1.bf16.msra.mxu0 %v1702_v27  ;;  %1094 = vmatprep.subr.bf16.mxu1 %v1707_v28  ;;  %v1800_v27 = vld [vmem:[#allocation2 + $0x454] ss:$8 sps:$4 sm:$0xff]   ;;  %v1798_v28 = vld [vmem:[#allocation2 + $0x450] ss:$8 sps:$4 sm:$0xff]  }
  0x7d   :  { %1200 = vmatprep.subr.bf16.mxu0 %v1710_v32  ;;  %v1804_v32 = vld [vmem:[#allocation2 + $0x470] ss:$8 sps:$4 sm:$0xff]  }
  0x7f   :  { %1095 = vmatpush1.bf16.msra.mxu1 %v1705_v34  ;;  %v1808_v34 = vld [vmem:[%s1972_s0 + $0x68] ss:$36 sps:$4 sm:$0xff]  }
  0x80   :  { %1201 = vmatpush1.bf16.msra.mxu0 %v1708_v35  ;;  %1096 = vmatprep.subr.bf16.mxu1 %v1713_v36  ;;  %v207_v35 = vlaneseq }
  0x81   :  { %1202 = vmatprep.subr.bf16.mxu0 %v1716_v37 }
  0x82   :  { %v208_v36 = vshrl.u32 %v207_v35, 7 }
  0x83   :  { %1097 = vmatpush1.bf16.msra.mxu1 %v1711_v38 }
  0x84   :  { %1203 = vmatpush1.bf16.msra.mxu0 %v1714_v39  ;;  %1098 = vmatprep.subr.bf16.mxu1 %v1719_v40  ;;  %v209_v40 = vsub.s32 0, %v208_v36  ;;  %v213_v43 = vsub.s32 1, %v208_v36 }
  0x85   :  { %1204 = vmatprep.subr.bf16.mxu0 %v1722_v42  ;;  %v205_v42 = vld [vmem:[#allocation4] sm:$0x3] }
  0x87   :  { %1099 = vmatpush1.bf16.msra.mxu1 %v1717_v44  ;;  %v210_v44 = vrot.slane %v205_v42, %v209_v40 }
  0x88   :  { %1205 = vmatpush1.bf16.msra.mxu0 %v1720_v45  ;;  %1100 = vmatprep.subr.bf16.mxu1 %v1725_v46  ;;  %v214_v45 = vrot.slane %v205_v42, %v213_v43 }
  0x89   :  { %1206 = vmatprep.subr.bf16.mxu0 %v1728_v47 }
  0x8b   :  { %1101 = vmatpush1.bf16.msra.mxu1 %v1723_v48 }
  0x8c   :  { %1207 = vmatpush1.bf16.msra.mxu0 %v1726_v49  ;;  %1102 = vmatprep.subr.bf16.mxu1 %v1731_v50 }
  0x8d   :  { %1208 = vmatprep.subr.bf16.mxu0 %v1734_v51 }
  0x8f   :  { %1103 = vmatpush1.bf16.msra.mxu1 %v1729_v52 }
  0x90   :  { %1209 = vmatpush1.bf16.msra.mxu0 %v1732_v53  ;;  %1104 = vmatprep.subr.bf16.mxu1 %v1737_v54 }
  0x91   :  { %1210 = vmatprep.subr.bf16.mxu0 %v1740_v55 }
  0x93   :  { %1105 = vmatpush1.bf16.msra.mxu1 %v1735_v56 }
  0x94   :  { %1211 = vmatpush1.bf16.msra.mxu0 %v1738_v57  ;;  %1106 = vmatprep.subr.bf16.mxu1 %v1743_v58 }
  0x95   :  { %1212 = vmatprep.subr.bf16.mxu0 %v1746_v59 }
  0x97   :  { %1107 = vmatpush1.bf16.msra.mxu1 %v1741_v60 }
  0x98   :  { %1213 = vmatpush1.bf16.msra.mxu0 %v1744_v61  ;;  %1108 = vmatprep.subr.bf16.mxu1 %v1749_v62 }
  0x99   :  { %1214 = vmatprep.subr.bf16.mxu0 %v1752_v63 }
  0x9b   :  { %1109 = vmatpush1.bf16.msra.mxu1 %v1747_v0 }
  0x9c   :  { %1215 = vmatpush1.bf16.msra.mxu0 %v1750_v1  ;;  %1110 = vmatprep.subr.bf16.mxu1 %v1760_v2 }
  0x9d   :  { %1216 = vmatprep.subr.bf16.mxu0 %v1764_v3 }
  0x9f   :  { %1111 = vmatpush1.bf16.msra.mxu1 %v1758_v4 }
  0xa0   :  { %1217 = vmatpush1.bf16.msra.mxu0 %v1762_v5  ;;  %1112 = vmatprep.subr.bf16.mxu1 %v1767_v6 }
  0xa1   :  { %1218 = vmatprep.subr.bf16.mxu0 %v1770_v7 }
  0xa3   :  { %1113 = vmatpush1.bf16.msra.mxu1 %v1765_v8 }
  0xa4   :  { %1219 = vmatpush1.bf16.msra.mxu0 %v1768_v9  ;;  %1506 = vmatprep.subr.bf16.mxu1 %v1779_v10 }
  0xa5   :  { %1241 = vmatprep.subr.bf16.mxu0 %v1779_v10 }
  0xa6   :  { %1115 = vmatmul.mubr.bf16.vlgmr.msra.gmra.mrb[0].mxu1 %v1771_v11 }
  0xa7   :  { %1221 = vmatmul.mubr.bf16.vlgmr.msra.gmra.mrb[0].mxu0 %v1774_v12  ;;  %1514 = vmatpush1.bf16.msra.mxu1 %v1777_v13 }
  0xa8   :  { %1242 = vmatpush1.bf16.msra.mxu0 %v1777_v13  ;;  %1507 = vmatprep.subr.bf16.mxu1 %v1782_v14 }
  0xa9   :  { %1243 = vmatprep.subr.bf16.mxu0 %v1782_v14  ;;  %1124 = vmatprep.mubr.bf16.mxu1 %v1783_v15 }
  0xaa   :  { %1230 = vmatprep.mubr.bf16.mxu0 %v1785_v16 }
  0xab   :  { %1515 = vmatpush1.bf16.msra.mxu1 %v1780_v17 }
  0xac   :  { %1244 = vmatpush1.bf16.msra.mxu0 %v1780_v17  ;;  %1508 = vmatprep.subr.bf16.mxu1 %v1791_v18 }
  0xad   :  { %1245 = vmatprep.subr.bf16.mxu0 %v1791_v18 }
  0xae   :  { %1125 = vmatmul.mubr.bf16.gmra.mrb[4].mxu1 %v1787_v19 }
  0xaf   :  { %1231 = vmatmul.mubr.bf16.gmra.mrb[4].mxu0 %v1788_v20  ;;  %1516 = vmatpush1.bf16.msra.mxu1 %v1789_v21 }
  0xb0   :  { %1246 = vmatpush1.bf16.msra.mxu0 %v1789_v21  ;;  %1509 = vmatprep.subr.bf16.mxu1 %v1794_v22 }
  0xb1   :  { %1247 = vmatprep.subr.bf16.mxu0 %v1794_v22  ;;  %1273 = vmatprep.mubr.bf16.mxu0 %v1861_v25 }
  0xb2   :  { %1283 = vmatprep.mubr.bf16.mxu1 %v1861_v25 }
  0xb3   :  { %1517 = vmatpush1.bf16.msra.mxu1 %v1792_v23 }
  0xb4   :  { %1248 = vmatpush1.bf16.msra.mxu0 %v1792_v23  ;;  %1510 = vmatprep.subr.bf16.mxu1 %v1797_v24 }
  0xb5   :  { %1249 = vmatprep.subr.bf16.mxu0 %v1797_v24 }
  0xb7   :  { %1518 = vmatpush1.bf16.msra.mxu1 %v1795_v26 }
  0xb8   :  { %1250 = vmatpush1.bf16.msra.mxu0 %v1795_v26  ;;  %1511 = vmatprep.subr.bf16.mxu1 %v1800_v27 }
  0xb9   :  { %1251 = vmatprep.subr.bf16.mxu0 %v1800_v27 }
  0xbb   :  { %1519 = vmatpush1.bf16.msra.mxu1 %v1798_v28 }
  0xbc   :  { %1252 = vmatpush1.bf16.msra.mxu0 %v1798_v28  ;;  %1512 = vmatprep.subr.bf16.mxu1 %v1803_v29 }
  0xbd   :  { %1253 = vmatprep.subr.bf16.mxu0 %v1803_v29 }
  0xbf   :  { %1520 = vmatpush1.bf16.msra.mxu1 %v1801_v30 }
  0xc0   :  { %1254 = vmatpush1.bf16.msra.mxu0 %v1801_v30  ;;  %1513 = vmatprep.subr.bf16.mxu1 %v1806_v31 }
  0xc1   :  { %1255 = vmatprep.subr.bf16.mxu0 %v1806_v31 }
  0xc3   :  { %1521 = vmatpush1.bf16.msra.mxu1 %v1804_v32 }
  0xc4   :  { %1256 = vmatpush1.bf16.msra.mxu0 %v1804_v32 }
  0xc6   :  { %1284 = vmatmul.mubr.bf16.vlgmr.msra.gmra.mrb[8].mxu1 %v1808_v34 }
  0xc7   :  { %1274 = vmatmul.mubr.bf16.vlgmr.msra.gmra.mrb[0].mxu0 %v1807_v33 }
 0x179   :  { %v1116_v37 = vpop.f32.mrb[0].mxu1 }
 0x17a   :  { %v1118_v38 = vpop.f32.mrb[1].mxu1  ;;  %v1522_v62 = vadd.f32 %v1116_v37, %v210_v44 }
 0x17b   :  { %v1120_v39 = vpop.f32.mrb[2].mxu1  ;;  %v1524_v63 = vadd.f32 %v1118_v38, %v214_v45 }
 0x17c   :  { %v1122_v41 = vpop.f32.mrb[3].mxu1  ;;  %v1526_v2 = vadd.f32 %v1120_v39, %v210_v44 }
 0x17d   :  { %v1528_v7 = vadd.f32 %v1122_v41, %v214_v45 }
 0x181   :  { %v1126_v46 = vpop.f32.mrb[4].mxu1 }
 0x182   :  { %v1232_v47 = vpop.f32.mrb[4].mxu0  ;;  %v1530_v48 = vadd.f32 %v1126_v46, %v210_v44  ;;  %v1128_v49 = vpop.f32.mrb[5].mxu1 }
 0x183   :  { %v1234_v50 = vpop.f32.mrb[5].mxu0  ;;  %v1533_v51 = vadd.f32 %v1128_v49, %v214_v45  ;;  %v1130_v52 = vpop.f32.mrb[6].mxu1 }
 0x184   :  { %v1236_v53 = vpop.f32.mrb[6].mxu0  ;;  %v1531_v54 = vadd.f32 %v1530_v48, %v1232_v47  ;;  %v1536_v55 = vadd.f32 %v1130_v52, %v210_v44  ;;  %v1132_v56 = vpop.f32.mrb[7].mxu1 }
 0x185   :  { %v1238_v57 = vpop.f32.mrb[7].mxu0  ;;  %v1534_v58 = vadd.f32 %v1533_v51, %v1234_v50  ;;  %v1539_v59 = vadd.f32 %v1132_v56, %v214_v45 }
 0x186   :  { %v1537_v60 = vadd.f32 %v1536_v55, %v1236_v53 }
 0x187   :  { %v1540_v61 = vadd.f32 %v1539_v59, %v1238_v57 }
 0x199   :  { %v1285_v1 = vpop.f32.mrb[8].mxu1 }
 0x19a   :  { %v1275_v0 = vpop.f32.mrb[0].mxu0  ;;  %v1532_v4 = vadd.f32 %v1531_v54, %v1285_v1  ;;  %v1287_v6 = vpop.f32.mrb[9].mxu1 }
 0x19b   :  { %v1523_v3 = vadd.f32 %v1522_v62, %v1275_v0  ;;  %v1277_v5 = vpop.f32.mrb[1].mxu0  ;;  %v1535_v9 = vadd.f32 %v1534_v58, %v1287_v6  ;;  %v1289_v11 = vpop.f32.mrb[10].mxu1 }
 0x19c   :  { %v1525_v8 = vadd.f32 %v1524_v63, %v1277_v5  ;;  %v1279_v10 = vpop.f32.mrb[2].mxu0  ;;  %v1298_v13 = vmax.f32 %v1532_v4, 0.0  ;;  %v1538_v15 = vadd.f32 %v1537_v60, %v1289_v11  ;;  %v1291_v17 = vpop.f32.mrb[11].mxu1 }
 0x19d   :  { %v1294_v12 = vmax.f32 %v1523_v3, 0.0  ;;  %v1527_v14 = vadd.f32 %v1526_v2, %v1279_v10  ;;  %v1281_v16 = vpop.f32.mrb[3].mxu0  ;;  %v1299_v19 = vmax.f32 %v1535_v9, 0.0  ;;  %v1541_v21 = vadd.f32 %v1540_v61, %v1291_v17 }
 0x19e   :  { %v1295_v18 = vmax.f32 %v1525_v8, 0.0  ;;  %v1529_v20 = vadd.f32 %v1528_v7, %v1281_v16  ;;  %v1300_v23 = vmax.f32 %v1538_v15, 0.0 }
 0x19f   :  { %v1296_v22 = vmax.f32 %v1527_v14, 0.0  ;;  %v1504_v25 = vpack.c.bf16 %v1299_v19, %v1298_v13  ;;  %v1301_v27 = vmax.f32 %v1541_v21, 0.0 }
 0x1a0   :  { %v1502_v24 = vpack.c.bf16 %v1295_v18, %v1294_v12  ;;  %v1297_v26 = vmax.f32 %v1529_v20, 0.0 }
 0x1a1   :  { %1328 = vst [vmem:[%s1975_s3 + $0x10] sm:$0xff] %v1504_v25  ;;  %v1505_v29 = vpack.c.bf16 %v1301_v27, %v1300_v23 }
 0x1a2   :  { %1326 = vst [vmem:[%s1975_s3] sm:$0xff] %v1502_v24  ;;  %v1503_v28 = vpack.c.bf16 %v1297_v26, %v1296_v22 }
 0x1a3   :  { %1329 = vst [vmem:[%s1975_s3 + $0x18] sm:$0xff] %v1505_v29 }
 0x1a4   :  { %1327 = vst [vmem:[%s1975_s3 + $0x8] sm:$0xff] %v1503_v28 }
 0x1a5   :  { %1334 = vsyncpa [#allocation3], 1 }
 0x1a6   :  { %1335 = vsyncpa [#allocation5], 1 }

// kernel: _lambda_.7
= control target key start
LH: loop header
LB: loop body
LE: loop exit
PB: predicated region body
PF: predicated region fallthrough
CT: control target
= control target key end

     0   :  { %8 = vsyncpa [#allocation3], 0  ;;  %s1501_s0 = inlined_call_operand.vmem [shape: bf16[128,576], index: 0, kind: input, shape index: {}]   ;;  %s1502_s1 = inlined_call_operand.hbm [shape: bf16[576,128], index: 1, kind: input, shape index: {}]   ;;  %s1503_s2 = inlined_call_operand.hbm [shape: f32[1,128], index: 2, kind: input, shape index: {}]   ;;  %s1504_s3 = inlined_call_operand.vmem [shape: bf16[128,128], index: 3, kind: output, shape index: {}]  }
   0x1   :  { %9 = vsyncpa [#allocation5], 0  ;;  %s1378_s12 = smov 0  }
   0x2 LB: > { %s959_s13 = sadd.s32 4294967295, %s1352_s12   ;;  %p961_p0 = scmp.ge.s32.totalorder %s1352_s12, 1  ;;  %s1352_s12 = sphi %s1378_s12, %s15_s12  }
   0x3   : > { %p114_p1 = scmp.lt.s32.totalorder %s1352_s12, 3  ;;  %s1354_s14 = smov [#allocation2]  }
   0x4   : > { %s126_s15 = sshll.u32 %s1354_s14, 4  ;;  %p1392_p3 = scmp.eq.s32.totalorder %s959_s13, 0  ;;  %s127_s15 = int_to_ptr.vmem [resolvable:$true] %s126_s15 }
   0x5   : > { %p1386_p2 = pnand %p961_p0, %p114_p1  ;;  %s1355_s18 = smov [#allocation4]  }
   0x6   : > { %s1509_s17 = scalar_select %p1392_p3, 1, 0 }
   0x7   : > { %s1508_s16 = scalar_select %p1386_p2, 1, 0 }
   0x8   : > { %p1195_p4 = pneg %p1386_p2  ;;  %s140_s19 = sshll.u32 %s1355_s18, 4  ;;  %s1404_s19 = int_to_ptr.vmem [resolvable:$true] %s140_s19 }
   0x9   : > { %s1282_s23 = scalar_lea.hbm %s1502_s1, 4608 }
   0xa   : > { %p1400_p5 = pnand %p1392_p3, %p1195_p4  ;;  %p1283_p6 = scmp.ne.s32.totalorder %s1502_s1, %s1282_s23 }
   0xb   : > { %p1289_p10 = scmp.lt.u32.totalorder %s1282_s23, %s1502_s1 }
   0xc   : > { %p1284_p7 = pneg %p1400_p5 }
   0xe   : > { %p1285_p8 = pnand %p1284_p7, %p1283_p6 }
  0x10   : > { %p1286_p9 = pneg %p1285_p8 }
  0x12   : > { %p1291_p11 = pnand %p1289_p10, %p1286_p9 }
  0x14   : > { %1294 = shalt.err (!%p1291_p11)
}
  0x15   : > { %s1295_s28 = scalar_lea.vmem %s127_s15, 4608  ;;  %p1303_p1 = scmp.lt.s32.totalorder %s127_s15, %s127_s15 }
  0x16   : > { %p1296_p12 = scmp.ne.s32.totalorder %s127_s15, %s1295_s28  ;;  %p1304_p4 = scmp.lt.s32.totalorder %s1295_s28, %s1295_s28 }
  0x18   : > { %p1298_p13 = pnand %p1296_p12, %p1284_p7  ;;  %p1305_p3 = por %p1304_p4, %p1303_p1 }
  0x1a   : > { %p1299_p0 = pneg %p1298_p13 }
  0x1c   : > { %p1306_p2 = pnand %p1305_p3, %p1299_p0 }
  0x1e   : > { %1309 = shalt.err (!%p1306_p2)
}
  0x1f   : > { %s1356_s29 = smov 64   ;;  %s1357_s30 = smov 4  }
  0x20   : > { %1198 = dma.hbm_to_vmem [thread:$0]  (!%p1400_p5), %s1502_s1, 4608, %s127_s15, [#allocation3], %s1356_s29, %s1356_s29, %s1357_s30  }
  0x21   : > { %s1310_s8 = scalar_lea.hbm %s1503_s2, 16 }
  0x22   : > { %p1311_p6 = scmp.ne.s32.totalorder %s1503_s2, %s1310_s8  ;;  %p1317_p8 = scmp.lt.u32.totalorder %s1310_s8, %s1503_s2 }
  0x24   : > { %p1313_p2 = pnand %p1311_p6, %p1284_p7 }
  0x26   : > { %p1314_p3 = pneg %p1313_p2 }
  0x28   : > { %p1319_p9 = pnand %p1317_p8, %p1314_p3 }
  0x2a   : > { %1322 = shalt.err (!%p1319_p9)
}
  0x2b   : > { %s1323_s15 = scalar_lea.vmem %s1404_s19, 16  ;;  %s1330_s18 = scalar_lea.vmem %s1404_s19, 32 }
  0x2c   : > { %p1324_p10 = scmp.ne.s32.totalorder %s1404_s19, %s1323_s15  ;;  %p1331_p13 = scmp.lt.s32.totalorder %s1404_s19, %s1404_s19 }
  0x2d   : > { %p1332_p0 = scmp.lt.s32.totalorder %s1330_s18, %s1323_s15 }
  0x2e   : > { %p1326_p11 = pnand %p1324_p10, %p1284_p7 }
  0x2f   : > { %p1333_p1 = por %p1332_p0, %p1331_p13 }
  0x30   : > { %p1327_p12 = pneg %p1326_p11 }
  0x32   : > { %p1334_p4 = pnand %p1333_p1, %p1327_p12 }
  0x34   : > { %1337 = shalt.err (!%p1334_p4)
}
  0x35   : > { %1201 = dma.hbm_to_vmem [thread:$0]  (!%p1400_p5), %s1503_s2, 16, %s1404_s19, [#allocation5]  }
  0x36   : > { %p1511_p6 = scmp.ne.s32.totalorder %s1508_s16, 0 }
  0x37   : > { %p1512_p7 = scmp.ne.s32.totalorder (!%p1511_p6), %s1509_s17, 0 }
  0x38   : > { %163 = sbr.rel (%p1511_p6) target bundleno = 355 (0x163), region = 32 }
  0x3f   : > { %1343 = dma.done.wait (%p1512_p7), [#allocation3], 4608  }
  0x40   : > { %1345 = vsyncadd (%p1512_p7), [#allocation3], 4294962688 }
  0x41   : > { %1347 = dma.done.wait (%p1512_p7), [#allocation5], 16  }
  0x42   : > { %1349 = vsyncadd (%p1512_p7), [#allocation5], 4294967280  ;;  %v1218_v0 = vld [vmem:[#allocation2 + $0x40] sm:$0xff]   ;;  %v1222_v4 = vld [vmem:[#allocation2 + $0x48] sm:$0xff]   ;;  %s968_s16 = sshll.u32 %s959_s13, 3  ;;  %vm625_vm0 = vcmask 523264  }
  0x43   : > { %v1219_v1 = vld [vmem:[#allocation2 + $0xc0] sm:$0xff]   ;;  %1074 = vmatprep.subr.bf16.mxu0 %v1218_v0  ;;  %v1223_v5 = vld [vmem:[#allocation2 + $0xc8] sm:$0xff]   ;;  %v1226_v8 = vld [vmem:[#allocation2 + $0x50] sm:$0xff]   ;;  %p193_p5 = scmp.lt.s32.totalorder %s968_s16, 15 }
  0x44   : > { %v1220_v2 = vld [vmem:[#allocation2] sm:$0xff]   ;;  %1114 = vmatprep.subr.bf16.mxu1 %v1219_v1  ;;  %v1224_v6 = vld [vmem:[#allocation2 + $0x8] sm:$0xff]   ;;  %v1227_v9 = vld [vmem:[#allocation2 + $0xd0] sm:$0xff]  }
  0x45   : > { %v1221_v3 = vld [vmem:[#allocation2 + $0x80] sm:$0xff]   ;;  %1075 = vmatpush3.bf16.msra.mxu0 %v1220_v2  ;;  %v1225_v7 = vld [vmem:[#allocation2 + $0x88] sm:$0xff]   ;;  %v1228_v10 = vld [vmem:[#allocation2 + $0x10] sm:$0xff]   ;;  %s1514_s16 = smov (!%p193_p5, %s968_s16), 15 }
  0x46   : > { %1115 = vmatpush3.bf16.msra.mxu1 %v1221_v3  ;;  %1076 = vmatprep.subr.bf16.mxu0 %v1222_v4  ;;  %v1229_v11 = vld [vmem:[#allocation2 + $0x90] sm:$0xff]   ;;  %v1230_v12 = vld [vmem:[#allocation2 + $0x58] sm:$0xff]   ;;  %v1234_v16 = vld [vmem:[#allocation2 + $0x60] sm:$0xff]   ;;  %s1186_s13 = smul.u32 20, %s1514_s16  ;;  %s971_s23 = sshll.u32 %s1514_s16, 2 }
  0x47   : > { %1116 = vmatprep.subr.bf16.mxu1 %v1223_v5  ;;  %v1231_v13 = vld [vmem:[#allocation2 + $0xd8] sm:$0xff]   ;;  %v1235_v17 = vld [vmem:[#allocation2 + $0xe0] sm:$0xff]   ;;  %v1238_v20 = vld [vmem:[#allocation2 + $0x68] sm:$0xff]   ;;  %s203_s26 = scalar_lea.vmem %s1504_s3, %s971_s23 }
  0x48   : > { %v1232_v14 = vld [vmem:[#allocation2 + $0x18] sm:$0xff]   ;;  %v1236_v18 = vld [vmem:[#allocation2 + $0x20] sm:$0xff]   ;;  %v1239_v21 = vld [vmem:[#allocation2 + $0xe8] sm:$0xff]   ;;  %s1472_s20 = scalar_lea.vmem %s1501_s0, %s1186_s13 }
  0x49   : > { %1077 = vmatpush3.bf16.msra.mxu0 %v1224_v6  ;;  %v1233_v15 = vld [vmem:[#allocation2 + $0x98] sm:$0xff]   ;;  %v1237_v19 = vld [vmem:[#allocation2 + $0xa0] sm:$0xff]   ;;  %v1240_v22 = vld [vmem:[#allocation2 + $0x28] sm:$0xff]  }
  0x4a   : > { %1117 = vmatpush3.bf16.msra.mxu1 %v1225_v7  ;;  %1078 = vmatprep.subr.bf16.mxu0 %v1226_v8  ;;  %v1241_v23 = vld [vmem:[#allocation2 + $0xa8] sm:$0xff]   ;;  %v1242_v24 = vld [vmem:[#allocation2 + $0x70] sm:$0xff]   ;;  %v1246_v28 = vld [vmem:[#allocation2 + $0x78] sm:$0xff]  }
  0x4b   : > { %1118 = vmatprep.subr.bf16.mxu1 %v1227_v9  ;;  %v1243_v25 = vld [vmem:[#allocation2 + $0xf0] sm:$0xff]   ;;  %v1247_v29 = vld [vmem:[#allocation2 + $0xf8] sm:$0xff]   ;;  %v1255_v35 = vld [vmem:[%s1472_s20 + $0xc] ss:$20 sps:$4 sm:$0xff]  }
  0x4c   : > { %v1244_v26 = vld [vmem:[#allocation2 + $0x30] sm:$0xff]   ;;  %v1248_v30 = vld [vmem:[#allocation2 + $0x38] sm:$0xff]   ;;  %v1256_v36 = vld [vmem:[#allocation2 + $0x100] sm:$0xff]   ;;  %735 = vmatprep.mubr.bf16.mxu1 %v1255_v35 }
  0x4d   : > { %1079 = vmatpush3.bf16.msra.mxu0 %v1228_v10  ;;  %v1245_v27 = vld [vmem:[#allocation2 + $0xb0] sm:$0xff]   ;;  %v1249_v31 = vld [vmem:[#allocation2 + $0xb8] sm:$0xff]   ;;  %v1257_v37 = vld [vmem:[%s1472_s20 + $0x2c] ss:$20 sps:$4 sm:$0xff]  }
  0x4e   : > { %1119 = vmatpush3.bf16.msra.mxu1 %v1229_v11  ;;  %1080 = vmatprep.subr.bf16.mxu0 %v1230_v12  ;;  %v1250_v32 = vld [vmem:[%s1472_s20] ss:$20 sps:$4 sm:$0xff]   ;;  %v1252_v33 = vld [vmem:[%s1472_s20 + $0x4] ss:$20 sps:$4 sm:$0xff]   ;;  %v1253_v34 = vld [vmem:[%s1472_s20 + $0x8] ss:$20 sps:$4 sm:$0xff]  }
  0x4f   : > { %1120 = vmatprep.subr.bf16.mxu1 %v1231_v13  ;;  %670 = vmatprep.mubr.bf16.mxu0 %v1252_v33  ;;  %v1259_v38 = vld [vmem:[%s1472_s20 + $0x34] ss:$20 sps:$4 sm:$0xff]   ;;  %v1262_v41 = vld [vmem:[%s1472_s20 + $0x30] ss:$20 sps:$4 sm:$0xff]   ;;  %v1277_v45 = vld [vmem:[#allocation2 + $0x118] sm:$0xff]  }
  0x50   : > { %v1263_v39 = vld [vmem:[#allocation2 + $0x108] sm:$0xff]   ;;  %v1266_v43 = vld [vmem:[%s1472_s20 + $0x5c] ss:$20 sps:$4 sm:$0xff]   ;;  %v1273_v49 = vld [vmem:[%s1472_s20 + $0x84] ss:$20 sps:$4 sm:$0xff]  }
  0x51   : > { %1081 = vmatpush3.bf16.msra.mxu0 %v1232_v14  ;;  %v1261_v40 = vld [vmem:[%s1472_s20 + $0x28] ss:$20 sps:$4 sm:$0xff]   ;;  %v1270_v44 = vld [vmem:[#allocation2 + $0x110] sm:$0xff]   ;;  %v1269_v47 = vld [vmem:[%s1472_s20 + $0x58] ss:$20 sps:$4 sm:$0xff]  }
  0x52   : > { %1121 = vmatpush3.bf16.msra.mxu1 %v1233_v15  ;;  %1082 = vmatprep.subr.bf16.mxu0 %v1234_v16  ;;  %v1264_v42 = vld [vmem:[%s1472_s20 + $0x54] ss:$20 sps:$4 sm:$0xff]   ;;  %v1268_v46 = vld [vmem:[%s1472_s20 + $0x50] ss:$20 sps:$4 sm:$0xff]   ;;  %v1275_v50 = vld [vmem:[%s1472_s20 + $0x78] ss:$20 sps:$4 sm:$0xff]  }
  0x53   : > { %1122 = vmatprep.subr.bf16.mxu1 %v1235_v17  ;;  %v1271_v48 = vld [vmem:[%s1472_s20 + $0x7c] ss:$20 sps:$4 sm:$0xff]   ;;  %v1276_v51 = vld [vmem:[%s1472_s20 + $0x80] ss:$20 sps:$4 sm:$0xff]   ;;  %v1280_v54 = vld [vmem:[%s1472_s20 + $0x38] ss:$20 sps:$4 sm:$0xff]  }
  0x54   : > { %v1278_v52 = vld [vmem:[%s1472_s20 + $0x10] ss:$20 sps:$4 sm:$0xff]   ;;  %v1279_v53 = vld [vmem:[%s1472_s20 + $0x60] ss:$20 sps:$4 sm:$0xff]   ;;  %v1281_v55 = vld [vmem:[%s1472_s20 + $0x88] ss:$20 sps:$4 sm:$0xff]  }
  0x55   : > { %1083 = vmatpush3.bf16.msra.mxu0 %v1236_v18  ;;  %v972_v58 = vld [vmem:[#allocation4] ss:$0 sm:$0xff] }
  0x56   : > { %1123 = vmatpush3.bf16.msra.mxu1 %v1237_v19  ;;  %1084 = vmatprep.subr.bf16.mxu0 %v1238_v20 }
  0x57   : > { %1124 = vmatprep.subr.bf16.mxu1 %v1239_v21 }
  0x59   : > { %1085 = vmatpush3.bf16.msra.mxu0 %v1240_v22 }
  0x5a   : > { %1125 = vmatpush3.bf16.msra.mxu1 %v1241_v23  ;;  %1086 = vmatprep.subr.bf16.mxu0 %v1242_v24 }
  0x5b   : > { %1126 = vmatprep.subr.bf16.mxu1 %v1243_v25 }
  0x5d   : > { %1087 = vmatpush3.bf16.msra.mxu0 %v1244_v26 }
  0x5e   : > { %1127 = vmatpush3.bf16.msra.mxu1 %v1245_v27  ;;  %1088 = vmatprep.subr.bf16.mxu0 %v1246_v28 }
  0x5f   : > { %1128 = vmatprep.subr.bf16.mxu1 %v1247_v29 }
  0x61   : > { %1089 = vmatpush3.bf16.msra.mxu0 %v1248_v30 }
  0x62   : > { %1129 = vmatpush3.bf16.msra.mxu1 %v1249_v31  ;;  %1162 = vmatprep.subr.bf16.mxu0 %v1256_v36 }
  0x63   : > { %1178 = vmatprep.subr.bf16.mxu1 %v1256_v36 }
  0x64   : > { %671 = vmatmul.mubr.bf16.vlgmr.msra.gmra.mrb[0].mxu0 %v1250_v32 }
  0x65   : > { %736 = vmatmul.mubr.bf16.vlgmr.msra.gmra.mrb[0].mxu1 %v1253_v34  ;;  %1163 = vmatpush3.bf16.msra.mxu0 %v1256_v36 }
  0x66   : > { %1182 = vmatpush3.bf16.msra.mxu1 %v1256_v36  ;;  %678 = vmatprep.mubr.bf16.mxu0 %v1257_v37 }
  0x67   : > { %743 = vmatprep.mubr.bf16.mxu1 %v1259_v38  ;;  %1164 = vmatprep.subr.bf16.mxu0 %v1263_v39 }
  0x68   : > { %1179 = vmatprep.subr.bf16.mxu1 %v1263_v39 }
  0x69   : > { %1165 = vmatpush3.bf16.msra.mxu0 %v1263_v39 }
  0x6a   : > { %1183 = vmatpush3.bf16.msra.mxu1 %v1263_v39  ;;  %1166 = vmatprep.subr.bf16.mxu0 %v1270_v44 }
  0x6b   : > { %1180 = vmatprep.subr.bf16.mxu1 %v1270_v44 }
  0x6c   : > { %679 = vmatmul.mubr.bf16.gmra.mrb[4].mxu0 %v1261_v40 }
  0x6d   : > { %744 = vmatmul.mubr.bf16.gmra.mrb[4].mxu1 %v1262_v41  ;;  %686 = vmatprep.mubr.bf16.mxu0 %v1264_v42 }
  0x6e   : > { %751 = vmatprep.mubr.bf16.mxu1 %v1266_v43  ;;  %1167 = vmatpush3.bf16.msra.mxu0 %v1270_v44 }
  0x6f   : > { %1184 = vmatpush3.bf16.msra.mxu1 %v1270_v44  ;;  %1168 = vmatprep.subr.bf16.mxu0 %v1277_v45 }
  0x70   : > { %1181 = vmatprep.subr.bf16.mxu1 %v1277_v45 }
  0x72   : > { %1169 = vmatpush3.bf16.msra.mxu0 %v1277_v45 }
  0x73   : > { %1185 = vmatpush3.bf16.msra.mxu1 %v1277_v45 }
  0x74   : > { %687 = vmatmul.mubr.bf16.gmra.mrb[8].mxu0 %v1268_v46 }
  0x75   : > { %752 = vmatmul.mubr.bf16.gmra.mrb[8].mxu1 %v1269_v47  ;;  %694 = vmatprep.mubr.bf16.mxu0 %v1271_v48 }
  0x76   : > { %759 = vmatprep.mubr.bf16.mxu1 %v1273_v49 }
  0x7c   : > { %695 = vmatmul.mubr.bf16.gmra.mrb[12].mxu0 %v1275_v50 }
  0x7d   : > { %760 = vmatmul.mubr.bf16.gmra.mrb[12].mxu1 %v1276_v51  ;;  %1170 = vmatprep.mubr.msk.bf16.mxu0 %vm625_vm0, %v1278_v52 }
  0x7e   : > { %1174 = vmatprep.mubr.msk.bf16.mxu1 %vm625_vm0, %v1279_v53 }
  0x84   : > { %1171 = vmatmul.mubr.msk.bf16.vlgmr.msra.gmra.mrb[16].mxu0 %vm625_vm0, %v1280_v54 }
  0x85   : > { %1175 = vmatmul.mubr.msk.bf16.vlgmr.msra.gmra.mrb[16].mxu1 %vm625_vm0, %v1281_v55 }
 0x137   : > { %v1090_v56 = vpop.f32.mrb[0].mxu0 }
 0x138   : > { %v1130_v57 = vpop.f32.mrb[0].mxu1  ;;  %v1091_v59 = vpop.f32.mrb[1].mxu0 }
 0x139   : > { %v1092_v60 = vadd.f32 %v1091_v59, %v1090_v56  ;;  %v1131_v61 = vpop.f32.mrb[1].mxu1  ;;  %v1093_v62 = vpop.f32.mrb[2].mxu0 }
 0x13a   : > { %v1132_v63 = vadd.f32 %v1131_v61, %v1130_v57  ;;  %v1133_v0 = vpop.f32.mrb[2].mxu1  ;;  %v1094_v1 = vpop.f32.mrb[3].mxu0 }
 0x13b   : > { %v673_v2 = vadd.f32 %v1092_v60, %v972_v58  ;;  %v1095_v3 = vadd.f32 %v1094_v1, %v1093_v62  ;;  %v1134_v4 = vpop.f32.mrb[3].mxu1 }
 0x13c   : > { %v1135_v5 = vadd.f32 %v1134_v4, %v1133_v0 }
 0x13d   : > { %v676_v6 = vadd.f32 %v1095_v3, %v972_v58  ;;  %v738_v7 = vadd.f32 %v1132_v63, %v673_v2 }
 0x13f   : > { %v1096_v8 = vpop.f32.mrb[4].mxu0  ;;  %v741_v9 = vadd.f32 %v1135_v5, %v676_v6 }
 0x140   : > { %v1136_v10 = vpop.f32.mrb[4].mxu1  ;;  %v1097_v11 = vpop.f32.mrb[5].mxu0 }
 0x141   : > { %v1098_v12 = vadd.f32 %v1097_v11, %v1096_v8  ;;  %v1137_v13 = vpop.f32.mrb[5].mxu1  ;;  %v1099_v14 = vpop.f32.mrb[6].mxu0 }
 0x142   : > { %v1138_v15 = vadd.f32 %v1137_v13, %v1136_v10  ;;  %v1139_v16 = vpop.f32.mrb[6].mxu1  ;;  %v1100_v17 = vpop.f32.mrb[7].mxu0 }
 0x143   : > { %v681_v18 = vadd.f32 %v1098_v12, %v972_v58  ;;  %v1101_v19 = vadd.f32 %v1100_v17, %v1099_v14  ;;  %v1140_v20 = vpop.f32.mrb[7].mxu1 }
 0x144   : > { %v1141_v21 = vadd.f32 %v1140_v20, %v1139_v16 }
 0x145   : > { %v684_v22 = vadd.f32 %v1101_v19, %v972_v58  ;;  %v746_v23 = vadd.f32 %v1138_v15, %v681_v18 }
 0x147   : > { %v1102_v24 = vpop.f32.mrb[8].mxu0  ;;  %v749_v25 = vadd.f32 %v1141_v21, %v684_v22 }
 0x148   : > { %v1142_v26 = vpop.f32.mrb[8].mxu1  ;;  %v1103_v27 = vpop.f32.mrb[9].mxu0 }
 0x149   : > { %v1104_v28 = vadd.f32 %v1103_v27, %v1102_v24  ;;  %v1143_v29 = vpop.f32.mrb[9].mxu1  ;;  %v1105_v30 = vpop.f32.mrb[10].mxu0 }
 0x14a   : > { %v1144_v31 = vadd.f32 %v1143_v29, %v1142_v26  ;;  %v1145_v32 = vpop.f32.mrb[10].mxu1  ;;  %v1106_v33 = vpop.f32.mrb[11].mxu0 }
 0x14b   : > { %v689_v34 = vadd.f32 %v1104_v28, %v972_v58  ;;  %v1107_v35 = vadd.f32 %v1106_v33, %v1105_v30  ;;  %v1146_v36 = vpop.f32.mrb[11].mxu1 }
 0x14c   : > { %v1147_v37 = vadd.f32 %v1146_v36, %v1145_v32 }
 0x14d   : > { %v692_v38 = vadd.f32 %v1107_v35, %v972_v58  ;;  %v754_v39 = vadd.f32 %v1144_v31, %v689_v34 }
 0x14f   : > { %v1108_v40 = vpop.f32.mrb[12].mxu0  ;;  %v757_v41 = vadd.f32 %v1147_v37, %v692_v38 }
 0x150   : > { %v1148_v42 = vpop.f32.mrb[12].mxu1  ;;  %v1109_v43 = vpop.f32.mrb[13].mxu0 }
 0x151   : > { %v1110_v44 = vadd.f32 %v1109_v43, %v1108_v40  ;;  %v1149_v45 = vpop.f32.mrb[13].mxu1  ;;  %v1111_v46 = vpop.f32.mrb[14].mxu0 }
 0x152   : > { %v1150_v47 = vadd.f32 %v1149_v45, %v1148_v42  ;;  %v1151_v48 = vpop.f32.mrb[14].mxu1  ;;  %v1112_v49 = vpop.f32.mrb[15].mxu0 }
 0x153   : > { %v697_v50 = vadd.f32 %v1110_v44, %v972_v58  ;;  %v1113_v51 = vadd.f32 %v1112_v49, %v1111_v46  ;;  %v1152_v52 = vpop.f32.mrb[15].mxu1 }
 0x154   : > { %v1153_v53 = vadd.f32 %v1152_v52, %v1151_v48 }
 0x155   : > { %v700_v54 = vadd.f32 %v1113_v51, %v972_v58  ;;  %v762_v55 = vadd.f32 %v1150_v47, %v697_v50 }
 0x157   : > { %v1172_v56 = vpop.f32.mrb[16].mxu0  ;;  %v765_v57 = vadd.f32 %v1153_v53, %v700_v54 }
 0x158   : > { %v811_v59 = vadd.f32 %v1172_v56, %v746_v23  ;;  %v1176_v60 = vpop.f32.mrb[16].mxu1  ;;  %v802_v61 = vpop.f32.mrb[17].mxu0 }
 0x159   : > { %v827_v62 = vadd.f32 %v1176_v60, %v762_v55  ;;  %v803_v63 = vadd.f32 %v802_v61, %v738_v7  ;;  %v818_v0 = vpop.f32.mrb[17].mxu1  ;;  %v1173_v1 = vpop.f32.mrb[18].mxu0 }
 0x15a   : > { %v819_v2 = vadd.f32 %v818_v0, %v754_v39  ;;  %v814_v3 = vadd.f32 %v1173_v1, %v749_v25  ;;  %v1177_v4 = vpop.f32.mrb[18].mxu1  ;;  %v805_v5 = vpop.f32.mrb[19].mxu0  ;;  %v835_v11 = vmax.f32 %v811_v59, 0.0 }
 0x15b   : > { %v830_v6 = vadd.f32 %v1177_v4, %v765_v57  ;;  %v806_v8 = vadd.f32 %v805_v5, %v741_v9  ;;  %v821_v10 = vpop.f32.mrb[19].mxu1  ;;  %v839_v13 = vmax.f32 %v827_v62, 0.0  ;;  %v833_v14 = vmax.f32 %v803_v63, 0.0 }
 0x15c   : > { %v836_v58 = vmax.f32 %v814_v3, 0.0  ;;  %v822_v12 = vadd.f32 %v821_v10, %v757_v41  ;;  %v837_v16 = vmax.f32 %v819_v2, 0.0 }
 0x15d   : > { %v840_v7 = vmax.f32 %v830_v6, 0.0  ;;  %v834_v15 = vmax.f32 %v806_v8, 0.0 }
 0x15e   : > { %v1059_v17 = vpack.c.bf16 %v836_v58, %v835_v11  ;;  %v838_v18 = vmax.f32 %v822_v12, 0.0 }
 0x15f   : > { %v1069_v19 = vpack.c.bf16 %v840_v7, %v839_v13  ;;  %v1054_v20 = vpack.c.bf16 %v834_v15, %v833_v14 }
 0x160   : > { %1071 = vst [vmem:[%s203_s26 + $0x8] sm:$0xff] %v1059_v17   ;;  %v1064_v21 = vpack.c.bf16 %v838_v18, %v837_v16 }
 0x161   : > { %1073 = vst [vmem:[%s203_s26 + $0x18] sm:$0xff] %v1069_v19   ;;  %1055 = vst [vmem:[%s203_s26] sm:$0xff] %v1054_v20  }
 0x162   : > { %1072 = vst [vmem:[%s203_s26 + $0x10] sm:$0xff] %v1064_v21  }
 0x163 PF: > { %s15_s12 = sadd.s32 1, %s1352_s12  }
 0x164   : > { %p12_p2 = scmp.ge.s32.totalorder %s15_s12, 4  }
 0x166   :  { %14 = sbr.rel (!%p12_p2) target bundleno = 2 (0x2), region = 71 }
 0x16d   :  { %903 = vsyncpa [#allocation3], 1 }
 0x16e   :  { %905 = vsyncpa [#allocation3 + $0x1], 1 }
 0x16f   :  { %906 = vsyncpa [#allocation5], 1 }

// kernel: _lambda_.8
= control target key start
LH: loop header
LB: loop body
LE: loop exit
PB: predicated region body
PF: predicated region fallthrough
CT: control target
= control target key end

     0   :  { %8 = vsyncpa [#allocation3], 0  ;;  %s2200_s0 = inlined_call_operand.vmem [shape: bf16[512,288], index: 0, kind: input, shape index: {}]   ;;  %s2201_s1 = inlined_call_operand.hbm [shape: bf16[288,128], index: 1, kind: input, shape index: {}]   ;;  %s2202_s2 = inlined_call_operand.hbm [shape: f32[1,128], index: 2, kind: input, shape index: {}]   ;;  %s2203_s3 = inlined_call_operand.vmem [shape: bf16[512,128], index: 3, kind: output, shape index: {}]  }
   0x1   :  { %9 = vsyncpa [#allocation5], 0  ;;  %s1951_s12 = smov 0  }
   0x2 LB: > { %s1302_s13 = sadd.s32 4294967295, %s1925_s12   ;;  %p1304_p0 = scmp.ge.s32.totalorder %s1925_s12, 1  ;;  %s1925_s12 = sphi %s1951_s12, %s15_s12  }
   0x3   : > { %p114_p1 = scmp.lt.s32.totalorder %s1925_s12, 3  ;;  %s1927_s14 = smov [#allocation2]  }
   0x4   : > { %s126_s15 = sshll.u32 %s1927_s14, 4  ;;  %p1965_p3 = scmp.eq.s32.totalorder %s1302_s13, 0  ;;  %s127_s15 = int_to_ptr.vmem [resolvable:$true] %s126_s15 }
   0x5   : > { %p1959_p2 = pnand %p1304_p0, %p114_p1  ;;  %s1928_s18 = smov [#allocation4]  }
   0x6   : > { %s2208_s17 = scalar_select %p1965_p3, 1, 0 }
   0x7   : > { %s2207_s16 = scalar_select %p1959_p2, 1, 0 }
   0x8   : > { %p1750_p4 = pneg %p1959_p2  ;;  %s140_s19 = sshll.u32 %s1928_s18, 4  ;;  %s1977_s19 = int_to_ptr.vmem [resolvable:$true] %s140_s19 }
   0x9   : > { %s1855_s23 = scalar_lea.hbm %s2201_s1, 2304 }
   0xa   : > { %p1973_p5 = pnand %p1965_p3, %p1750_p4  ;;  %p1856_p6 = scmp.ne.s32.totalorder %s2201_s1, %s1855_s23 }
   0xb   : > { %p1862_p10 = scmp.lt.u32.totalorder %s1855_s23, %s2201_s1 }
   0xc   : > { %p1857_p7 = pneg %p1973_p5 }
   0xe   : > { %p1858_p8 = pnand %p1857_p7, %p1856_p6 }
  0x10   : > { %p1859_p9 = pneg %p1858_p8 }
  0x12   : > { %p1864_p11 = pnand %p1862_p10, %p1859_p9 }
  0x14   : > { %1867 = shalt.err (!%p1864_p11)
}
  0x15   : > { %s1868_s28 = scalar_lea.vmem %s127_s15, 2304  ;;  %p1876_p1 = scmp.lt.s32.totalorder %s127_s15, %s127_s15 }
  0x16   : > { %p1869_p12 = scmp.ne.s32.totalorder %s127_s15, %s1868_s28  ;;  %p1877_p4 = scmp.lt.s32.totalorder %s1868_s28, %s1868_s28 }
  0x18   : > { %p1871_p13 = pnand %p1869_p12, %p1857_p7  ;;  %p1878_p3 = por %p1877_p4, %p1876_p1 }
  0x1a   : > { %p1872_p0 = pneg %p1871_p13 }
  0x1c   : > { %p1879_p2 = pnand %p1878_p3, %p1872_p0 }
  0x1e   : > { %1882 = shalt.err (!%p1879_p2)
}
  0x1f   : > { %s1929_s29 = smov 64   ;;  %s1930_s30 = smov 4  }
  0x20   : > { %1753 = dma.hbm_to_vmem [thread:$0]  (!%p1973_p5), %s2201_s1, 2304, %s127_s15, [#allocation3], %s1929_s29, %s1929_s29, %s1930_s30  }
  0x21   : > { %s1883_s8 = scalar_lea.hbm %s2202_s2, 16 }
  0x22   : > { %p1884_p6 = scmp.ne.s32.totalorder %s2202_s2, %s1883_s8  ;;  %p1890_p8 = scmp.lt.u32.totalorder %s1883_s8, %s2202_s2 }
  0x24   : > { %p1886_p2 = pnand %p1884_p6, %p1857_p7 }
  0x26   : > { %p1887_p3 = pneg %p1886_p2 }
  0x28   : > { %p1892_p9 = pnand %p1890_p8, %p1887_p3 }
  0x2a   : > { %1895 = shalt.err (!%p1892_p9)
}
  0x2b   : > { %s1896_s15 = scalar_lea.vmem %s1977_s19, 16  ;;  %s1903_s18 = scalar_lea.vmem %s1977_s19, 32 }
  0x2c   : > { %p1897_p10 = scmp.ne.s32.totalorder %s1977_s19, %s1896_s15  ;;  %p1904_p13 = scmp.lt.s32.totalorder %s1977_s19, %s1977_s19 }
  0x2d   : > { %p1905_p0 = scmp.lt.s32.totalorder %s1903_s18, %s1896_s15 }
  0x2e   : > { %p1899_p11 = pnand %p1897_p10, %p1857_p7 }
  0x2f   : > { %p1906_p1 = por %p1905_p0, %p1904_p13 }
  0x30   : > { %p1900_p12 = pneg %p1899_p11 }
  0x32   : > { %p1907_p4 = pnand %p1906_p1, %p1900_p12 }
  0x34   : > { %1910 = shalt.err (!%p1907_p4)
}
  0x35   : > { %1756 = dma.hbm_to_vmem [thread:$0]  (!%p1973_p5), %s2202_s2, 16, %s1977_s19, [#allocation5]  }
  0x36   : > { %p2210_p6 = scmp.ne.s32.totalorder %s2207_s16, 0 }
  0x37   : > { %p2211_p7 = scmp.ne.s32.totalorder (!%p2210_p6), %s2208_s17, 0 }
  0x38   : > { %163 = sbr.rel (%p2210_p6) target bundleno = 413 (0x19d), region = 32 }
  0x3f   : > { %1916 = dma.done.wait (%p2211_p7), [#allocation3], 2304  }
  0x40   : > { %1918 = vsyncadd (%p2211_p7), [#allocation3], 4294964992 }
  0x41   : > { %1920 = dma.done.wait (%p2211_p7), [#allocation5], 16  }
  0x42   : > { %1922 = vsyncadd (%p2211_p7), [#allocation5], 4294967280  ;;  %s1311_s20 = sshll.u32 %s1302_s13, 5  ;;  %v1773_v0 = vld [vmem:[#allocation2 + $0x40] sm:$0xff]   ;;  %v1775_v2 = vld [vmem:[#allocation2 + $0x48] sm:$0xff]   ;;  %vm661_vm0 = vcmask 261120  }
  0x43   : > { %v1774_v1 = vld [vmem:[#allocation2] sm:$0xff]   ;;  %1559 = vmatprep.subr.bf16.mxu0 %v1773_v0  ;;  %1725 = vmatprep.subr.bf16.mxu1 %v1773_v0  ;;  %p193_p5 = scmp.lt.s32.totalorder %s1311_s20, 63  ;;  %v1776_v3 = vld [vmem:[#allocation2 + $0x8] sm:$0xff]   ;;  %v1777_v4 = vld [vmem:[#allocation2 + $0x50] sm:$0xff]  }
  0x44   : > { %1560 = vmatpush3.bf16.msra.mxu0 %v1774_v1  ;;  %1733 = vmatpush3.bf16.msra.mxu1 %v1774_v1  ;;  %v1778_v5 = vld [vmem:[#allocation2 + $0x10] sm:$0xff]   ;;  %v1779_v6 = vld [vmem:[#allocation2 + $0x58] sm:$0xff]   ;;  %v1781_v8 = vld [vmem:[#allocation2 + $0x60] sm:$0xff]  }
  0x45   : > { %1561 = vmatprep.subr.bf16.mxu0 %v1775_v2  ;;  %1726 = vmatprep.subr.bf16.mxu1 %v1775_v2  ;;  %s2213_s20 = smov (!%p193_p5, %s1311_s20), 63  ;;  %v1780_v7 = vld [vmem:[#allocation2 + $0x18] sm:$0xff]   ;;  %v1782_v9 = vld [vmem:[#allocation2 + $0x20] sm:$0xff]   ;;  %v1783_v10 = vld [vmem:[#allocation2 + $0x68] sm:$0xff]  }
  0x46   : > { %s1741_s13 = smul.u32 12, %s2213_s20  ;;  %v1784_v13 = vld [vmem:[#allocation2 + $0x28] sm:$0xff]   ;;  %v1785_v14 = vld [vmem:[#allocation2 + $0x70] sm:$0xff]   ;;  %v1787_v16 = vld [vmem:[#allocation2 + $0x78] sm:$0xff]   ;;  %s1314_s23 = sshll.u32 %s2213_s20, 2 }
  0x47   : > { %v1786_v15 = vld [vmem:[#allocation2 + $0x30] sm:$0xff]   ;;  %v1788_v17 = vld [vmem:[#allocation2 + $0x38] sm:$0xff]   ;;  %v1795_v18 = vld [vmem:[#allocation2 + $0x80] sm:$0xff]   ;;  %s2137_s26 = scalar_lea.vmem %s2203_s3, %s1314_s23 }
  0x48   : > { %1562 = vmatpush3.bf16.msra.mxu0 %v1776_v3  ;;  %1734 = vmatpush3.bf16.msra.mxu1 %v1776_v3  ;;  %s2045_s19 = scalar_lea.vmem %s2200_s0, %s1741_s13  ;;  %v1808_v23 = vld [vmem:[#allocation2 + $0x88] sm:$0xff]  }
  0x49   : > { %1563 = vmatprep.subr.bf16.mxu0 %v1777_v4  ;;  %1727 = vmatprep.subr.bf16.mxu1 %v1777_v4  ;;  %v1791_v11 = vld [vmem:[%s2045_s19 + $0x4] ss:$12 sps:$4 sm:$0xff]   ;;  %v1789_v19 = vld [vmem:[%s2045_s19] ss:$12 sps:$4 sm:$0xff]   ;;  %v1796_v21 = vld [vmem:[%s2045_s19 + $0x1c] ss:$12 sps:$4 sm:$0xff]  }
  0x4a   : > { %v1794_v12 = vld [vmem:[%s2045_s19 + $0x124] ss:$12 sps:$4 sm:$0xff]   ;;  %742 = vmatprep.mubr.bf16.mxu0 %v1791_v11  ;;  %v1792_v20 = vld [vmem:[%s2045_s19 + $0x120] ss:$12 sps:$4 sm:$0xff]   ;;  %v1798_v22 = vld [vmem:[%s2045_s19 + $0x13c] ss:$12 sps:$4 sm:$0xff]  }
  0x4b   : > { %838 = vmatprep.mubr.bf16.mxu1 %v1794_v12  ;;  %v1800_v24 = vld [vmem:[%s2045_s19 + $0x18] ss:$12 sps:$4 sm:$0xff]   ;;  %v1802_v26 = vld [vmem:[%s2045_s19 + $0x34] ss:$12 sps:$4 sm:$0xff]   ;;  %v1806_v28 = vld [vmem:[%s2045_s19 + $0x30] ss:$12 sps:$4 sm:$0xff]  }
  0x4c   : > { %1564 = vmatpush3.bf16.msra.mxu0 %v1778_v5  ;;  %1735 = vmatpush3.bf16.msra.mxu1 %v1778_v5  ;;  %v1801_v25 = vld [vmem:[%s2045_s19 + $0x138] ss:$12 sps:$4 sm:$0xff]   ;;  %v1804_v27 = vld [vmem:[%s2045_s19 + $0x154] ss:$12 sps:$4 sm:$0xff]   ;;  %v1807_v29 = vld [vmem:[%s2045_s19 + $0x150] ss:$12 sps:$4 sm:$0xff]  }
  0x4d   : > { %1565 = vmatprep.subr.bf16.mxu0 %v1779_v6  ;;  %1728 = vmatprep.subr.bf16.mxu1 %v1779_v6  ;;  %v1809_v30 = vld [vmem:[%s2045_s19 + $0x4c] ss:$12 sps:$4 sm:$0xff]   ;;  %v1813_v32 = vld [vmem:[%s2045_s19 + $0x48] ss:$12 sps:$4 sm:$0xff]   ;;  %v1815_v34 = vld [vmem:[%s2045_s19 + $0x64] ss:$12 sps:$4 sm:$0xff]  }
  0x4e   : > { %v1811_v31 = vld [vmem:[%s2045_s19 + $0x16c] ss:$12 sps:$4 sm:$0xff]   ;;  %v1814_v33 = vld [vmem:[%s2045_s19 + $0x168] ss:$12 sps:$4 sm:$0xff]   ;;  %v1824_v41 = vld [vmem:[%s2045_s19 + $0x50] ss:$12 sps:$4 sm:$0xff]  }
  0x4f   : > { %v1817_v35 = vld [vmem:[%s2045_s19 + $0x8] ss:$12 sps:$4 sm:$0xff]   ;;  %v1818_v36 = vld [vmem:[%s2045_s19 + $0x60] ss:$12 sps:$4 sm:$0xff]   ;;  %v1822_v39 = vld [vmem:[%s2045_s19 + $0x38] ss:$12 sps:$4 sm:$0xff]  }
  0x50   : > { %1566 = vmatpush3.bf16.msra.mxu0 %v1780_v7  ;;  %1736 = vmatpush3.bf16.msra.mxu1 %v1780_v7  ;;  %v1819_v37 = vld [vmem:[%s2045_s19 + $0x20] ss:$12 sps:$4 sm:$0xff]   ;;  %v1820_v38 = vld [vmem:[%s2045_s19 + $0x7c] ss:$12 sps:$4 sm:$0xff]   ;;  %v1823_v40 = vld [vmem:[%s2045_s19 + $0x78] ss:$12 sps:$4 sm:$0xff]  }
  0x51   : > { %1567 = vmatprep.subr.bf16.mxu0 %v1781_v8  ;;  %1729 = vmatprep.subr.bf16.mxu1 %v1781_v8  ;;  %v1825_v42 = vld [vmem:[%s2045_s19 + $0x94] ss:$12 sps:$4 sm:$0xff]   ;;  %v1828_v44 = vld [vmem:[%s2045_s19 + $0x90] ss:$12 sps:$4 sm:$0xff]   ;;  %v1830_v46 = vld [vmem:[%s2045_s19 + $0xac] ss:$12 sps:$4 sm:$0xff]  }
  0x52   : > { %v1827_v43 = vld [vmem:[%s2045_s19 + $0x68] ss:$12 sps:$4 sm:$0xff]   ;;  %v1829_v45 = vld [vmem:[%s2045_s19 + $0x80] ss:$12 sps:$4 sm:$0xff]   ;;  %v1832_v47 = vld [vmem:[%s2045_s19 + $0x98] ss:$12 sps:$4 sm:$0xff]  }
  0x53   : > { %v1833_v48 = vld [vmem:[%s2045_s19 + $0xa8] ss:$12 sps:$4 sm:$0xff]   ;;  %v1834_v49 = vld [vmem:[%s2045_s19 + $0xb0] ss:$12 sps:$4 sm:$0xff]   ;;  %v1838_v52 = vld [vmem:[%s2045_s19 + $0xc0] ss:$12 sps:$4 sm:$0xff]  }
  0x54   : > { %1568 = vmatpush3.bf16.msra.mxu0 %v1782_v9  ;;  %1737 = vmatpush3.bf16.msra.mxu1 %v1782_v9  ;;  %v1835_v50 = vld [vmem:[%s2045_s19 + $0xc4] ss:$12 sps:$4 sm:$0xff]   ;;  %v1837_v51 = vld [vmem:[%s2045_s19 + $0xc8] ss:$12 sps:$4 sm:$0xff]   ;;  %v1839_v53 = vld [vmem:[%s2045_s19 + $0xe0] ss:$12 sps:$4 sm:$0xff]  }
  0x55   : > { %1569 = vmatprep.subr.bf16.mxu0 %v1783_v10  ;;  %1730 = vmatprep.subr.bf16.mxu1 %v1783_v10  ;;  %v1840_v54 = vld [vmem:[%s2045_s19 + $0xdc] ss:$12 sps:$4 sm:$0xff]   ;;  %v1842_v55 = vld [vmem:[%s2045_s19 + $0xf8] ss:$12 sps:$4 sm:$0xff]   ;;  %v1845_v58 = vld [vmem:[%s2045_s19 + $0xf4] ss:$12 sps:$4 sm:$0xff]  }
  0x56   : > { %v1843_v56 = vld [vmem:[%s2045_s19 + $0xd8] ss:$12 sps:$4 sm:$0xff]   ;;  %v1844_v57 = vld [vmem:[%s2045_s19 + $0x110] ss:$12 sps:$4 sm:$0xff]   ;;  %v1847_v59 = vld [vmem:[%s2045_s19 + $0x128] ss:$12 sps:$4 sm:$0xff]  }
  0x57   : > { %v1848_v60 = vld [vmem:[%s2045_s19 + $0xf0] ss:$12 sps:$4 sm:$0xff]   ;;  %v1849_v61 = vld [vmem:[%s2045_s19 + $0x140] ss:$12 sps:$4 sm:$0xff]   ;;  %v1852_v63 = vld [vmem:[%s2045_s19 + $0x158] ss:$12 sps:$4 sm:$0xff]  }
  0x58   : > { %1570 = vmatpush3.bf16.msra.mxu0 %v1784_v13  ;;  %1738 = vmatpush3.bf16.msra.mxu1 %v1784_v13  ;;  %v1850_v62 = vld [vmem:[%s2045_s19 + $0x10c] ss:$12 sps:$4 sm:$0xff]   ;;  %v1853_v0 = vld [vmem:[%s2045_s19 + $0x108] ss:$12 sps:$4 sm:$0xff]   ;;  %v1854_v1 = vld [vmem:[%s2045_s19 + $0x170] ss:$12 sps:$4 sm:$0xff]  }
  0x59   : > { %1571 = vmatprep.subr.bf16.mxu0 %v1785_v14  ;;  %1731 = vmatprep.subr.bf16.mxu1 %v1785_v14 }
  0x5c   : > { %1572 = vmatpush3.bf16.msra.mxu0 %v1786_v15  ;;  %1739 = vmatpush3.bf16.msra.mxu1 %v1786_v15 }
  0x5d   : > { %1573 = vmatprep.subr.bf16.mxu0 %v1787_v16  ;;  %1732 = vmatprep.subr.bf16.mxu1 %v1787_v16 }
  0x60   : > { %1574 = vmatpush3.bf16.msra.mxu0 %v1788_v17  ;;  %1740 = vmatpush3.bf16.msra.mxu1 %v1788_v17 }
  0x61   : > { %1689 = vmatprep.subr.bf16.mxu1 %v1795_v18 }
  0x63   : > { %743 = vmatmul.mubr.bf16.vlgmr.msra.gmra.mrb[0].mxu0 %v1789_v19  ;;  %839 = vmatmul.mubr.bf16.vlgmr.msra.gmra.mrb[0].mxu1 %v1792_v20 }
  0x64   : > { %1690 = vmatpush3.bf16.msra.mxu1 %v1795_v18  ;;  %750 = vmatprep.mubr.bf16.mxu0 %v1796_v21 }
  0x65   : > { %846 = vmatprep.mubr.bf16.mxu1 %v1798_v22  ;;  %1691 = vmatprep.subr.bf16.mxu1 %v1808_v23 }
  0x68   : > { %1692 = vmatpush3.bf16.msra.mxu1 %v1808_v23 }
  0x6b   : > { %751 = vmatmul.mubr.bf16.gmra.mrb[4].mxu0 %v1800_v24  ;;  %847 = vmatmul.mubr.bf16.gmra.mrb[4].mxu1 %v1801_v25 }
  0x6c   : > { %758 = vmatprep.mubr.bf16.mxu0 %v1802_v26  ;;  %854 = vmatprep.mubr.bf16.mxu1 %v1804_v27 }
  0x73   : > { %759 = vmatmul.mubr.bf16.gmra.mrb[8].mxu0 %v1806_v28  ;;  %855 = vmatmul.mubr.bf16.gmra.mrb[8].mxu1 %v1807_v29 }
  0x74   : > { %766 = vmatprep.mubr.bf16.mxu0 %v1809_v30  ;;  %862 = vmatprep.mubr.bf16.mxu1 %v1811_v31 }
  0x7b   : > { %767 = vmatmul.mubr.bf16.gmra.mrb[12].mxu0 %v1813_v32  ;;  %863 = vmatmul.mubr.bf16.gmra.mrb[12].mxu1 %v1814_v33 }
  0x7c   : > { %774 = vmatprep.mubr.bf16.mxu0 %v1815_v34  ;;  %1693 = vmatprep.mubr.msk.bf16.mxu1 %vm661_vm0, %v1817_v35 }
  0x83   : > { %775 = vmatmul.mubr.bf16.gmra.mrb[16].mxu0 %v1818_v36  ;;  %1694 = vmatmul.mubr.msk.bf16.vlgmr.msra.gmra.mrb[16].mxu1 %vm661_vm0, %v1819_v37 }
  0x84   : > { %782 = vmatprep.mubr.bf16.mxu0 %v1820_v38  ;;  %1697 = vmatprep.mubr.msk.bf16.mxu1 %vm661_vm0, %v1822_v39 }
  0x8b   : > { %783 = vmatmul.mubr.bf16.gmra.mrb[20].mxu0 %v1823_v40  ;;  %1698 = vmatmul.mubr.msk.bf16.gmra.mrb[20].mxu1 %vm661_vm0, %v1824_v41 }
  0x8c   : > { %790 = vmatprep.mubr.bf16.mxu0 %v1825_v42  ;;  %1701 = vmatprep.mubr.msk.bf16.mxu1 %vm661_vm0, %v1827_v43 }
  0x93   : > { %791 = vmatmul.mubr.bf16.gmra.mrb[24].mxu0 %v1828_v44  ;;  %1702 = vmatmul.mubr.msk.bf16.gmra.mrb[24].mxu1 %vm661_vm0, %v1829_v45 }
  0x94   : > { %798 = vmatprep.mubr.bf16.mxu0 %v1830_v46  ;;  %1705 = vmatprep.mubr.msk.bf16.mxu1 %vm661_vm0, %v1832_v47 }
  0x9b   : > { %799 = vmatmul.mubr.bf16.gmra.mrb[28].mxu0 %v1833_v48  ;;  %1706 = vmatmul.mubr.msk.bf16.gmra.mrb[28].mxu1 %vm661_vm0, %v1834_v49 }
  0x9c   : > { %806 = vmatprep.mubr.bf16.mxu0 %v1835_v50  ;;  %1709 = vmatprep.mubr.msk.bf16.mxu1 %vm661_vm0, %v1837_v51  ;;  %v2127_v50 = vld [vmem:[#allocation4] ss:$0 sm:$0xff] }
  0xa3   : > { %807 = vmatmul.mubr.bf16.gmra.mrb[32].mxu0 %v1838_v52  ;;  %1710 = vmatmul.mubr.msk.bf16.gmra.mrb[32].mxu1 %vm661_vm0, %v1839_v53 }
  0xa4   : > { %814 = vmatprep.mubr.bf16.mxu0 %v1840_v54  ;;  %1713 = vmatprep.mubr.msk.bf16.mxu1 %vm661_vm0, %v1842_v55 }
  0xab   : > { %815 = vmatmul.mubr.bf16.gmra.mrb[36].mxu0 %v1843_v56  ;;  %1714 = vmatmul.mubr.msk.bf16.gmra.mrb[36].mxu1 %vm661_vm0, %v1844_v57 }
  0xac   : > { %822 = vmatprep.mubr.bf16.mxu0 %v1845_v58  ;;  %1717 = vmatprep.mubr.msk.bf16.mxu1 %vm661_vm0, %v1847_v59 }
  0xb3   : > { %823 = vmatmul.mubr.bf16.gmra.mrb[40].mxu0 %v1848_v60  ;;  %1718 = vmatmul.mubr.msk.bf16.gmra.mrb[40].mxu1 %vm661_vm0, %v1849_v61 }
  0xb4   : > { %830 = vmatprep.mubr.bf16.mxu0 %v1850_v62  ;;  %1721 = vmatprep.mubr.msk.bf16.mxu1 %vm661_vm0, %v1852_v63 }
  0xbb   : > { %831 = vmatmul.mubr.bf16.gmra.mrb[44].mxu0 %v1853_v0  ;;  %1722 = vmatmul.mubr.msk.bf16.gmra.mrb[44].mxu1 %vm661_vm0, %v1854_v1 }
 0x136   : > { %v1575_v2 = vpop.f32.mrb[0].mxu0  ;;  %v1647_v3 = vpop.f32.mrb[0].mxu1 }
 0x137   : > { %v1576_v4 = vpop.f32.mrb[1].mxu0  ;;  %v1648_v5 = vpop.f32.mrb[1].mxu1 }
 0x138   : > { %v1577_v6 = vadd.f32 %v1576_v4, %v1575_v2  ;;  %v1578_v7 = vpop.f32.mrb[2].mxu0  ;;  %v2111_v8 = vadd.f32 %v1648_v5, %v1647_v3  ;;  %v1650_v9 = vpop.f32.mrb[2].mxu1 }
 0x139   : > { %v1579_v10 = vpop.f32.mrb[3].mxu0  ;;  %v1651_v11 = vpop.f32.mrb[3].mxu1 }
 0x13a   : > { %v1580_v12 = vadd.f32 %v1579_v10, %v1578_v7  ;;  %v2113_v13 = vadd.f32 %v1651_v11, %v1650_v9  ;;  %v745_v54 = vadd.f32 %v1577_v6, %v2127_v50 }
 0x13c   : > { %v748_v63 = vadd.f32 %v1580_v12, %v2127_v50 }
 0x13e   : > { %v1581_v14 = vpop.f32.mrb[4].mxu0  ;;  %v1653_v15 = vpop.f32.mrb[4].mxu1 }
 0x13f   : > { %v1582_v16 = vpop.f32.mrb[5].mxu0  ;;  %v1654_v17 = vpop.f32.mrb[5].mxu1 }
 0x140   : > { %v1583_v18 = vadd.f32 %v1582_v16, %v1581_v14  ;;  %v1584_v19 = vpop.f32.mrb[6].mxu0  ;;  %v2115_v20 = vadd.f32 %v1654_v17, %v1653_v15  ;;  %v1656_v21 = vpop.f32.mrb[6].mxu1 }
 0x141   : > { %v1585_v22 = vpop.f32.mrb[7].mxu0  ;;  %v1657_v23 = vpop.f32.mrb[7].mxu1 }
 0x142   : > { %v1586_v24 = vadd.f32 %v1585_v22, %v1584_v19  ;;  %v2117_v25 = vadd.f32 %v1657_v23, %v1656_v21  ;;  %v753_v51 = vadd.f32 %v1583_v18, %v2127_v50 }
 0x144   : > { %v756_v58 = vadd.f32 %v1586_v24, %v2127_v50 }
 0x146   : > { %v1587_v26 = vpop.f32.mrb[8].mxu0  ;;  %v1659_v27 = vpop.f32.mrb[8].mxu1 }
 0x147   : > { %v1588_v28 = vpop.f32.mrb[9].mxu0  ;;  %v1660_v29 = vpop.f32.mrb[9].mxu1 }
 0x148   : > { %v1589_v30 = vadd.f32 %v1588_v28, %v1587_v26  ;;  %v1590_v31 = vpop.f32.mrb[10].mxu0  ;;  %v2119_v32 = vadd.f32 %v1660_v29, %v1659_v27  ;;  %v1662_v33 = vpop.f32.mrb[10].mxu1 }
 0x149   : > { %v1591_v34 = vpop.f32.mrb[11].mxu0  ;;  %v1663_v35 = vpop.f32.mrb[11].mxu1 }
 0x14a   : > { %v1592_v36 = vadd.f32 %v1591_v34, %v1590_v31  ;;  %v2121_v37 = vadd.f32 %v1663_v35, %v1662_v33  ;;  %v761_v16 = vadd.f32 %v1589_v30, %v2127_v50 }
 0x14c   : > { %v764_v27 = vadd.f32 %v1592_v36, %v2127_v50 }
 0x14e   : > { %v1593_v38 = vpop.f32.mrb[12].mxu0  ;;  %v1665_v39 = vpop.f32.mrb[12].mxu1 }
 0x14f   : > { %v1594_v40 = vpop.f32.mrb[13].mxu0  ;;  %v1666_v41 = vpop.f32.mrb[13].mxu1 }
 0x150   : > { %v1595_v42 = vadd.f32 %v1594_v40, %v1593_v38  ;;  %v1596_v43 = vpop.f32.mrb[14].mxu0  ;;  %v2123_v44 = vadd.f32 %v1666_v41, %v1665_v39  ;;  %v1668_v45 = vpop.f32.mrb[14].mxu1 }
 0x151   : > { %v1597_v46 = vpop.f32.mrb[15].mxu0  ;;  %v1669_v47 = vpop.f32.mrb[15].mxu1 }
 0x152   : > { %v1598_v48 = vadd.f32 %v1597_v46, %v1596_v43  ;;  %v2125_v49 = vadd.f32 %v1669_v47, %v1668_v45  ;;  %v769_v11 = vadd.f32 %v1595_v42, %v2127_v50 }
 0x154   : > { %v772_v21 = vadd.f32 %v1598_v48, %v2127_v50 }
 0x156   : > { %v1599_v52 = vpop.f32.mrb[16].mxu0  ;;  %v1695_v53 = vpop.f32.mrb[16].mxu1 }
 0x157   : > { %v914_v55 = vadd.f32 %v1695_v53, %v753_v51  ;;  %v1600_v56 = vpop.f32.mrb[17].mxu0  ;;  %v905_v57 = vpop.f32.mrb[17].mxu1 }
 0x158   : > { %v1601_v59 = vadd.f32 %v1600_v56, %v1599_v52  ;;  %v906_v60 = vadd.f32 %v905_v57, %v745_v54  ;;  %v1602_v61 = vpop.f32.mrb[18].mxu0  ;;  %v1696_v62 = vpop.f32.mrb[18].mxu1 }
 0x159   : > { %v917_v0 = vadd.f32 %v1696_v62, %v756_v58  ;;  %v1603_v1 = vpop.f32.mrb[19].mxu0  ;;  %v908_v2 = vpop.f32.mrb[19].mxu1  ;;  %v1034_v5 = vmax.f32 %v914_v55, 0.0 }
 0x15a   : > { %v1604_v3 = vadd.f32 %v1603_v1, %v1602_v61  ;;  %v909_v4 = vadd.f32 %v908_v2, %v748_v63  ;;  %v1032_v6 = vmax.f32 %v906_v60, 0.0  ;;  %v777_v46 = vadd.f32 %v1601_v59, %v2127_v50 }
 0x15b   : > { %v1035_v7 = vmax.f32 %v917_v0, 0.0 }
 0x15c   : > { %v1033_v9 = vmax.f32 %v909_v4, 0.0  ;;  %v780_v56 = vadd.f32 %v1604_v3, %v2127_v50 }
 0x15d   : > { %v1472_v10 = vpack.c.bf16 %v1035_v7, %v1034_v5 }
 0x15e   : > { %v1467_v12 = vpack.c.bf16 %v1033_v9, %v1032_v6  ;;  %v1605_v14 = vpop.f32.mrb[20].mxu0  ;;  %v1699_v15 = vpop.f32.mrb[20].mxu1 }
 0x15f   : > { %1544 = vst [vmem:[%s2137_s26 + $0x8] sm:$0xff] %v1472_v10   ;;  %v930_v17 = vadd.f32 %v1699_v15, %v769_v11  ;;  %v1606_v18 = vpop.f32.mrb[21].mxu0  ;;  %v921_v19 = vpop.f32.mrb[21].mxu1 }
 0x160   : > { %1468 = vst [vmem:[%s2137_s26] sm:$0xff] %v1467_v12   ;;  %v1607_v22 = vadd.f32 %v1606_v18, %v1605_v14  ;;  %v922_v23 = vadd.f32 %v921_v19, %v761_v16  ;;  %v1608_v24 = vpop.f32.mrb[22].mxu0  ;;  %v1700_v26 = vpop.f32.mrb[22].mxu1 }
 0x161   : > { %v933_v28 = vadd.f32 %v1700_v26, %v772_v21  ;;  %v1609_v29 = vpop.f32.mrb[23].mxu0  ;;  %v924_v31 = vpop.f32.mrb[23].mxu1  ;;  %v1038_v30 = vmax.f32 %v930_v17, 0.0 }
 0x162   : > { %v1610_v33 = vadd.f32 %v1609_v29, %v1608_v24  ;;  %v925_v34 = vadd.f32 %v924_v31, %v764_v27  ;;  %v1036_v38 = vmax.f32 %v922_v23, 0.0  ;;  %v785_v41 = vadd.f32 %v1607_v22, %v2127_v50 }
 0x163   : > { %v1039_v35 = vmax.f32 %v933_v28, 0.0 }
 0x164   : > { %v1037_v39 = vmax.f32 %v925_v34, 0.0  ;;  %v788_v51 = vadd.f32 %v1610_v33, %v2127_v50 }
 0x165   : > { %v1482_v40 = vpack.c.bf16 %v1039_v35, %v1038_v30 }
 0x166   : > { %v1477_v42 = vpack.c.bf16 %v1037_v39, %v1036_v38  ;;  %v1611_v43 = vpop.f32.mrb[24].mxu0  ;;  %v1703_v45 = vpop.f32.mrb[24].mxu1 }
 0x167   : > { %1546 = vst [vmem:[%s2137_s26 + $0x18] sm:$0xff] %v1482_v40   ;;  %v946_v36 = vadd.f32 %v1703_v45, %v785_v41  ;;  %v1612_v47 = vpop.f32.mrb[25].mxu0  ;;  %v937_v48 = vpop.f32.mrb[25].mxu1 }
 0x168   : > { %1545 = vst [vmem:[%s2137_s26 + $0x10] sm:$0xff] %v1477_v42   ;;  %v1613_v52 = vadd.f32 %v1612_v47, %v1611_v43  ;;  %v938_v53 = vadd.f32 %v937_v48, %v777_v46  ;;  %v1614_v54 = vpop.f32.mrb[26].mxu0  ;;  %v1704_v55 = vpop.f32.mrb[26].mxu1 }
 0x169   : > { %v949_v57 = vadd.f32 %v1704_v55, %v788_v51  ;;  %v1615_v58 = vpop.f32.mrb[27].mxu0  ;;  %v940_v60 = vpop.f32.mrb[27].mxu1  ;;  %v1042_v62 = vmax.f32 %v946_v36, 0.0 }
 0x16a   : > { %v1616_v61 = vadd.f32 %v1615_v58, %v1614_v54  ;;  %v941_v59 = vadd.f32 %v940_v60, %v780_v56  ;;  %v1040_v0 = vmax.f32 %v938_v53, 0.0  ;;  %v793_v6 = vadd.f32 %v1613_v52, %v2127_v50 }
 0x16b   : > { %v1043_v63 = vmax.f32 %v949_v57, 0.0 }
 0x16c   : > { %v1041_v1 = vmax.f32 %v941_v59, 0.0  ;;  %v796_v15 = vadd.f32 %v1616_v61, %v2127_v50 }
 0x16d   : > { %v1492_v2 = vpack.c.bf16 %v1043_v63, %v1042_v62 }
 0x16e   : > { %v1487_v4 = vpack.c.bf16 %v1041_v1, %v1040_v0  ;;  %v1617_v5 = vpop.f32.mrb[28].mxu0  ;;  %v1707_v7 = vpop.f32.mrb[28].mxu1 }
 0x16f   : > { %1548 = vst [vmem:[%s2137_s26 + $0x28] sm:$0xff] %v1492_v2   ;;  %v1618_v9 = vpop.f32.mrb[29].mxu0  ;;  %v953_v10 = vpop.f32.mrb[29].mxu1 }
 0x170   : > { %1547 = vst [vmem:[%s2137_s26 + $0x20] sm:$0xff] %v1487_v4   ;;  %v1619_v3 = vadd.f32 %v1618_v9, %v1617_v5  ;;  %v954_v11 = vadd.f32 %v953_v10, %v793_v6  ;;  %v1620_v12 = vpop.f32.mrb[30].mxu0  ;;  %v1708_v14 = vpop.f32.mrb[30].mxu1  ;;  %v849_v4 = vadd.f32 %v2115_v20, %v2127_v50  ;;  %v841_v9 = vadd.f32 %v2111_v8, %v2127_v50 }
 0x171   : > { %v1621_v16 = vpop.f32.mrb[31].mxu0  ;;  %v956_v17 = vpop.f32.mrb[31].mxu1 }
 0x172   : > { %v801_v18 = vadd.f32 %v1619_v3, %v2127_v50  ;;  %v1622_v19 = vadd.f32 %v1621_v16, %v1620_v12  ;;  %v957_v21 = vadd.f32 %v956_v17, %v796_v15  ;;  %v1044_v23 = vmax.f32 %v954_v11, 0.0 }
 0x173   : > { %v852_v12 = vadd.f32 %v2117_v25, %v2127_v50 }
 0x174   : > { %v962_v22 = vadd.f32 %v1707_v7, %v801_v18  ;;  %v804_v24 = vadd.f32 %v1622_v19, %v2127_v50  ;;  %v1045_v26 = vmax.f32 %v957_v21, 0.0 }
 0x176   : > { %v965_v27 = vadd.f32 %v1708_v14, %v804_v24  ;;  %v1497_v28 = vpack.c.bf16 %v1045_v26, %v1044_v23  ;;  %v1623_v29 = vpop.f32.mrb[32].mxu0  ;;  %v1711_v31 = vpop.f32.mrb[32].mxu1  ;;  %v1046_v30 = vmax.f32 %v962_v22, 0.0  ;;  %v844_v22 = vadd.f32 %v2113_v13, %v2127_v50 }
 0x177   : > { %v1624_v33 = vpop.f32.mrb[33].mxu0  ;;  %v969_v34 = vpop.f32.mrb[33].mxu1 }
 0x178   : > { %v1047_v35 = vmax.f32 %v965_v27, 0.0  ;;  %1549 = vst [vmem:[%s2137_s26 + $0x30] sm:$0xff] %v1497_v28   ;;  %v1625_v38 = vadd.f32 %v1624_v33, %v1623_v29  ;;  %v1626_v39 = vpop.f32.mrb[34].mxu0  ;;  %v1712_v40 = vpop.f32.mrb[34].mxu1 }
 0x179   : > { %v1627_v41 = vpop.f32.mrb[35].mxu0  ;;  %v972_v42 = vpop.f32.mrb[35].mxu1 }
 0x17a   : > { %v1502_v43 = vpack.c.bf16 %v1047_v35, %v1046_v30  ;;  %v809_v45 = vadd.f32 %v1625_v38, %v2127_v50  ;;  %v1628_v46 = vadd.f32 %v1627_v41, %v1626_v39  ;;  %v865_v35 = vadd.f32 %v2123_v44, %v2127_v50 }
 0x17c   : > { %1550 = vst [vmem:[%s2137_s26 + $0x38] sm:$0xff] %v1502_v43   ;;  %v970_v36 = vadd.f32 %v969_v34, %v809_v45  ;;  %v812_v47 = vadd.f32 %v1628_v46, %v2127_v50  ;;  %v868_v46 = vadd.f32 %v2125_v49, %v2127_v50 }
 0x17e   : > { %v973_v48 = vadd.f32 %v972_v42, %v812_v47  ;;  %v1629_v51 = vpop.f32.mrb[36].mxu0  ;;  %v2161_v52 = vpop.f32.mrb[36].mxu1  ;;  %v1048_v55 = vmax.f32 %v970_v36, 0.0 }
 0x17f   : > { %v1630_v53 = vpop.f32.mrb[37].mxu0  ;;  %v985_v54 = vpop.f32.mrb[37].mxu1 }
 0x180   : > { %v1049_v56 = vmax.f32 %v973_v48, 0.0  ;;  %v1631_v57 = vadd.f32 %v1630_v53, %v1629_v51  ;;  %v1632_v58 = vpop.f32.mrb[38].mxu0  ;;  %v2163_v60 = vpop.f32.mrb[38].mxu1 }
 0x181   : > { %v1633_v61 = vpop.f32.mrb[39].mxu0  ;;  %v988_v59 = vpop.f32.mrb[39].mxu1 }
 0x182   : > { %v1507_v62 = vpack.c.bf16 %v1049_v56, %v1048_v55  ;;  %v817_v63 = vadd.f32 %v1631_v57, %v2127_v50  ;;  %v1634_v0 = vadd.f32 %v1633_v61, %v1632_v58 }
 0x184   : > { %1551 = vst [vmem:[%s2137_s26 + $0x40] sm:$0xff] %v1507_v62   ;;  %v978_v1 = vadd.f32 %v1711_v31, %v817_v63  ;;  %v820_v2 = vadd.f32 %v1634_v0, %v2127_v50 }
 0x186   : > { %v981_v5 = vadd.f32 %v1712_v40, %v820_v2  ;;  %v1635_v7 = vpop.f32.mrb[40].mxu0  ;;  %v1719_v6 = vpop.f32.mrb[40].mxu1  ;;  %v1050_v14 = vmax.f32 %v978_v1, 0.0  ;;  %v857_v40 = vadd.f32 %v2119_v32, %v2127_v50  ;;  %v860_v32 = vadd.f32 %v2121_v37, %v2127_v50 }
 0x187   : > { %v1010_v10 = vadd.f32 %v1719_v6, %v849_v4  ;;  %v1636_v3 = vpop.f32.mrb[41].mxu0  ;;  %v1001_v11 = vpop.f32.mrb[41].mxu1 }
 0x188   : > { %v1051_v15 = vmax.f32 %v981_v5, 0.0  ;;  %v1637_v16 = vadd.f32 %v1636_v3, %v1635_v7  ;;  %v1002_v17 = vadd.f32 %v1001_v11, %v841_v9  ;;  %v1638_v18 = vpop.f32.mrb[42].mxu0  ;;  %v1720_v19 = vpop.f32.mrb[42].mxu1 }
 0x189   : > { %v1013_v20 = vadd.f32 %v1720_v19, %v852_v12  ;;  %v1639_v21 = vpop.f32.mrb[43].mxu0  ;;  %v1004_v23 = vpop.f32.mrb[43].mxu1  ;;  %v1058_v27 = vmax.f32 %v1010_v10, 0.0 }
 0x18a   : > { %v1512_v8 = vpack.c.bf16 %v1051_v15, %v1050_v14  ;;  %v825_v24 = vadd.f32 %v1637_v16, %v2127_v50  ;;  %v1640_v26 = vadd.f32 %v1639_v21, %v1638_v18  ;;  %v1005_v28 = vadd.f32 %v1004_v23, %v844_v22 }
 0x18b   : > { %v1059_v25 = vmax.f32 %v1013_v20, 0.0  ;;  %v1056_v33 = vmax.f32 %v1002_v17, 0.0 }
 0x18c   : > { %1552 = vst [vmem:[%s2137_s26 + $0x48] sm:$0xff] %v1512_v8   ;;  %v986_v29 = vadd.f32 %v985_v54, %v825_v24  ;;  %v828_v31 = vadd.f32 %v1640_v26, %v2127_v50  ;;  %v1057_v30 = vmax.f32 %v1005_v28, 0.0 }
 0x18d   : > { %v1532_v34 = vpack.c.bf16 %v1059_v25, %v1058_v27 }
 0x18e   : > { %v989_v13 = vadd.f32 %v988_v59, %v828_v31  ;;  %v1641_v38 = vpop.f32.mrb[44].mxu0  ;;  %v1723_v39 = vpop.f32.mrb[44].mxu1  ;;  %v1527_v41 = vpack.c.bf16 %v1057_v30, %v1056_v33  ;;  %v1052_v36 = vmax.f32 %v986_v29, 0.0 }
 0x18f   : > { %1556 = vst [vmem:[%s2137_s26 + $0x68] sm:$0xff] %v1532_v34   ;;  %v1026_v42 = vadd.f32 %v1723_v39, %v865_v35  ;;  %v1642_v43 = vpop.f32.mrb[45].mxu0  ;;  %v1017_v45 = vpop.f32.mrb[45].mxu1 }
 0x190   : > { %v1053_v47 = vmax.f32 %v989_v13, 0.0  ;;  %v1643_v48 = vadd.f32 %v1642_v43, %v1641_v38  ;;  %v1018_v44 = vadd.f32 %v1017_v45, %v857_v40  ;;  %v1644_v51 = vpop.f32.mrb[46].mxu0  ;;  %v1724_v53 = vpop.f32.mrb[46].mxu1  ;;  %1555 = vst [vmem:[%s2137_s26 + $0x60] sm:$0xff] %v1527_v41  }
 0x191   : > { %v1029_v54 = vadd.f32 %v1724_v53, %v868_v46  ;;  %v1645_v55 = vpop.f32.mrb[47].mxu0  ;;  %v1020_v56 = vpop.f32.mrb[47].mxu1  ;;  %v1062_v61 = vmax.f32 %v1026_v42, 0.0 }
 0x192   : > { %v1517_v57 = vpack.c.bf16 %v1053_v47, %v1052_v36  ;;  %v833_v58 = vadd.f32 %v1643_v48, %v2127_v50  ;;  %v1646_v49 = vadd.f32 %v1645_v55, %v1644_v51  ;;  %v1021_v62 = vadd.f32 %v1020_v56, %v860_v32 }
 0x193   : > { %v1063_v59 = vmax.f32 %v1029_v54, 0.0  ;;  %v1060_v1 = vmax.f32 %v1018_v44, 0.0 }
 0x194   : > { %1553 = vst [vmem:[%s2137_s26 + $0x50] sm:$0xff] %v1517_v57   ;;  %v994_v63 = vadd.f32 %v2161_v52, %v833_v58  ;;  %v836_v0 = vadd.f32 %v1646_v49, %v2127_v50  ;;  %v1061_v4 = vmax.f32 %v1021_v62, 0.0 }
 0x195   : > { %v1542_v2 = vpack.c.bf16 %v1063_v59, %v1062_v61 }
 0x196   : > { %v997_v37 = vadd.f32 %v2163_v60, %v836_v0  ;;  %v1537_v5 = vpack.c.bf16 %v1061_v4, %v1060_v1  ;;  %v1054_v7 = vmax.f32 %v994_v63, 0.0 }
 0x197   : > { %1558 = vst [vmem:[%s2137_s26 + $0x78] sm:$0xff] %v1542_v2  }
 0x198   : > { %v1055_v6 = vmax.f32 %v997_v37, 0.0  ;;  %1557 = vst [vmem:[%s2137_s26 + $0x70] sm:$0xff] %v1537_v5  }
 0x19a   : > { %v1522_v9 = vpack.c.bf16 %v1055_v6, %v1054_v7 }
 0x19c   : > { %1554 = vst [vmem:[%s2137_s26 + $0x58] sm:$0xff] %v1522_v9  }
 0x19d PF: > { %s15_s12 = sadd.s32 1, %s1925_s12  }
 0x19e   : > { %p12_p2 = scmp.ge.s32.totalorder %s15_s12, 4  }
 0x1a0   :  { %14 = sbr.rel (!%p12_p2) target bundleno = 2 (0x2), region = 71 }
 0x1a7   :  { %1246 = vsyncpa [#allocation3], 1 }
 0x1a8   :  { %1248 = vsyncpa [#allocation3 + $0x1], 1 }
 0x1a9   :  { %1249 = vsyncpa [#allocation5], 1 }

// kernel: _lambda_.9
= control target key start
LH: loop header
LB: loop body
LE: loop exit
PB: predicated region body
PF: predicated region fallthrough
CT: control target
= control target key end

     0   :  { %s2740_s12 = smov 0   ;;  %s3253_s0 = inlined_call_operand.vmem [shape: bf16[2048,144], index: 0, kind: input, shape index: {}]   ;;  %s3254_s1 = inlined_call_operand.vmem [shape: bf16[144,128], index: 1, kind: input, shape index: {}]   ;;  %s3255_s2 = inlined_call_operand.vmem [shape: f32[1,128], index: 2, kind: input, shape index: {}]   ;;  %s3256_s3 = inlined_call_operand.vmem [shape: f32[2048,128], index: 3, kind: output, shape index: {}]  }
   0x1 LB: > { %s2011_s13 = sadd.s32 4294967295, %s2717_s12   ;;  %p2015_p0 = scmp.ge.s32.totalorder %s2717_s12, 1  ;;  %s2717_s12 = sphi %s2740_s12, %s13_s12  }
   0x2   : > { %p139_p1 = scmp.lt.s32.totalorder %s2717_s12, 3 }
   0x4   : > { %p140_p2 = pnand %p2015_p0, %p139_p1 }
   0x5   : > { %v2253_v0 = vld [vmem:[%s3254_s1] sm:$0xff] (!%p140_p2)   ;;  %v2719_v1 = vmov (!%p140_p2), 0   ;;  %s2016_s16 = sshll.u32 (!%p140_p2), %s2011_s13, 7  ;;  %v2254_v2 = vld [vmem:[%s3254_s1 + $0x8] sm:$0xff] (!%p140_p2)   ;;  %v2255_v3 = vld [vmem:[%s3254_s1 + $0x10] sm:$0xff] (!%p140_p2)   ;;  %vm961_vm0 = vcmask (!%p140_p2), 130048  }
   0x6   : > { %143 = sbr.rel (%p140_p2) target bundleno = 519 (0x207), region = 32  ;;  %1154 = vmatprep.subr.bf16.mxu0 (!%p140_p2), %v2719_v1  ;;  %2226 = vmatprep.subr.bf16.mxu1 (!%p140_p2), %v2719_v1  ;;  %p165_p3 = scmp.lt.s32.totalorder (!%p140_p2), %s2016_s16, 255  ;;  %v2256_v4 = vld [vmem:[%s3254_s1 + $0x18] sm:$0xff] (!%p140_p2)   ;;  %v2257_v7 = vld [vmem:[%s3254_s1 + $0x20] sm:$0xff] (!%p140_p2)   ;;  %v2258_v8 = vld [vmem:[%s3254_s1 + $0x28] sm:$0xff] (!%p140_p2)  }
   0x7   : > { %1155 = vmatpush1.bf16.msra.mxu0 (!%p140_p2), %v2253_v0  ;;  %2235 = vmatpush1.bf16.msra.mxu1 (!%p140_p2), %v2253_v0  ;;  %v2259_v9 = vld [vmem:[%s3254_s1 + $0x30] sm:$0xff] (!%p140_p2)   ;;  %v2260_v10 = vld [vmem:[%s3254_s1 + $0x38] sm:$0xff] (!%p140_p2)   ;;  %v2261_v11 = vld [vmem:[%s3254_s1 + $0x40] sm:$0xff] (!%p140_p2)  }
   0x8   : > { %1156 = vmatprep.subr.bf16.mxu0 (!%p140_p2), %v2719_v1  ;;  %2227 = vmatprep.subr.bf16.mxu1 (!%p140_p2), %v2719_v1 }
   0xb   : > { %1157 = vmatpush1.bf16.msra.mxu0 (!%p140_p2), %v2254_v2  ;;  %2236 = vmatpush1.bf16.msra.mxu1 (!%p140_p2), %v2254_v2 }
   0xc   : > { %1158 = vmatprep.subr.bf16.mxu0 (!%p140_p2), %v2719_v1  ;;  %2228 = vmatprep.subr.bf16.mxu1 (!%p140_p2), %v2719_v1 }
   0xd   : > { %s3258_s16 = smov (!%p165_p3, %s2016_s16), 255 }
   0xe   : > { %s2225_s21 = sshll.u32 %s3258_s16, 3 }
   0xf   : > { %s2765_s24 = scalar_lea.vmem %s3253_s0, %s2225_s21  ;;  %1159 = vmatpush1.bf16.msra.mxu0 %v2255_v3  ;;  %2237 = vmatpush1.bf16.msra.mxu1 %v2255_v3  ;;  %s2977_s15 = scalar_lea.vmem %s3256_s3, %s2225_s21 }
  0x10   : > { %v2264_v5 = vld [vmem:[%s2765_s24 + $0x4] ss:$8 sps:$4 sm:$0xff]   ;;  %1160 = vmatprep.subr.bf16.mxu0 %v2719_v1  ;;  %2229 = vmatprep.subr.bf16.mxu1 %v2719_v1  ;;  %v2262_v12 = vld [vmem:[%s2765_s24] ss:$8 sps:$4 sm:$0xff]   ;;  %v2268_v14 = vld [vmem:[%s2765_s24 + $0x14] ss:$8 sps:$4 sm:$0xff]  }
  0x11   : > { %v2267_v6 = vld [vmem:[%s2765_s24 + $0x204] ss:$8 sps:$4 sm:$0xff]   ;;  %2159 = vmatprep.mubr.msk.bf16.mxu0 %vm961_vm0, %v2264_v5  ;;  %v2265_v13 = vld [vmem:[%s2765_s24 + $0x200] ss:$8 sps:$4 sm:$0xff]   ;;  %v2270_v15 = vld [vmem:[%s2765_s24 + $0x214] ss:$8 sps:$4 sm:$0xff]  }
  0x12   : > { %2191 = vmatprep.mubr.msk.bf16.mxu1 %vm961_vm0, %v2267_v6  ;;  %v2272_v16 = vld [vmem:[%s2765_s24 + $0x10] ss:$8 sps:$4 sm:$0xff]   ;;  %v2274_v18 = vld [vmem:[%s2765_s24 + $0x24] ss:$8 sps:$4 sm:$0xff]   ;;  %v2278_v20 = vld [vmem:[%s2765_s24 + $0x20] ss:$8 sps:$4 sm:$0xff]  }
  0x13   : > { %1161 = vmatpush1.bf16.msra.mxu0 %v2256_v4  ;;  %2238 = vmatpush1.bf16.msra.mxu1 %v2256_v4  ;;  %v2273_v17 = vld [vmem:[%s2765_s24 + $0x210] ss:$8 sps:$4 sm:$0xff]   ;;  %v2276_v19 = vld [vmem:[%s2765_s24 + $0x224] ss:$8 sps:$4 sm:$0xff]   ;;  %v2279_v21 = vld [vmem:[%s2765_s24 + $0x220] ss:$8 sps:$4 sm:$0xff]  }
  0x14   : > { %1162 = vmatprep.subr.bf16.mxu0 %v2719_v1  ;;  %2230 = vmatprep.subr.bf16.mxu1 %v2719_v1  ;;  %v2280_v22 = vld [vmem:[%s2765_s24 + $0x34] ss:$8 sps:$4 sm:$0xff]   ;;  %v2284_v24 = vld [vmem:[%s2765_s24 + $0x30] ss:$8 sps:$4 sm:$0xff]   ;;  %v2286_v26 = vld [vmem:[%s2765_s24 + $0x44] ss:$8 sps:$4 sm:$0xff]  }
  0x15   : > { %v2282_v23 = vld [vmem:[%s2765_s24 + $0x234] ss:$8 sps:$4 sm:$0xff]   ;;  %v2285_v25 = vld [vmem:[%s2765_s24 + $0x230] ss:$8 sps:$4 sm:$0xff]   ;;  %v2288_v27 = vld [vmem:[%s2765_s24 + $0x244] ss:$8 sps:$4 sm:$0xff]  }
  0x16   : > { %v2290_v28 = vld [vmem:[%s2765_s24 + $0x40] ss:$8 sps:$4 sm:$0xff]   ;;  %v2292_v30 = vld [vmem:[%s2765_s24 + $0x54] ss:$8 sps:$4 sm:$0xff]   ;;  %v2296_v32 = vld [vmem:[%s2765_s24 + $0x50] ss:$8 sps:$4 sm:$0xff]  }
  0x17   : > { %1163 = vmatpush1.bf16.msra.mxu0 %v2257_v7  ;;  %2239 = vmatpush1.bf16.msra.mxu1 %v2257_v7  ;;  %v2291_v29 = vld [vmem:[%s2765_s24 + $0x240] ss:$8 sps:$4 sm:$0xff]   ;;  %v2294_v31 = vld [vmem:[%s2765_s24 + $0x254] ss:$8 sps:$4 sm:$0xff]   ;;  %v2297_v33 = vld [vmem:[%s2765_s24 + $0x250] ss:$8 sps:$4 sm:$0xff]  }
  0x18   : > { %1164 = vmatprep.subr.bf16.mxu0 %v2719_v1  ;;  %2231 = vmatprep.subr.bf16.mxu1 %v2719_v1  ;;  %v2298_v34 = vld [vmem:[%s2765_s24 + $0x64] ss:$8 sps:$4 sm:$0xff]   ;;  %v2302_v36 = vld [vmem:[%s2765_s24 + $0x60] ss:$8 sps:$4 sm:$0xff]   ;;  %v2304_v38 = vld [vmem:[%s2765_s24 + $0x74] ss:$8 sps:$4 sm:$0xff]  }
  0x19   : > { %v2300_v35 = vld [vmem:[%s2765_s24 + $0x264] ss:$8 sps:$4 sm:$0xff]   ;;  %v2303_v37 = vld [vmem:[%s2765_s24 + $0x260] ss:$8 sps:$4 sm:$0xff]   ;;  %v2306_v39 = vld [vmem:[%s2765_s24 + $0x274] ss:$8 sps:$4 sm:$0xff]  }
  0x1a   : > { %v2308_v40 = vld [vmem:[%s2765_s24 + $0x70] ss:$8 sps:$4 sm:$0xff]   ;;  %v2310_v42 = vld [vmem:[%s2765_s24 + $0x84] ss:$8 sps:$4 sm:$0xff]   ;;  %v2314_v44 = vld [vmem:[%s2765_s24 + $0x80] ss:$8 sps:$4 sm:$0xff]  }
  0x1b   : > { %1165 = vmatpush1.bf16.msra.mxu0 %v2258_v8  ;;  %2240 = vmatpush1.bf16.msra.mxu1 %v2258_v8  ;;  %v2309_v41 = vld [vmem:[%s2765_s24 + $0x270] ss:$8 sps:$4 sm:$0xff]   ;;  %v2312_v43 = vld [vmem:[%s2765_s24 + $0x284] ss:$8 sps:$4 sm:$0xff]   ;;  %v2315_v45 = vld [vmem:[%s2765_s24 + $0x280] ss:$8 sps:$4 sm:$0xff]  }
  0x1c   : > { %1166 = vmatprep.subr.bf16.mxu0 %v2719_v1  ;;  %2232 = vmatprep.subr.bf16.mxu1 %v2719_v1  ;;  %v2316_v46 = vld [vmem:[%s2765_s24 + $0x94] ss:$8 sps:$4 sm:$0xff]   ;;  %v2320_v48 = vld [vmem:[%s2765_s24 + $0x90] ss:$8 sps:$4 sm:$0xff]   ;;  %v2322_v50 = vld [vmem:[%s2765_s24 + $0xa4] ss:$8 sps:$4 sm:$0xff]  }
  0x1d   : > { %v2318_v47 = vld [vmem:[%s2765_s24 + $0x294] ss:$8 sps:$4 sm:$0xff]   ;;  %v2321_v49 = vld [vmem:[%s2765_s24 + $0x290] ss:$8 sps:$4 sm:$0xff]   ;;  %v2324_v51 = vld [vmem:[%s2765_s24 + $0x2a4] ss:$8 sps:$4 sm:$0xff]  }
  0x1e   : > { %v2326_v52 = vld [vmem:[%s2765_s24 + $0xa0] ss:$8 sps:$4 sm:$0xff]   ;;  %v2328_v54 = vld [vmem:[%s2765_s24 + $0xb4] ss:$8 sps:$4 sm:$0xff]   ;;  %v2332_v56 = vld [vmem:[%s2765_s24 + $0xb0] ss:$8 sps:$4 sm:$0xff]  }
  0x1f   : > { %1167 = vmatpush1.bf16.msra.mxu0 %v2259_v9  ;;  %2241 = vmatpush1.bf16.msra.mxu1 %v2259_v9  ;;  %v2327_v53 = vld [vmem:[%s2765_s24 + $0x2a0] ss:$8 sps:$4 sm:$0xff]   ;;  %v2330_v55 = vld [vmem:[%s2765_s24 + $0x2b4] ss:$8 sps:$4 sm:$0xff]   ;;  %v2333_v57 = vld [vmem:[%s2765_s24 + $0x2b0] ss:$8 sps:$4 sm:$0xff]  }
  0x20   : > { %1168 = vmatprep.subr.bf16.mxu0 %v2719_v1  ;;  %2233 = vmatprep.subr.bf16.mxu1 %v2719_v1  ;;  %v2334_v58 = vld [vmem:[%s2765_s24 + $0xc4] ss:$8 sps:$4 sm:$0xff]   ;;  %v2338_v60 = vld [vmem:[%s2765_s24 + $0xc0] ss:$8 sps:$4 sm:$0xff]   ;;  %v2340_v62 = vld [vmem:[%s2765_s24 + $0xd4] ss:$8 sps:$4 sm:$0xff]  }
  0x21   : > { %v2336_v59 = vld [vmem:[%s2765_s24 + $0x2c4] ss:$8 sps:$4 sm:$0xff]   ;;  %v2339_v61 = vld [vmem:[%s2765_s24 + $0x2c0] ss:$8 sps:$4 sm:$0xff]   ;;  %v2342_v63 = vld [vmem:[%s2765_s24 + $0x2d4] ss:$8 sps:$4 sm:$0xff]  }
  0x22   : > { %v2344_v0 = vld [vmem:[%s2765_s24 + $0xd0] ss:$8 sps:$4 sm:$0xff]   ;;  %v2346_v2 = vld [vmem:[%s2765_s24 + $0xe4] ss:$8 sps:$4 sm:$0xff]   ;;  %v2350_v4 = vld [vmem:[%s2765_s24 + $0xe0] ss:$8 sps:$4 sm:$0xff]  }
  0x23   : > { %1169 = vmatpush1.bf16.msra.mxu0 %v2260_v10  ;;  %2242 = vmatpush1.bf16.msra.mxu1 %v2260_v10  ;;  %v2348_v3 = vld [vmem:[%s2765_s24 + $0x2e4] ss:$8 sps:$4 sm:$0xff]   ;;  %v2351_v5 = vld [vmem:[%s2765_s24 + $0x2e0] ss:$8 sps:$4 sm:$0xff]   ;;  %v2352_v6 = vld [vmem:[%s2765_s24 + $0xf4] ss:$8 sps:$4 sm:$0xff]  }
  0x24   : > { %1170 = vmatprep.subr.bf16.mxu0 %v2719_v1  ;;  %2234 = vmatprep.subr.bf16.mxu1 %v2719_v1  ;;  %v2345_v1 = vld [vmem:[%s2765_s24 + $0x2d0] ss:$8 sps:$4 sm:$0xff]   ;;  %v2354_v7 = vld [vmem:[%s2765_s24 + $0x2f4] ss:$8 sps:$4 sm:$0xff]   ;;  %v2358_v10 = vld [vmem:[%s2765_s24 + $0x104] ss:$8 sps:$4 sm:$0xff]  }
  0x25   : > { %v2356_v8 = vld [vmem:[%s2765_s24 + $0xf0] ss:$8 sps:$4 sm:$0xff]  }
  0x26   : > { %v2357_v9 = vld [vmem:[%s2765_s24 + $0x2f0] ss:$8 sps:$4 sm:$0xff]  }
  0x27   : > { %1171 = vmatpush1.bf16.msra.mxu0 %v2261_v11  ;;  %2243 = vmatpush1.bf16.msra.mxu1 %v2261_v11  ;;  %v2360_v11 = vld [vmem:[%s2765_s24 + $0x304] ss:$8 sps:$4 sm:$0xff]  }
  0x2a   : > { %1187 = vmatmul.mubr.bf16.vlgmr.msra.gmra.mrb[0].mxu0 %v2262_v12  ;;  %1443 = vmatmul.mubr.bf16.vlgmr.msra.gmra.mrb[0].mxu1 %v2265_v13  ;;  %v2362_v12 = vld [vmem:[%s2765_s24 + $0x100] ss:$8 sps:$4 sm:$0xff]  }
  0x2b   : > { %2160 = vmatprep.mubr.msk.bf16.mxu0 %vm961_vm0, %v2268_v14  ;;  %2192 = vmatprep.mubr.msk.bf16.mxu1 %vm961_vm0, %v2270_v15  ;;  %v2363_v13 = vld [vmem:[%s2765_s24 + $0x300] ss:$8 sps:$4 sm:$0xff]   ;;  %v2364_v14 = vld [vmem:[%s2765_s24 + $0x114] ss:$8 sps:$4 sm:$0xff]  }
  0x2c   : > { %v2366_v15 = vld [vmem:[%s2765_s24 + $0x314] ss:$8 sps:$4 sm:$0xff]  }
  0x32   : > { %1195 = vmatmul.mubr.bf16.gmra.mrb[4].mxu0 %v2272_v16  ;;  %1451 = vmatmul.mubr.bf16.gmra.mrb[4].mxu1 %v2273_v17  ;;  %v2368_v16 = vld [vmem:[%s2765_s24 + $0x110] ss:$8 sps:$4 sm:$0xff]  }
  0x33   : > { %2161 = vmatprep.mubr.msk.bf16.mxu0 %vm961_vm0, %v2274_v18  ;;  %2193 = vmatprep.mubr.msk.bf16.mxu1 %vm961_vm0, %v2276_v19  ;;  %v2369_v17 = vld [vmem:[%s2765_s24 + $0x310] ss:$8 sps:$4 sm:$0xff]   ;;  %v2370_v18 = vld [vmem:[%s2765_s24 + $0x124] ss:$8 sps:$4 sm:$0xff]  }
  0x34   : > { %v2372_v19 = vld [vmem:[%s2765_s24 + $0x324] ss:$8 sps:$4 sm:$0xff]  }
  0x3a   : > { %1203 = vmatmul.mubr.bf16.gmra.mrb[8].mxu0 %v2278_v20  ;;  %1459 = vmatmul.mubr.bf16.gmra.mrb[8].mxu1 %v2279_v21  ;;  %v2374_v20 = vld [vmem:[%s2765_s24 + $0x120] ss:$8 sps:$4 sm:$0xff]  }
  0x3b   : > { %2162 = vmatprep.mubr.msk.bf16.mxu0 %vm961_vm0, %v2280_v22  ;;  %2194 = vmatprep.mubr.msk.bf16.mxu1 %vm961_vm0, %v2282_v23  ;;  %v2375_v21 = vld [vmem:[%s2765_s24 + $0x320] ss:$8 sps:$4 sm:$0xff]   ;;  %v2376_v22 = vld [vmem:[%s2765_s24 + $0x134] ss:$8 sps:$4 sm:$0xff]  }
  0x3c   : > { %v2378_v23 = vld [vmem:[%s2765_s24 + $0x334] ss:$8 sps:$4 sm:$0xff]  }
  0x42   : > { %1211 = vmatmul.mubr.bf16.gmra.mrb[12].mxu0 %v2284_v24  ;;  %1467 = vmatmul.mubr.bf16.gmra.mrb[12].mxu1 %v2285_v25  ;;  %v2380_v24 = vld [vmem:[%s2765_s24 + $0x130] ss:$8 sps:$4 sm:$0xff]  }
  0x43   : > { %2163 = vmatprep.mubr.msk.bf16.mxu0 %vm961_vm0, %v2286_v26  ;;  %2195 = vmatprep.mubr.msk.bf16.mxu1 %vm961_vm0, %v2288_v27  ;;  %v2381_v25 = vld [vmem:[%s2765_s24 + $0x330] ss:$8 sps:$4 sm:$0xff]   ;;  %v2382_v26 = vld [vmem:[%s2765_s24 + $0x144] ss:$8 sps:$4 sm:$0xff]  }
  0x44   : > { %v2384_v27 = vld [vmem:[%s2765_s24 + $0x344] ss:$8 sps:$4 sm:$0xff]  }
  0x4a   : > { %1219 = vmatmul.mubr.bf16.gmra.mrb[16].mxu0 %v2290_v28  ;;  %1475 = vmatmul.mubr.bf16.gmra.mrb[16].mxu1 %v2291_v29  ;;  %v2386_v28 = vld [vmem:[%s2765_s24 + $0x140] ss:$8 sps:$4 sm:$0xff]  }
  0x4b   : > { %2164 = vmatprep.mubr.msk.bf16.mxu0 %vm961_vm0, %v2292_v30  ;;  %2196 = vmatprep.mubr.msk.bf16.mxu1 %vm961_vm0, %v2294_v31  ;;  %v2387_v29 = vld [vmem:[%s2765_s24 + $0x340] ss:$8 sps:$4 sm:$0xff]   ;;  %v2388_v30 = vld [vmem:[%s2765_s24 + $0x154] ss:$8 sps:$4 sm:$0xff]  }
  0x4c   : > { %v2390_v31 = vld [vmem:[%s2765_s24 + $0x354] ss:$8 sps:$4 sm:$0xff]  }
  0x52   : > { %1227 = vmatmul.mubr.bf16.gmra.mrb[20].mxu0 %v2296_v32  ;;  %1483 = vmatmul.mubr.bf16.gmra.mrb[20].mxu1 %v2297_v33  ;;  %v2392_v32 = vld [vmem:[%s2765_s24 + $0x150] ss:$8 sps:$4 sm:$0xff]  }
  0x53   : > { %2165 = vmatprep.mubr.msk.bf16.mxu0 %vm961_vm0, %v2298_v34  ;;  %2197 = vmatprep.mubr.msk.bf16.mxu1 %vm961_vm0, %v2300_v35  ;;  %v2393_v33 = vld [vmem:[%s2765_s24 + $0x350] ss:$8 sps:$4 sm:$0xff]   ;;  %v2394_v34 = vld [vmem:[%s2765_s24 + $0x164] ss:$8 sps:$4 sm:$0xff]  }
  0x54   : > { %v2396_v35 = vld [vmem:[%s2765_s24 + $0x364] ss:$8 sps:$4 sm:$0xff]  }
  0x5a   : > { %1235 = vmatmul.mubr.bf16.gmra.mrb[24].mxu0 %v2302_v36  ;;  %1491 = vmatmul.mubr.bf16.gmra.mrb[24].mxu1 %v2303_v37  ;;  %v2398_v36 = vld [vmem:[%s2765_s24 + $0x160] ss:$8 sps:$4 sm:$0xff]  }
  0x5b   : > { %2166 = vmatprep.mubr.msk.bf16.mxu0 %vm961_vm0, %v2304_v38  ;;  %2198 = vmatprep.mubr.msk.bf16.mxu1 %vm961_vm0, %v2306_v39  ;;  %v2399_v37 = vld [vmem:[%s2765_s24 + $0x360] ss:$8 sps:$4 sm:$0xff]   ;;  %v2400_v38 = vld [vmem:[%s2765_s24 + $0x174] ss:$8 sps:$4 sm:$0xff]  }
  0x5c   : > { %v2402_v39 = vld [vmem:[%s2765_s24 + $0x374] ss:$8 sps:$4 sm:$0xff]  }
  0x62   : > { %1243 = vmatmul.mubr.bf16.gmra.mrb[28].mxu0 %v2308_v40  ;;  %1499 = vmatmul.mubr.bf16.gmra.mrb[28].mxu1 %v2309_v41  ;;  %v2404_v40 = vld [vmem:[%s2765_s24 + $0x170] ss:$8 sps:$4 sm:$0xff]  }
  0x63   : > { %2167 = vmatprep.mubr.msk.bf16.mxu0 %vm961_vm0, %v2310_v42  ;;  %2199 = vmatprep.mubr.msk.bf16.mxu1 %vm961_vm0, %v2312_v43  ;;  %v2405_v41 = vld [vmem:[%s2765_s24 + $0x370] ss:$8 sps:$4 sm:$0xff]   ;;  %v2406_v42 = vld [vmem:[%s2765_s24 + $0x184] ss:$8 sps:$4 sm:$0xff]  }
  0x64   : > { %v2408_v43 = vld [vmem:[%s2765_s24 + $0x384] ss:$8 sps:$4 sm:$0xff]  }
  0x6a   : > { %1251 = vmatmul.mubr.bf16.gmra.mrb[32].mxu0 %v2314_v44  ;;  %1507 = vmatmul.mubr.bf16.gmra.mrb[32].mxu1 %v2315_v45  ;;  %v2410_v44 = vld [vmem:[%s2765_s24 + $0x180] ss:$8 sps:$4 sm:$0xff]  }
  0x6b   : > { %2168 = vmatprep.mubr.msk.bf16.mxu0 %vm961_vm0, %v2316_v46  ;;  %2200 = vmatprep.mubr.msk.bf16.mxu1 %vm961_vm0, %v2318_v47  ;;  %v2411_v45 = vld [vmem:[%s2765_s24 + $0x380] ss:$8 sps:$4 sm:$0xff]   ;;  %v2412_v46 = vld [vmem:[%s2765_s24 + $0x194] ss:$8 sps:$4 sm:$0xff]  }
  0x6c   : > { %v2414_v47 = vld [vmem:[%s2765_s24 + $0x394] ss:$8 sps:$4 sm:$0xff]  }
  0x72   : > { %1259 = vmatmul.mubr.bf16.gmra.mrb[36].mxu0 %v2320_v48  ;;  %1515 = vmatmul.mubr.bf16.gmra.mrb[36].mxu1 %v2321_v49  ;;  %v2416_v48 = vld [vmem:[%s2765_s24 + $0x190] ss:$8 sps:$4 sm:$0xff]  }
  0x73   : > { %2169 = vmatprep.mubr.msk.bf16.mxu0 %vm961_vm0, %v2322_v50  ;;  %2201 = vmatprep.mubr.msk.bf16.mxu1 %vm961_vm0, %v2324_v51  ;;  %v2417_v49 = vld [vmem:[%s2765_s24 + $0x390] ss:$8 sps:$4 sm:$0xff]   ;;  %v2418_v50 = vld [vmem:[%s2765_s24 + $0x1a4] ss:$8 sps:$4 sm:$0xff]  }
  0x74   : > { %v2420_v51 = vld [vmem:[%s2765_s24 + $0x3a4] ss:$8 sps:$4 sm:$0xff]  }
  0x7a   : > { %1267 = vmatmul.mubr.bf16.gmra.mrb[40].mxu0 %v2326_v52  ;;  %1523 = vmatmul.mubr.bf16.gmra.mrb[40].mxu1 %v2327_v53  ;;  %v2422_v52 = vld [vmem:[%s2765_s24 + $0x1a0] ss:$8 sps:$4 sm:$0xff]  }
  0x7b   : > { %2170 = vmatprep.mubr.msk.bf16.mxu0 %vm961_vm0, %v2328_v54  ;;  %2202 = vmatprep.mubr.msk.bf16.mxu1 %vm961_vm0, %v2330_v55  ;;  %v2423_v53 = vld [vmem:[%s2765_s24 + $0x3a0] ss:$8 sps:$4 sm:$0xff]   ;;  %v2424_v54 = vld [vmem:[%s2765_s24 + $0x1b4] ss:$8 sps:$4 sm:$0xff]  }
  0x7c   : > { %v2426_v55 = vld [vmem:[%s2765_s24 + $0x3b4] ss:$8 sps:$4 sm:$0xff]  }
  0x82   : > { %1275 = vmatmul.mubr.bf16.gmra.mrb[44].mxu0 %v2332_v56  ;;  %1531 = vmatmul.mubr.bf16.gmra.mrb[44].mxu1 %v2333_v57  ;;  %v2952_v56 = vld [vmem:[%s3255_s2] ss:$0 sm:$0xff] }
  0x83   : > { %2171 = vmatprep.mubr.msk.bf16.mxu0 %vm961_vm0, %v2334_v58  ;;  %2203 = vmatprep.mubr.msk.bf16.mxu1 %vm961_vm0, %v2336_v59 }
  0x8a   : > { %1283 = vmatmul.mubr.bf16.gmra.mrb[48].mxu0 %v2338_v60  ;;  %1539 = vmatmul.mubr.bf16.gmra.mrb[48].mxu1 %v2339_v61 }
  0x8b   : > { %2172 = vmatprep.mubr.msk.bf16.mxu0 %vm961_vm0, %v2340_v62  ;;  %2204 = vmatprep.mubr.msk.bf16.mxu1 %vm961_vm0, %v2342_v63  ;;  %v2428_v63 = vld [vmem:[%s2765_s24 + $0x1b0] ss:$8 sps:$4 sm:$0xff]  }
  0x92   : > { %1291 = vmatmul.mubr.bf16.gmra.mrb[52].mxu0 %v2344_v0  ;;  %1547 = vmatmul.mubr.bf16.gmra.mrb[52].mxu1 %v2345_v1  ;;  %v2429_v0 = vld [vmem:[%s2765_s24 + $0x3b0] ss:$8 sps:$4 sm:$0xff]  }
  0x93   : > { %2173 = vmatprep.mubr.msk.bf16.mxu0 %vm961_vm0, %v2346_v2  ;;  %2205 = vmatprep.mubr.msk.bf16.mxu1 %vm961_vm0, %v2348_v3  ;;  %v2430_v3 = vld [vmem:[%s2765_s24 + $0x1c4] ss:$8 sps:$4 sm:$0xff]  }
  0x9a   : > { %1299 = vmatmul.mubr.bf16.gmra.mrb[56].mxu0 %v2350_v4  ;;  %1555 = vmatmul.mubr.bf16.gmra.mrb[56].mxu1 %v2351_v5  ;;  %v2432_v4 = vld [vmem:[%s2765_s24 + $0x3c4] ss:$8 sps:$4 sm:$0xff]  }
  0x9b   : > { %2174 = vmatprep.mubr.msk.bf16.mxu0 %vm961_vm0, %v2352_v6  ;;  %2206 = vmatprep.mubr.msk.bf16.mxu1 %vm961_vm0, %v2354_v7 }
  0xa2   : > { %1307 = vmatmul.mubr.bf16.gmra.mrb[60].mxu0 %v2356_v8  ;;  %1563 = vmatmul.mubr.bf16.gmra.mrb[60].mxu1 %v2357_v9 }
  0xa3   : > { %2175 = vmatprep.mubr.msk.bf16.mxu0 %vm961_vm0, %v2358_v10  ;;  %2207 = vmatprep.mubr.msk.bf16.mxu1 %vm961_vm0, %v2360_v11 }
  0xaa   : > { %1315 = vmatmul.mubr.bf16.gmra.mrb[64].mxu0 %v2362_v12  ;;  %1571 = vmatmul.mubr.bf16.gmra.mrb[64].mxu1 %v2363_v13 }
  0xab   : > { %2176 = vmatprep.mubr.msk.bf16.mxu0 %vm961_vm0, %v2364_v14  ;;  %2208 = vmatprep.mubr.msk.bf16.mxu1 %vm961_vm0, %v2366_v15  ;;  %v2434_v15 = vld [vmem:[%s2765_s24 + $0x1c0] ss:$8 sps:$4 sm:$0xff]  }
  0xb2   : > { %1323 = vmatmul.mubr.bf16.gmra.mrb[68].mxu0 %v2368_v16  ;;  %1579 = vmatmul.mubr.bf16.gmra.mrb[68].mxu1 %v2369_v17  ;;  %v2435_v16 = vld [vmem:[%s2765_s24 + $0x3c0] ss:$8 sps:$4 sm:$0xff]  }
  0xb3   : > { %2177 = vmatprep.mubr.msk.bf16.mxu0 %vm961_vm0, %v2370_v18  ;;  %2209 = vmatprep.mubr.msk.bf16.mxu1 %vm961_vm0, %v2372_v19  ;;  %v2436_v19 = vld [vmem:[%s2765_s24 + $0x1d4] ss:$8 sps:$4 sm:$0xff]  }
  0xba   : > { %1331 = vmatmul.mubr.bf16.gmra.mrb[72].mxu0 %v2374_v20  ;;  %1587 = vmatmul.mubr.bf16.gmra.mrb[72].mxu1 %v2375_v21  ;;  %v2438_v20 = vld [vmem:[%s2765_s24 + $0x3d4] ss:$8 sps:$4 sm:$0xff]  }
  0xbb   : > { %2178 = vmatprep.mubr.msk.bf16.mxu0 %vm961_vm0, %v2376_v22  ;;  %2210 = vmatprep.mubr.msk.bf16.mxu1 %vm961_vm0, %v2378_v23 }
  0xc2   : > { %1339 = vmatmul.mubr.bf16.gmra.mrb[76].mxu0 %v2380_v24  ;;  %1595 = vmatmul.mubr.bf16.gmra.mrb[76].mxu1 %v2381_v25 }
  0xc3   : > { %2179 = vmatprep.mubr.msk.bf16.mxu0 %vm961_vm0, %v2382_v26  ;;  %2211 = vmatprep.mubr.msk.bf16.mxu1 %vm961_vm0, %v2384_v27 }
  0xca   : > { %1347 = vmatmul.mubr.bf16.gmra.mrb[80].mxu0 %v2386_v28  ;;  %1603 = vmatmul.mubr.bf16.gmra.mrb[80].mxu1 %v2387_v29 }
  0xcb   : > { %2180 = vmatprep.mubr.msk.bf16.mxu0 %vm961_vm0, %v2388_v30  ;;  %2212 = vmatprep.mubr.msk.bf16.mxu1 %vm961_vm0, %v2390_v31 }
  0xd2   : > { %1355 = vmatmul.mubr.bf16.gmra.mrb[84].mxu0 %v2392_v32  ;;  %1611 = vmatmul.mubr.bf16.gmra.mrb[84].mxu1 %v2393_v33 }
  0xd3   : > { %2181 = vmatprep.mubr.msk.bf16.mxu0 %vm961_vm0, %v2394_v34  ;;  %2213 = vmatprep.mubr.msk.bf16.mxu1 %vm961_vm0, %v2396_v35  ;;  %v2440_v35 = vld [vmem:[%s2765_s24 + $0x1d0] ss:$8 sps:$4 sm:$0xff]  }
  0xda   : > { %1363 = vmatmul.mubr.bf16.gmra.mrb[88].mxu0 %v2398_v36  ;;  %1619 = vmatmul.mubr.bf16.gmra.mrb[88].mxu1 %v2399_v37  ;;  %v2441_v36 = vld [vmem:[%s2765_s24 + $0x3d0] ss:$8 sps:$4 sm:$0xff]  }
  0xdb   : > { %2182 = vmatprep.mubr.msk.bf16.mxu0 %vm961_vm0, %v2400_v38  ;;  %2214 = vmatprep.mubr.msk.bf16.mxu1 %vm961_vm0, %v2402_v39  ;;  %v2442_v39 = vld [vmem:[%s2765_s24 + $0x1e4] ss:$8 sps:$4 sm:$0xff]  }
  0xe2   : > { %1371 = vmatmul.mubr.bf16.gmra.mrb[92].mxu0 %v2404_v40  ;;  %1627 = vmatmul.mubr.bf16.gmra.mrb[92].mxu1 %v2405_v41  ;;  %v2444_v40 = vld [vmem:[%s2765_s24 + $0x3e4] ss:$8 sps:$4 sm:$0xff]  }
  0xe3   : > { %2183 = vmatprep.mubr.msk.bf16.mxu0 %vm961_vm0, %v2406_v42  ;;  %2215 = vmatprep.mubr.msk.bf16.mxu1 %vm961_vm0, %v2408_v43 }
  0xea   : > { %1379 = vmatmul.mubr.bf16.gmra.mrb[96].mxu0 %v2410_v44  ;;  %1635 = vmatmul.mubr.bf16.gmra.mrb[96].mxu1 %v2411_v45 }
  0xeb   : > { %2184 = vmatprep.mubr.msk.bf16.mxu0 %vm961_vm0, %v2412_v46  ;;  %2216 = vmatprep.mubr.msk.bf16.mxu1 %vm961_vm0, %v2414_v47 }
  0xf2   : > { %1387 = vmatmul.mubr.bf16.gmra.mrb[100].mxu0 %v2416_v48  ;;  %1643 = vmatmul.mubr.bf16.gmra.mrb[100].mxu1 %v2417_v49 }
  0xf3   : > { %2185 = vmatprep.mubr.msk.bf16.mxu0 %vm961_vm0, %v2418_v50  ;;  %2217 = vmatprep.mubr.msk.bf16.mxu1 %vm961_vm0, %v2420_v51 }
  0xfa   : > { %1395 = vmatmul.mubr.bf16.gmra.mrb[104].mxu0 %v2422_v52  ;;  %1651 = vmatmul.mubr.bf16.gmra.mrb[104].mxu1 %v2423_v53 }
  0xfb   : > { %2186 = vmatprep.mubr.msk.bf16.mxu0 %vm961_vm0, %v2424_v54  ;;  %2218 = vmatprep.mubr.msk.bf16.mxu1 %vm961_vm0, %v2426_v55  ;;  %v2446_v55 = vld [vmem:[%s2765_s24 + $0x1e0] ss:$8 sps:$4 sm:$0xff]  }
  0xfd   : > { %v1188_v57 = vpop.f32.mrb[0].mxu0  ;;  %v1444_v58 = vpop.f32.mrb[0].mxu1 }
  0xfe   : > { %v1189_v59 = vadd.f32 %v2952_v56, %v1188_v57  ;;  %v1445_v60 = vadd.f32 %v2952_v56, %v1444_v58  ;;  %v1190_v61 = vpop.f32.mrb[1].mxu0  ;;  %v1446_v62 = vpop.f32.mrb[1].mxu1  ;;  %v2447_v57 = vld [vmem:[%s2765_s24 + $0x3e0] ss:$8 sps:$4 sm:$0xff]  }
  0xff   : > { %v1191_v1 = vpop.f32.mrb[2].mxu0  ;;  %v1447_v2 = vpop.f32.mrb[2].mxu1  ;;  %v2450_v61 = vld [vmem:[%s2765_s24 + $0x3f4] ss:$8 sps:$4 sm:$0xff]  }
 0x100   : > { %2454 = vtanh.f32 %v1189_v59  ;;  %v1192_v5 = vadd.f32 %v2952_v56, %v1191_v1  ;;  %v1448_v6 = vadd.f32 %v2952_v56, %v1447_v2  ;;  %v1193_v7 = vpop.f32.mrb[3].mxu0  ;;  %v1449_v8 = vpop.f32.mrb[3].mxu1 }
 0x101   : > { %2456 = vtanh.f32 %v1445_v60  ;;  %v2448_v60 = vld [vmem:[%s2765_s24 + $0x1f4] ss:$8 sps:$4 sm:$0xff]  }
 0x102   : > { %2458 = vtanh.f32 %v1192_v5  ;;  %1403 = vmatmul.mubr.bf16.gmra.mrb[108].mxu0 %v2428_v63  ;;  %1659 = vmatmul.mubr.bf16.gmra.mrb[108].mxu1 %v2429_v0 }
 0x103   : > { %2460 = vtanh.f32 %v1448_v6  ;;  %2187 = vmatprep.mubr.msk.bf16.mxu0 %vm961_vm0, %v2430_v3  ;;  %2219 = vmatprep.mubr.msk.bf16.mxu1 %vm961_vm0, %v2432_v4 }
 0x105   : > { %v1196_v9 = vpop.f32.mrb[4].mxu0  ;;  %v1452_v10 = vpop.f32.mrb[4].mxu1 }
 0x106   : > { %v1197_v11 = vadd.f32 %v2952_v56, %v1196_v9  ;;  %v1453_v12 = vadd.f32 %v2952_v56, %v1452_v10  ;;  %v1198_v13 = vpop.f32.mrb[5].mxu0  ;;  %v1454_v14 = vpop.f32.mrb[5].mxu1 }
 0x107   : > { %v1199_v17 = vpop.f32.mrb[6].mxu0  ;;  %v1455_v18 = vpop.f32.mrb[6].mxu1  ;;  %v2453_v13 = vld [vmem:[%s2765_s24 + $0x3f0] ss:$8 sps:$4 sm:$0xff]  }
 0x108   : > { %2462 = vtanh.f32 %v1197_v11  ;;  %v1200_v21 = vadd.f32 %v2952_v56, %v1199_v17  ;;  %v1456_v22 = vadd.f32 %v2952_v56, %v1455_v18  ;;  %v1201_v23 = vpop.f32.mrb[7].mxu0  ;;  %v1457_v24 = vpop.f32.mrb[7].mxu1 }
 0x109   : > { %2464 = vtanh.f32 %v1453_v12  ;;  %v2452_v12 = vld [vmem:[%s2765_s24 + $0x1f0] ss:$8 sps:$4 sm:$0xff]  }
 0x10a   : > { %v2455_v25 = vpop.eup %2454  ;;  %2466 = vtanh.f32 %v1200_v21  ;;  %1411 = vmatmul.mubr.bf16.gmra.mrb[112].mxu0 %v2434_v15  ;;  %1667 = vmatmul.mubr.bf16.gmra.mrb[112].mxu1 %v2435_v16 }
 0x10b   : > { %v2457_v26 = vpop.eup %2456  ;;  %1827 = vst [vmem:[%s2977_s15] sm:$0xff] %v2455_v25  ;;  %2468 = vtanh.f32 %v1456_v22  ;;  %2188 = vmatprep.mubr.msk.bf16.mxu0 %vm961_vm0, %v2436_v19  ;;  %2220 = vmatprep.mubr.msk.bf16.mxu1 %vm961_vm0, %v2438_v20 }
 0x10c   : > { %v2459_v27 = vpop.eup %2458  ;;  %1891 = vst [vmem:[%s2977_s15 + $0x200] sm:$0xff] %v2457_v26 }
 0x10d   : > { %v2461_v28 = vpop.eup %2460  ;;  %1828 = vst [vmem:[%s2977_s15 + $0x8] sm:$0xff] %v2459_v27  ;;  %v1204_v29 = vpop.f32.mrb[8].mxu0 }
 0x10e   : > { %v1460_v30 = vpop.f32.mrb[8].mxu1  ;;  %1892 = vst [vmem:[%s2977_s15 + $0x208] sm:$0xff] %v2461_v28  ;;  %v1205_v31 = vadd.f32 %v2952_v56, %v1204_v29  ;;  %v1206_v33 = vpop.f32.mrb[9].mxu0 }
 0x10f   : > { %v1461_v32 = vadd.f32 %v2952_v56, %v1460_v30  ;;  %v1462_v34 = vpop.f32.mrb[9].mxu1  ;;  %v1207_v37 = vpop.f32.mrb[10].mxu0 }
 0x110   : > { %v1463_v38 = vpop.f32.mrb[10].mxu1  ;;  %2470 = vtanh.f32 %v1205_v31  ;;  %v1208_v41 = vadd.f32 %v2952_v56, %v1207_v37  ;;  %v1209_v43 = vpop.f32.mrb[11].mxu0 }
 0x111   : > { %v1464_v42 = vadd.f32 %v2952_v56, %v1463_v38  ;;  %v1465_v44 = vpop.f32.mrb[11].mxu1  ;;  %2472 = vtanh.f32 %v1461_v32 }
 0x112   : > { %v2463_v45 = vpop.eup %2462  ;;  %2474 = vtanh.f32 %v1208_v41  ;;  %1419 = vmatmul.mubr.bf16.gmra.mrb[116].mxu0 %v2440_v35  ;;  %1675 = vmatmul.mubr.bf16.gmra.mrb[116].mxu1 %v2441_v36 }
 0x113   : > { %v2465_v46 = vpop.eup %2464  ;;  %1829 = vst [vmem:[%s2977_s15 + $0x10] sm:$0xff] %v2463_v45  ;;  %2476 = vtanh.f32 %v1464_v42  ;;  %2189 = vmatprep.mubr.msk.bf16.mxu0 %vm961_vm0, %v2442_v39  ;;  %2221 = vmatprep.mubr.msk.bf16.mxu1 %vm961_vm0, %v2444_v40 }
 0x114   : > { %v2467_v47 = vpop.eup %2466  ;;  %1893 = vst [vmem:[%s2977_s15 + $0x210] sm:$0xff] %v2465_v46 }
 0x115   : > { %v2469_v48 = vpop.eup %2468  ;;  %1830 = vst [vmem:[%s2977_s15 + $0x18] sm:$0xff] %v2467_v47  ;;  %v1212_v49 = vpop.f32.mrb[12].mxu0 }
 0x116   : > { %v1468_v50 = vpop.f32.mrb[12].mxu1  ;;  %1894 = vst [vmem:[%s2977_s15 + $0x218] sm:$0xff] %v2469_v48  ;;  %v1213_v51 = vadd.f32 %v2952_v56, %v1212_v49  ;;  %v1214_v53 = vpop.f32.mrb[13].mxu0 }
 0x117   : > { %v1469_v52 = vadd.f32 %v2952_v56, %v1468_v50  ;;  %v1470_v54 = vpop.f32.mrb[13].mxu1  ;;  %v1215_v58 = vpop.f32.mrb[14].mxu0 }
 0x118   : > { %v1471_v59 = vpop.f32.mrb[14].mxu1  ;;  %2478 = vtanh.f32 %v1213_v51  ;;  %v1216_v62 = vadd.f32 %v2952_v56, %v1215_v58  ;;  %v1217_v0 = vpop.f32.mrb[15].mxu0 }
 0x119   : > { %v1472_v63 = vadd.f32 %v2952_v56, %v1471_v59  ;;  %v1473_v1 = vpop.f32.mrb[15].mxu1  ;;  %2480 = vtanh.f32 %v1469_v52 }
 0x11a   : > { %v2471_v2 = vpop.eup %2470  ;;  %2482 = vtanh.f32 %v1216_v62  ;;  %1427 = vmatmul.mubr.bf16.gmra.mrb[120].mxu0 %v2446_v55  ;;  %1683 = vmatmul.mubr.bf16.gmra.mrb[120].mxu1 %v2447_v57 }
 0x11b   : > { %v2473_v3 = vpop.eup %2472  ;;  %1831 = vst [vmem:[%s2977_s15 + $0x20] sm:$0xff] %v2471_v2  ;;  %2484 = vtanh.f32 %v1472_v63  ;;  %2190 = vmatprep.mubr.msk.bf16.mxu0 %vm961_vm0, %v2448_v60  ;;  %2222 = vmatprep.mubr.msk.bf16.mxu1 %vm961_vm0, %v2450_v61 }
 0x11c   : > { %v2475_v4 = vpop.eup %2474  ;;  %1895 = vst [vmem:[%s2977_s15 + $0x220] sm:$0xff] %v2473_v3 }
 0x11d   : > { %v2477_v5 = vpop.eup %2476  ;;  %1832 = vst [vmem:[%s2977_s15 + $0x28] sm:$0xff] %v2475_v4  ;;  %v1220_v6 = vpop.f32.mrb[16].mxu0 }
 0x11e   : > { %v1476_v7 = vpop.f32.mrb[16].mxu1  ;;  %1896 = vst [vmem:[%s2977_s15 + $0x228] sm:$0xff] %v2477_v5  ;;  %v1221_v8 = vadd.f32 %v2952_v56, %v1220_v6  ;;  %v1222_v10 = vpop.f32.mrb[17].mxu0 }
 0x11f   : > { %v1477_v9 = vadd.f32 %v2952_v56, %v1476_v7  ;;  %v1478_v11 = vpop.f32.mrb[17].mxu1  ;;  %v1223_v14 = vpop.f32.mrb[18].mxu0 }
 0x120   : > { %v1479_v15 = vpop.f32.mrb[18].mxu1  ;;  %2486 = vtanh.f32 %v1221_v8  ;;  %v1224_v16 = vadd.f32 %v2952_v56, %v1223_v14  ;;  %v1225_v18 = vpop.f32.mrb[19].mxu0 }
 0x121   : > { %v1480_v17 = vadd.f32 %v2952_v56, %v1479_v15  ;;  %v1481_v19 = vpop.f32.mrb[19].mxu1  ;;  %2488 = vtanh.f32 %v1477_v9 }
 0x122   : > { %v2479_v20 = vpop.eup %2478  ;;  %2490 = vtanh.f32 %v1224_v16  ;;  %1435 = vmatmul.mubr.bf16.gmra.mrb[124].mxu0 %v2452_v12  ;;  %1691 = vmatmul.mubr.bf16.gmra.mrb[124].mxu1 %v2453_v13 }
 0x123   : > { %v2481_v21 = vpop.eup %2480  ;;  %1833 = vst [vmem:[%s2977_s15 + $0x30] sm:$0xff] %v2479_v20  ;;  %2492 = vtanh.f32 %v1480_v17 }
 0x124   : > { %v2483_v22 = vpop.eup %2482  ;;  %1897 = vst [vmem:[%s2977_s15 + $0x230] sm:$0xff] %v2481_v21 }
 0x125   : > { %v2485_v23 = vpop.eup %2484  ;;  %1834 = vst [vmem:[%s2977_s15 + $0x38] sm:$0xff] %v2483_v22  ;;  %v1228_v24 = vpop.f32.mrb[20].mxu0 }
 0x126   : > { %v1484_v25 = vpop.f32.mrb[20].mxu1  ;;  %1898 = vst [vmem:[%s2977_s15 + $0x238] sm:$0xff] %v2485_v23  ;;  %v1229_v26 = vadd.f32 %v2952_v56, %v1228_v24  ;;  %v1230_v28 = vpop.f32.mrb[21].mxu0 }
 0x127   : > { %v1485_v27 = vadd.f32 %v2952_v56, %v1484_v25  ;;  %v1486_v29 = vpop.f32.mrb[21].mxu1  ;;  %v1231_v30 = vpop.f32.mrb[22].mxu0 }
 0x128   : > { %v1487_v31 = vpop.f32.mrb[22].mxu1  ;;  %2494 = vtanh.f32 %v1229_v26  ;;  %v1232_v32 = vadd.f32 %v2952_v56, %v1231_v30  ;;  %v1233_v34 = vpop.f32.mrb[23].mxu0 }
 0x129   : > { %v1488_v33 = vadd.f32 %v2952_v56, %v1487_v31  ;;  %v1489_v35 = vpop.f32.mrb[23].mxu1  ;;  %2496 = vtanh.f32 %v1485_v27 }
 0x12a   : > { %v2487_v36 = vpop.eup %2486  ;;  %2498 = vtanh.f32 %v1232_v32 }
 0x12b   : > { %v2489_v37 = vpop.eup %2488  ;;  %1835 = vst [vmem:[%s2977_s15 + $0x40] sm:$0xff] %v2487_v36  ;;  %2500 = vtanh.f32 %v1488_v33 }
 0x12c   : > { %v2491_v38 = vpop.eup %2490  ;;  %1899 = vst [vmem:[%s2977_s15 + $0x240] sm:$0xff] %v2489_v37 }
 0x12d   : > { %v2493_v39 = vpop.eup %2492  ;;  %1836 = vst [vmem:[%s2977_s15 + $0x48] sm:$0xff] %v2491_v38  ;;  %v1236_v40 = vpop.f32.mrb[24].mxu0 }
 0x12e   : > { %v1492_v41 = vpop.f32.mrb[24].mxu1  ;;  %1900 = vst [vmem:[%s2977_s15 + $0x248] sm:$0xff] %v2493_v39  ;;  %v1237_v42 = vadd.f32 %v2952_v56, %v1236_v40  ;;  %v1238_v44 = vpop.f32.mrb[25].mxu0 }
 0x12f   : > { %v1493_v43 = vadd.f32 %v2952_v56, %v1492_v41  ;;  %v1494_v45 = vpop.f32.mrb[25].mxu1  ;;  %v1239_v46 = vpop.f32.mrb[26].mxu0 }
 0x130   : > { %v1495_v47 = vpop.f32.mrb[26].mxu1  ;;  %2502 = vtanh.f32 %v1237_v42  ;;  %v1240_v48 = vadd.f32 %v2952_v56, %v1239_v46  ;;  %v1241_v50 = vpop.f32.mrb[27].mxu0 }
 0x131   : > { %v1496_v49 = vadd.f32 %v2952_v56, %v1495_v47  ;;  %v1497_v51 = vpop.f32.mrb[27].mxu1  ;;  %2504 = vtanh.f32 %v1493_v43 }
 0x132   : > { %v2495_v52 = vpop.eup %2494  ;;  %2506 = vtanh.f32 %v1240_v48 }
 0x133   : > { %v2497_v53 = vpop.eup %2496  ;;  %1837 = vst [vmem:[%s2977_s15 + $0x50] sm:$0xff] %v2495_v52  ;;  %2508 = vtanh.f32 %v1496_v49 }
 0x134   : > { %v2499_v54 = vpop.eup %2498  ;;  %1901 = vst [vmem:[%s2977_s15 + $0x250] sm:$0xff] %v2497_v53 }
 0x135   : > { %v2501_v55 = vpop.eup %2500  ;;  %1838 = vst [vmem:[%s2977_s15 + $0x58] sm:$0xff] %v2499_v54  ;;  %v1244_v57 = vpop.f32.mrb[28].mxu0 }
 0x136   : > { %v1500_v58 = vpop.f32.mrb[28].mxu1  ;;  %1902 = vst [vmem:[%s2977_s15 + $0x258] sm:$0xff] %v2501_v55  ;;  %v1245_v59 = vadd.f32 %v2952_v56, %v1244_v57  ;;  %v1246_v61 = vpop.f32.mrb[29].mxu0 }
 0x137   : > { %v1501_v60 = vadd.f32 %v2952_v56, %v1500_v58  ;;  %v1502_v62 = vpop.f32.mrb[29].mxu1  ;;  %v1247_v63 = vpop.f32.mrb[30].mxu0 }
 0x138   : > { %v1503_v0 = vpop.f32.mrb[30].mxu1  ;;  %2510 = vtanh.f32 %v1245_v59  ;;  %v1248_v1 = vadd.f32 %v2952_v56, %v1247_v63  ;;  %v1249_v3 = vpop.f32.mrb[31].mxu0 }
 0x139   : > { %v1504_v2 = vadd.f32 %v2952_v56, %v1503_v0  ;;  %v1505_v4 = vpop.f32.mrb[31].mxu1  ;;  %2512 = vtanh.f32 %v1501_v60 }
 0x13a   : > { %v2503_v5 = vpop.eup %2502  ;;  %2514 = vtanh.f32 %v1248_v1 }
 0x13b   : > { %v2505_v6 = vpop.eup %2504  ;;  %1839 = vst [vmem:[%s2977_s15 + $0x60] sm:$0xff] %v2503_v5  ;;  %2516 = vtanh.f32 %v1504_v2 }
 0x13c   : > { %v2507_v7 = vpop.eup %2506  ;;  %1903 = vst [vmem:[%s2977_s15 + $0x260] sm:$0xff] %v2505_v6 }
 0x13d   : > { %v2509_v8 = vpop.eup %2508  ;;  %1840 = vst [vmem:[%s2977_s15 + $0x68] sm:$0xff] %v2507_v7  ;;  %v1252_v9 = vpop.f32.mrb[32].mxu0 }
 0x13e   : > { %v1508_v10 = vpop.f32.mrb[32].mxu1  ;;  %1904 = vst [vmem:[%s2977_s15 + $0x268] sm:$0xff] %v2509_v8  ;;  %v1253_v11 = vadd.f32 %v2952_v56, %v1252_v9  ;;  %v1254_v13 = vpop.f32.mrb[33].mxu0 }
 0x13f   : > { %v1509_v12 = vadd.f32 %v2952_v56, %v1508_v10  ;;  %v1510_v14 = vpop.f32.mrb[33].mxu1  ;;  %v1255_v15 = vpop.f32.mrb[34].mxu0 }
 0x140   : > { %v1511_v16 = vpop.f32.mrb[34].mxu1  ;;  %2518 = vtanh.f32 %v1253_v11  ;;  %v1256_v17 = vadd.f32 %v2952_v56, %v1255_v15  ;;  %v1257_v19 = vpop.f32.mrb[35].mxu0 }
 0x141   : > { %v1512_v18 = vadd.f32 %v2952_v56, %v1511_v16  ;;  %v1513_v20 = vpop.f32.mrb[35].mxu1  ;;  %2520 = vtanh.f32 %v1509_v12 }
 0x142   : > { %v2511_v21 = vpop.eup %2510  ;;  %2522 = vtanh.f32 %v1256_v17 }
 0x143   : > { %v2513_v22 = vpop.eup %2512  ;;  %1841 = vst [vmem:[%s2977_s15 + $0x70] sm:$0xff] %v2511_v21  ;;  %2524 = vtanh.f32 %v1512_v18 }
 0x144   : > { %v2515_v23 = vpop.eup %2514  ;;  %1905 = vst [vmem:[%s2977_s15 + $0x270] sm:$0xff] %v2513_v22 }
 0x145   : > { %v2517_v24 = vpop.eup %2516  ;;  %1842 = vst [vmem:[%s2977_s15 + $0x78] sm:$0xff] %v2515_v23  ;;  %v1260_v25 = vpop.f32.mrb[36].mxu0 }
 0x146   : > { %v1516_v26 = vpop.f32.mrb[36].mxu1  ;;  %1906 = vst [vmem:[%s2977_s15 + $0x278] sm:$0xff] %v2517_v24  ;;  %v1261_v27 = vadd.f32 %v2952_v56, %v1260_v25  ;;  %v1262_v29 = vpop.f32.mrb[37].mxu0 }
 0x147   : > { %v1517_v28 = vadd.f32 %v2952_v56, %v1516_v26  ;;  %v1518_v30 = vpop.f32.mrb[37].mxu1  ;;  %v1263_v31 = vpop.f32.mrb[38].mxu0 }
 0x148   : > { %v1519_v32 = vpop.f32.mrb[38].mxu1  ;;  %2526 = vtanh.f32 %v1261_v27  ;;  %v1264_v33 = vadd.f32 %v2952_v56, %v1263_v31  ;;  %v1265_v35 = vpop.f32.mrb[39].mxu0 }
 0x149   : > { %v1520_v34 = vadd.f32 %v2952_v56, %v1519_v32  ;;  %v1521_v36 = vpop.f32.mrb[39].mxu1  ;;  %2528 = vtanh.f32 %v1517_v28 }
 0x14a   : > { %v2519_v37 = vpop.eup %2518  ;;  %2530 = vtanh.f32 %v1264_v33 }
 0x14b   : > { %v2521_v38 = vpop.eup %2520  ;;  %1843 = vst [vmem:[%s2977_s15 + $0x80] sm:$0xff] %v2519_v37  ;;  %2532 = vtanh.f32 %v1520_v34 }
 0x14c   : > { %v2523_v39 = vpop.eup %2522  ;;  %1907 = vst [vmem:[%s2977_s15 + $0x280] sm:$0xff] %v2521_v38 }
 0x14d   : > { %v2525_v40 = vpop.eup %2524  ;;  %1844 = vst [vmem:[%s2977_s15 + $0x88] sm:$0xff] %v2523_v39  ;;  %v1268_v41 = vpop.f32.mrb[40].mxu0 }
 0x14e   : > { %v1524_v42 = vpop.f32.mrb[40].mxu1  ;;  %1908 = vst [vmem:[%s2977_s15 + $0x288] sm:$0xff] %v2525_v40  ;;  %v1269_v43 = vadd.f32 %v2952_v56, %v1268_v41  ;;  %v1270_v45 = vpop.f32.mrb[41].mxu0 }
 0x14f   : > { %v1525_v44 = vadd.f32 %v2952_v56, %v1524_v42  ;;  %v1526_v46 = vpop.f32.mrb[41].mxu1  ;;  %v1271_v47 = vpop.f32.mrb[42].mxu0 }
 0x150   : > { %v1527_v48 = vpop.f32.mrb[42].mxu1  ;;  %2534 = vtanh.f32 %v1269_v43  ;;  %v1272_v49 = vadd.f32 %v2952_v56, %v1271_v47  ;;  %v1273_v51 = vpop.f32.mrb[43].mxu0 }
 0x151   : > { %v1528_v50 = vadd.f32 %v2952_v56, %v1527_v48  ;;  %v1529_v52 = vpop.f32.mrb[43].mxu1  ;;  %2536 = vtanh.f32 %v1525_v44 }
 0x152   : > { %v2527_v53 = vpop.eup %2526  ;;  %2538 = vtanh.f32 %v1272_v49 }
 0x153   : > { %v2529_v54 = vpop.eup %2528  ;;  %1845 = vst [vmem:[%s2977_s15 + $0x90] sm:$0xff] %v2527_v53  ;;  %2540 = vtanh.f32 %v1528_v50 }
 0x154   : > { %v2531_v55 = vpop.eup %2530  ;;  %1909 = vst [vmem:[%s2977_s15 + $0x290] sm:$0xff] %v2529_v54 }
 0x155   : > { %v2533_v57 = vpop.eup %2532  ;;  %1846 = vst [vmem:[%s2977_s15 + $0x98] sm:$0xff] %v2531_v55  ;;  %v1276_v58 = vpop.f32.mrb[44].mxu0 }
 0x156   : > { %v1532_v59 = vpop.f32.mrb[44].mxu1  ;;  %1910 = vst [vmem:[%s2977_s15 + $0x298] sm:$0xff] %v2533_v57  ;;  %v1277_v60 = vadd.f32 %v2952_v56, %v1276_v58  ;;  %v1278_v62 = vpop.f32.mrb[45].mxu0 }
 0x157   : > { %v1533_v61 = vadd.f32 %v2952_v56, %v1532_v59  ;;  %v1534_v63 = vpop.f32.mrb[45].mxu1  ;;  %v1279_v0 = vpop.f32.mrb[46].mxu0 }
 0x158   : > { %v1535_v1 = vpop.f32.mrb[46].mxu1  ;;  %2542 = vtanh.f32 %v1277_v60  ;;  %v1280_v2 = vadd.f32 %v2952_v56, %v1279_v0  ;;  %v1281_v4 = vpop.f32.mrb[47].mxu0 }
 0x159   : > { %v1536_v3 = vadd.f32 %v2952_v56, %v1535_v1  ;;  %v1537_v5 = vpop.f32.mrb[47].mxu1  ;;  %2544 = vtanh.f32 %v1533_v61 }
 0x15a   : > { %v2535_v6 = vpop.eup %2534  ;;  %2546 = vtanh.f32 %v1280_v2 }
 0x15b   : > { %v2537_v7 = vpop.eup %2536  ;;  %1847 = vst [vmem:[%s2977_s15 + $0xa0] sm:$0xff] %v2535_v6  ;;  %2548 = vtanh.f32 %v1536_v3 }
 0x15c   : > { %v2539_v8 = vpop.eup %2538  ;;  %1911 = vst [vmem:[%s2977_s15 + $0x2a0] sm:$0xff] %v2537_v7 }
 0x15d   : > { %v2541_v9 = vpop.eup %2540  ;;  %1848 = vst [vmem:[%s2977_s15 + $0xa8] sm:$0xff] %v2539_v8  ;;  %v1284_v10 = vpop.f32.mrb[48].mxu0 }
 0x15e   : > { %v1540_v11 = vpop.f32.mrb[48].mxu1  ;;  %1912 = vst [vmem:[%s2977_s15 + $0x2a8] sm:$0xff] %v2541_v9  ;;  %v1285_v12 = vadd.f32 %v2952_v56, %v1284_v10  ;;  %v1286_v14 = vpop.f32.mrb[49].mxu0 }
 0x15f   : > { %v1541_v13 = vadd.f32 %v2952_v56, %v1540_v11  ;;  %v1542_v15 = vpop.f32.mrb[49].mxu1  ;;  %v1287_v16 = vpop.f32.mrb[50].mxu0 }
 0x160   : > { %v1543_v17 = vpop.f32.mrb[50].mxu1  ;;  %2550 = vtanh.f32 %v1285_v12  ;;  %v1288_v18 = vadd.f32 %v2952_v56, %v1287_v16  ;;  %v1289_v20 = vpop.f32.mrb[51].mxu0 }
 0x161   : > { %v1544_v19 = vadd.f32 %v2952_v56, %v1543_v17  ;;  %v1545_v21 = vpop.f32.mrb[51].mxu1  ;;  %2552 = vtanh.f32 %v1541_v13 }
 0x162   : > { %v2543_v22 = vpop.eup %2542  ;;  %2554 = vtanh.f32 %v1288_v18 }
 0x163   : > { %v2545_v23 = vpop.eup %2544  ;;  %1849 = vst [vmem:[%s2977_s15 + $0xb0] sm:$0xff] %v2543_v22  ;;  %2556 = vtanh.f32 %v1544_v19 }
 0x164   : > { %v2547_v24 = vpop.eup %2546  ;;  %1913 = vst [vmem:[%s2977_s15 + $0x2b0] sm:$0xff] %v2545_v23 }
 0x165   : > { %v2549_v25 = vpop.eup %2548  ;;  %1850 = vst [vmem:[%s2977_s15 + $0xb8] sm:$0xff] %v2547_v24  ;;  %v1292_v26 = vpop.f32.mrb[52].mxu0 }
 0x166   : > { %v1548_v27 = vpop.f32.mrb[52].mxu1  ;;  %1914 = vst [vmem:[%s2977_s15 + $0x2b8] sm:$0xff] %v2549_v25  ;;  %v1293_v28 = vadd.f32 %v2952_v56, %v1292_v26  ;;  %v1294_v30 = vpop.f32.mrb[53].mxu0 }
 0x167   : > { %v1549_v29 = vadd.f32 %v2952_v56, %v1548_v27  ;;  %v1550_v31 = vpop.f32.mrb[53].mxu1  ;;  %v1295_v32 = vpop.f32.mrb[54].mxu0 }
 0x168   : > { %v1551_v33 = vpop.f32.mrb[54].mxu1  ;;  %2558 = vtanh.f32 %v1293_v28  ;;  %v1296_v34 = vadd.f32 %v2952_v56, %v1295_v32  ;;  %v1297_v36 = vpop.f32.mrb[55].mxu0 }
 0x169   : > { %v1552_v35 = vadd.f32 %v2952_v56, %v1551_v33  ;;  %v1553_v37 = vpop.f32.mrb[55].mxu1  ;;  %2560 = vtanh.f32 %v1549_v29 }
 0x16a   : > { %v2551_v38 = vpop.eup %2550  ;;  %2562 = vtanh.f32 %v1296_v34 }
 0x16b   : > { %v2553_v39 = vpop.eup %2552  ;;  %1851 = vst [vmem:[%s2977_s15 + $0xc0] sm:$0xff] %v2551_v38  ;;  %2564 = vtanh.f32 %v1552_v35 }
 0x16c   : > { %v2555_v40 = vpop.eup %2554  ;;  %1915 = vst [vmem:[%s2977_s15 + $0x2c0] sm:$0xff] %v2553_v39 }
 0x16d   : > { %v2557_v41 = vpop.eup %2556  ;;  %1852 = vst [vmem:[%s2977_s15 + $0xc8] sm:$0xff] %v2555_v40  ;;  %v1300_v42 = vpop.f32.mrb[56].mxu0 }
 0x16e   : > { %v1556_v43 = vpop.f32.mrb[56].mxu1  ;;  %1916 = vst [vmem:[%s2977_s15 + $0x2c8] sm:$0xff] %v2557_v41  ;;  %v1301_v44 = vadd.f32 %v2952_v56, %v1300_v42  ;;  %v1302_v46 = vpop.f32.mrb[57].mxu0 }
 0x16f   : > { %v1557_v45 = vadd.f32 %v2952_v56, %v1556_v43  ;;  %v1558_v47 = vpop.f32.mrb[57].mxu1  ;;  %v1303_v48 = vpop.f32.mrb[58].mxu0 }
 0x170   : > { %v1559_v49 = vpop.f32.mrb[58].mxu1  ;;  %2566 = vtanh.f32 %v1301_v44  ;;  %v1304_v50 = vadd.f32 %v2952_v56, %v1303_v48  ;;  %v1305_v52 = vpop.f32.mrb[59].mxu0 }
 0x171   : > { %v1560_v51 = vadd.f32 %v2952_v56, %v1559_v49  ;;  %v1561_v53 = vpop.f32.mrb[59].mxu1  ;;  %2568 = vtanh.f32 %v1557_v45 }
 0x172   : > { %v2559_v54 = vpop.eup %2558  ;;  %2570 = vtanh.f32 %v1304_v50 }
 0x173   : > { %v2561_v55 = vpop.eup %2560  ;;  %1853 = vst [vmem:[%s2977_s15 + $0xd0] sm:$0xff] %v2559_v54  ;;  %2572 = vtanh.f32 %v1560_v51 }
 0x174   : > { %v2563_v57 = vpop.eup %2562  ;;  %1917 = vst [vmem:[%s2977_s15 + $0x2d0] sm:$0xff] %v2561_v55 }
 0x175   : > { %v2565_v58 = vpop.eup %2564  ;;  %1854 = vst [vmem:[%s2977_s15 + $0xd8] sm:$0xff] %v2563_v57  ;;  %v1308_v59 = vpop.f32.mrb[60].mxu0 }
 0x176   : > { %v1564_v60 = vpop.f32.mrb[60].mxu1  ;;  %1918 = vst [vmem:[%s2977_s15 + $0x2d8] sm:$0xff] %v2565_v58  ;;  %v1309_v61 = vadd.f32 %v2952_v56, %v1308_v59  ;;  %v1310_v63 = vpop.f32.mrb[61].mxu0 }
 0x177   : > { %v1565_v62 = vadd.f32 %v2952_v56, %v1564_v60  ;;  %v1566_v0 = vpop.f32.mrb[61].mxu1  ;;  %v1311_v1 = vpop.f32.mrb[62].mxu0 }
 0x178   : > { %v1567_v2 = vpop.f32.mrb[62].mxu1  ;;  %2574 = vtanh.f32 %v1309_v61  ;;  %v1312_v3 = vadd.f32 %v2952_v56, %v1311_v1  ;;  %v1313_v5 = vpop.f32.mrb[63].mxu0 }
 0x179   : > { %v1568_v4 = vadd.f32 %v2952_v56, %v1567_v2  ;;  %v1569_v6 = vpop.f32.mrb[63].mxu1  ;;  %2576 = vtanh.f32 %v1565_v62 }
 0x17a   : > { %v2567_v7 = vpop.eup %2566  ;;  %2578 = vtanh.f32 %v1312_v3 }
 0x17b   : > { %v2569_v8 = vpop.eup %2568  ;;  %1855 = vst [vmem:[%s2977_s15 + $0xe0] sm:$0xff] %v2567_v7  ;;  %2580 = vtanh.f32 %v1568_v4 }
 0x17c   : > { %v2571_v9 = vpop.eup %2570  ;;  %1919 = vst [vmem:[%s2977_s15 + $0x2e0] sm:$0xff] %v2569_v8 }
 0x17d   : > { %v2573_v10 = vpop.eup %2572  ;;  %1856 = vst [vmem:[%s2977_s15 + $0xe8] sm:$0xff] %v2571_v9  ;;  %v1316_v11 = vpop.f32.mrb[64].mxu0 }
 0x17e   : > { %v1572_v12 = vpop.f32.mrb[64].mxu1  ;;  %1920 = vst [vmem:[%s2977_s15 + $0x2e8] sm:$0xff] %v2573_v10  ;;  %v1317_v13 = vadd.f32 %v2952_v56, %v1316_v11  ;;  %v1318_v15 = vpop.f32.mrb[65].mxu0 }
 0x17f   : > { %v1573_v14 = vadd.f32 %v2952_v56, %v1572_v12  ;;  %v1574_v16 = vpop.f32.mrb[65].mxu1  ;;  %v1319_v17 = vpop.f32.mrb[66].mxu0 }
 0x180   : > { %v1575_v18 = vpop.f32.mrb[66].mxu1  ;;  %2582 = vtanh.f32 %v1317_v13  ;;  %v1320_v19 = vadd.f32 %v2952_v56, %v1319_v17  ;;  %v1321_v21 = vpop.f32.mrb[67].mxu0 }
 0x181   : > { %v1576_v20 = vadd.f32 %v2952_v56, %v1575_v18  ;;  %v1577_v22 = vpop.f32.mrb[67].mxu1  ;;  %2584 = vtanh.f32 %v1573_v14  ;;  %v3148_v14 = vld [vmem:[%s3255_s2] ss:$0 sm:$0xff] }
 0x182   : > { %v2575_v23 = vpop.eup %2574  ;;  %2586 = vtanh.f32 %v1320_v19 }
 0x183   : > { %v2577_v24 = vpop.eup %2576  ;;  %1857 = vst [vmem:[%s2977_s15 + $0xf0] sm:$0xff] %v2575_v23  ;;  %2588 = vtanh.f32 %v1576_v20 }
 0x184   : > { %v2579_v25 = vpop.eup %2578  ;;  %1921 = vst [vmem:[%s2977_s15 + $0x2f0] sm:$0xff] %v2577_v24 }
 0x185   : > { %v2581_v26 = vpop.eup %2580  ;;  %1858 = vst [vmem:[%s2977_s15 + $0xf8] sm:$0xff] %v2579_v25  ;;  %v1324_v27 = vpop.f32.mrb[68].mxu0 }
 0x186   : > { %v1580_v28 = vpop.f32.mrb[68].mxu1  ;;  %1922 = vst [vmem:[%s2977_s15 + $0x2f8] sm:$0xff] %v2581_v26  ;;  %v1325_v29 = vadd.f32 %v2952_v56, %v1324_v27  ;;  %v1326_v31 = vpop.f32.mrb[69].mxu0 }
 0x187   : > { %v1581_v30 = vadd.f32 %v2952_v56, %v1580_v28  ;;  %v1582_v32 = vpop.f32.mrb[69].mxu1  ;;  %v1327_v33 = vpop.f32.mrb[70].mxu0 }
 0x188   : > { %v1583_v34 = vpop.f32.mrb[70].mxu1  ;;  %2590 = vtanh.f32 %v1325_v29  ;;  %v1328_v35 = vadd.f32 %v2952_v56, %v1327_v33  ;;  %v1329_v37 = vpop.f32.mrb[71].mxu0 }
 0x189   : > { %v1584_v36 = vadd.f32 %v2952_v56, %v1583_v34  ;;  %v1585_v38 = vpop.f32.mrb[71].mxu1  ;;  %2592 = vtanh.f32 %v1581_v30 }
 0x18a   : > { %v2583_v39 = vpop.eup %2582  ;;  %2594 = vtanh.f32 %v1328_v35 }
 0x18b   : > { %v2585_v40 = vpop.eup %2584  ;;  %1859 = vst [vmem:[%s2977_s15 + $0x100] sm:$0xff] %v2583_v39  ;;  %2596 = vtanh.f32 %v1584_v36 }
 0x18c   : > { %v2587_v41 = vpop.eup %2586  ;;  %1923 = vst [vmem:[%s2977_s15 + $0x300] sm:$0xff] %v2585_v40 }
 0x18d   : > { %v2589_v42 = vpop.eup %2588  ;;  %1860 = vst [vmem:[%s2977_s15 + $0x108] sm:$0xff] %v2587_v41  ;;  %v1332_v43 = vpop.f32.mrb[72].mxu0 }
 0x18e   : > { %v1588_v44 = vpop.f32.mrb[72].mxu1  ;;  %1924 = vst [vmem:[%s2977_s15 + $0x308] sm:$0xff] %v2589_v42  ;;  %v1333_v45 = vadd.f32 %v2952_v56, %v1332_v43  ;;  %v1334_v47 = vpop.f32.mrb[73].mxu0 }
 0x18f   : > { %v1589_v46 = vadd.f32 %v2952_v56, %v1588_v44  ;;  %v1590_v48 = vpop.f32.mrb[73].mxu1  ;;  %v1335_v49 = vpop.f32.mrb[74].mxu0 }
 0x190   : > { %v1591_v50 = vpop.f32.mrb[74].mxu1  ;;  %2598 = vtanh.f32 %v1333_v45  ;;  %v1336_v51 = vadd.f32 %v2952_v56, %v1335_v49  ;;  %v1337_v53 = vpop.f32.mrb[75].mxu0 }
 0x191   : > { %v1592_v52 = vadd.f32 %v2952_v56, %v1591_v50  ;;  %v1593_v54 = vpop.f32.mrb[75].mxu1  ;;  %2600 = vtanh.f32 %v1589_v46 }
 0x192   : > { %v2591_v55 = vpop.eup %2590  ;;  %2602 = vtanh.f32 %v1336_v51 }
 0x193   : > { %v2593_v57 = vpop.eup %2592  ;;  %1861 = vst [vmem:[%s2977_s15 + $0x110] sm:$0xff] %v2591_v55  ;;  %2604 = vtanh.f32 %v1592_v52 }
 0x194   : > { %v2595_v58 = vpop.eup %2594  ;;  %1925 = vst [vmem:[%s2977_s15 + $0x310] sm:$0xff] %v2593_v57 }
 0x195   : > { %v2597_v59 = vpop.eup %2596  ;;  %1862 = vst [vmem:[%s2977_s15 + $0x118] sm:$0xff] %v2595_v58  ;;  %v1340_v60 = vpop.f32.mrb[76].mxu0 }
 0x196   : > { %v1596_v61 = vpop.f32.mrb[76].mxu1  ;;  %1926 = vst [vmem:[%s2977_s15 + $0x318] sm:$0xff] %v2597_v59  ;;  %v1341_v62 = vadd.f32 %v2952_v56, %v1340_v60  ;;  %v1342_v0 = vpop.f32.mrb[77].mxu0 }
 0x197   : > { %v1597_v63 = vadd.f32 %v2952_v56, %v1596_v61  ;;  %v1598_v1 = vpop.f32.mrb[77].mxu1  ;;  %v1343_v2 = vpop.f32.mrb[78].mxu0 }
 0x198   : > { %v1599_v3 = vpop.f32.mrb[78].mxu1  ;;  %2606 = vtanh.f32 %v1341_v62  ;;  %v1344_v4 = vadd.f32 %v2952_v56, %v1343_v2  ;;  %v1345_v6 = vpop.f32.mrb[79].mxu0 }
 0x199   : > { %v1600_v5 = vadd.f32 %v2952_v56, %v1599_v3  ;;  %v1601_v7 = vpop.f32.mrb[79].mxu1  ;;  %2608 = vtanh.f32 %v1597_v63 }
 0x19a   : > { %v2599_v8 = vpop.eup %2598  ;;  %2610 = vtanh.f32 %v1344_v4 }
 0x19b   : > { %v2601_v9 = vpop.eup %2600  ;;  %1863 = vst [vmem:[%s2977_s15 + $0x120] sm:$0xff] %v2599_v8  ;;  %2612 = vtanh.f32 %v1600_v5 }
 0x19c   : > { %v2603_v10 = vpop.eup %2602  ;;  %1927 = vst [vmem:[%s2977_s15 + $0x320] sm:$0xff] %v2601_v9 }
 0x19d   : > { %v2605_v11 = vpop.eup %2604  ;;  %1864 = vst [vmem:[%s2977_s15 + $0x128] sm:$0xff] %v2603_v10  ;;  %v1348_v12 = vpop.f32.mrb[80].mxu0 }
 0x19e   : > { %v1604_v13 = vpop.f32.mrb[80].mxu1  ;;  %1928 = vst [vmem:[%s2977_s15 + $0x328] sm:$0xff] %v2605_v11  ;;  %v1349_v56 = vadd.f32 %v3148_v14, %v1348_v12  ;;  %v1350_v16 = vpop.f32.mrb[81].mxu0 }
 0x19f   : > { %v1605_v15 = vadd.f32 %v3148_v14, %v1604_v13  ;;  %v1606_v17 = vpop.f32.mrb[81].mxu1  ;;  %v1351_v18 = vpop.f32.mrb[82].mxu0 }
 0x1a0   : > { %v1607_v19 = vpop.f32.mrb[82].mxu1  ;;  %2614 = vtanh.f32 %v1349_v56  ;;  %v1352_v20 = vadd.f32 %v3148_v14, %v1351_v18  ;;  %v1353_v22 = vpop.f32.mrb[83].mxu0 }
 0x1a1   : > { %v1608_v21 = vadd.f32 %v3148_v14, %v1607_v19  ;;  %v1609_v23 = vpop.f32.mrb[83].mxu1  ;;  %2616 = vtanh.f32 %v1605_v15 }
 0x1a2   : > { %v2607_v24 = vpop.eup %2606  ;;  %2618 = vtanh.f32 %v1352_v20 }
 0x1a3   : > { %v2609_v25 = vpop.eup %2608  ;;  %1865 = vst [vmem:[%s2977_s15 + $0x130] sm:$0xff] %v2607_v24  ;;  %2620 = vtanh.f32 %v1608_v21 }
 0x1a4   : > { %v2611_v26 = vpop.eup %2610  ;;  %1929 = vst [vmem:[%s2977_s15 + $0x330] sm:$0xff] %v2609_v25 }
 0x1a5   : > { %v2613_v27 = vpop.eup %2612  ;;  %1866 = vst [vmem:[%s2977_s15 + $0x138] sm:$0xff] %v2611_v26  ;;  %v1356_v28 = vpop.f32.mrb[84].mxu0 }
 0x1a6   : > { %v1612_v29 = vpop.f32.mrb[84].mxu1  ;;  %1930 = vst [vmem:[%s2977_s15 + $0x338] sm:$0xff] %v2613_v27  ;;  %v1357_v30 = vadd.f32 %v3148_v14, %v1356_v28  ;;  %v1358_v32 = vpop.f32.mrb[85].mxu0 }
 0x1a7   : > { %v1613_v31 = vadd.f32 %v3148_v14, %v1612_v29  ;;  %v1614_v33 = vpop.f32.mrb[85].mxu1  ;;  %v1359_v34 = vpop.f32.mrb[86].mxu0 }
 0x1a8   : > { %v1615_v35 = vpop.f32.mrb[86].mxu1  ;;  %2622 = vtanh.f32 %v1357_v30  ;;  %v1360_v36 = vadd.f32 %v3148_v14, %v1359_v34  ;;  %v1361_v38 = vpop.f32.mrb[87].mxu0 }
 0x1a9   : > { %v1616_v37 = vadd.f32 %v3148_v14, %v1615_v35  ;;  %v1617_v39 = vpop.f32.mrb[87].mxu1  ;;  %2624 = vtanh.f32 %v1613_v31 }
 0x1aa   : > { %v2615_v40 = vpop.eup %2614  ;;  %2626 = vtanh.f32 %v1360_v36 }
 0x1ab   : > { %v2617_v41 = vpop.eup %2616  ;;  %1867 = vst [vmem:[%s2977_s15 + $0x140] sm:$0xff] %v2615_v40  ;;  %2628 = vtanh.f32 %v1616_v37 }
 0x1ac   : > { %v2619_v42 = vpop.eup %2618  ;;  %1931 = vst [vmem:[%s2977_s15 + $0x340] sm:$0xff] %v2617_v41 }
 0x1ad   : > { %v2621_v43 = vpop.eup %2620  ;;  %1868 = vst [vmem:[%s2977_s15 + $0x148] sm:$0xff] %v2619_v42  ;;  %v1364_v44 = vpop.f32.mrb[88].mxu0 }
 0x1ae   : > { %v1620_v45 = vpop.f32.mrb[88].mxu1  ;;  %1932 = vst [vmem:[%s2977_s15 + $0x348] sm:$0xff] %v2621_v43  ;;  %v1365_v46 = vadd.f32 %v3148_v14, %v1364_v44  ;;  %v1366_v48 = vpop.f32.mrb[89].mxu0 }
 0x1af   : > { %v1621_v47 = vadd.f32 %v3148_v14, %v1620_v45  ;;  %v1622_v49 = vpop.f32.mrb[89].mxu1  ;;  %v1367_v50 = vpop.f32.mrb[90].mxu0 }
 0x1b0   : > { %v1623_v51 = vpop.f32.mrb[90].mxu1  ;;  %2630 = vtanh.f32 %v1365_v46  ;;  %v1368_v52 = vadd.f32 %v3148_v14, %v1367_v50  ;;  %v1369_v54 = vpop.f32.mrb[91].mxu0 }
 0x1b1   : > { %v1624_v53 = vadd.f32 %v3148_v14, %v1623_v51  ;;  %v1625_v55 = vpop.f32.mrb[91].mxu1  ;;  %2632 = vtanh.f32 %v1621_v47 }
 0x1b2   : > { %v2623_v57 = vpop.eup %2622  ;;  %2634 = vtanh.f32 %v1368_v52 }
 0x1b3   : > { %v2625_v58 = vpop.eup %2624  ;;  %1869 = vst [vmem:[%s2977_s15 + $0x150] sm:$0xff] %v2623_v57  ;;  %2636 = vtanh.f32 %v1624_v53 }
 0x1b4   : > { %v2627_v59 = vpop.eup %2626  ;;  %1933 = vst [vmem:[%s2977_s15 + $0x350] sm:$0xff] %v2625_v58 }
 0x1b5   : > { %v2629_v60 = vpop.eup %2628  ;;  %1870 = vst [vmem:[%s2977_s15 + $0x158] sm:$0xff] %v2627_v59  ;;  %v1372_v61 = vpop.f32.mrb[92].mxu0 }
 0x1b6   : > { %v1628_v62 = vpop.f32.mrb[92].mxu1  ;;  %1934 = vst [vmem:[%s2977_s15 + $0x358] sm:$0xff] %v2629_v60  ;;  %v1373_v63 = vadd.f32 %v3148_v14, %v1372_v61  ;;  %v1374_v1 = vpop.f32.mrb[93].mxu0 }
 0x1b7   : > { %v1629_v0 = vadd.f32 %v3148_v14, %v1628_v62  ;;  %v1630_v2 = vpop.f32.mrb[93].mxu1  ;;  %v1375_v3 = vpop.f32.mrb[94].mxu0 }
 0x1b8   : > { %v1631_v4 = vpop.f32.mrb[94].mxu1  ;;  %2638 = vtanh.f32 %v1373_v63  ;;  %v1376_v5 = vadd.f32 %v3148_v14, %v1375_v3  ;;  %v1377_v7 = vpop.f32.mrb[95].mxu0 }
 0x1b9   : > { %v1632_v6 = vadd.f32 %v3148_v14, %v1631_v4  ;;  %v1633_v8 = vpop.f32.mrb[95].mxu1  ;;  %2640 = vtanh.f32 %v1629_v0 }
 0x1ba   : > { %v2631_v9 = vpop.eup %2630  ;;  %2642 = vtanh.f32 %v1376_v5 }
 0x1bb   : > { %v2633_v10 = vpop.eup %2632  ;;  %1871 = vst [vmem:[%s2977_s15 + $0x160] sm:$0xff] %v2631_v9  ;;  %2644 = vtanh.f32 %v1632_v6 }
 0x1bc   : > { %v2635_v11 = vpop.eup %2634  ;;  %1935 = vst [vmem:[%s2977_s15 + $0x360] sm:$0xff] %v2633_v10 }
 0x1bd   : > { %v2637_v12 = vpop.eup %2636  ;;  %1872 = vst [vmem:[%s2977_s15 + $0x168] sm:$0xff] %v2635_v11  ;;  %v1380_v13 = vpop.f32.mrb[96].mxu0 }
 0x1be   : > { %v1636_v56 = vpop.f32.mrb[96].mxu1  ;;  %1936 = vst [vmem:[%s2977_s15 + $0x368] sm:$0xff] %v2637_v12  ;;  %v1381_v15 = vadd.f32 %v3148_v14, %v1380_v13  ;;  %v1382_v17 = vpop.f32.mrb[97].mxu0 }
 0x1bf   : > { %v1637_v16 = vadd.f32 %v3148_v14, %v1636_v56  ;;  %v1638_v18 = vpop.f32.mrb[97].mxu1  ;;  %v1383_v19 = vpop.f32.mrb[98].mxu0 }
 0x1c0   : > { %v1639_v20 = vpop.f32.mrb[98].mxu1  ;;  %2646 = vtanh.f32 %v1381_v15  ;;  %v1384_v21 = vadd.f32 %v3148_v14, %v1383_v19  ;;  %v1385_v23 = vpop.f32.mrb[99].mxu0 }
 0x1c1   : > { %v1640_v22 = vadd.f32 %v3148_v14, %v1639_v20  ;;  %v1641_v24 = vpop.f32.mrb[99].mxu1  ;;  %2648 = vtanh.f32 %v1637_v16 }
 0x1c2   : > { %v2639_v25 = vpop.eup %2638  ;;  %2650 = vtanh.f32 %v1384_v21 }
 0x1c3   : > { %v2641_v26 = vpop.eup %2640  ;;  %1873 = vst [vmem:[%s2977_s15 + $0x170] sm:$0xff] %v2639_v25  ;;  %2652 = vtanh.f32 %v1640_v22 }
 0x1c4   : > { %v2643_v27 = vpop.eup %2642  ;;  %1937 = vst [vmem:[%s2977_s15 + $0x370] sm:$0xff] %v2641_v26 }
 0x1c5   : > { %v2645_v28 = vpop.eup %2644  ;;  %1874 = vst [vmem:[%s2977_s15 + $0x178] sm:$0xff] %v2643_v27  ;;  %v1388_v29 = vpop.f32.mrb[100].mxu0 }
 0x1c6   : > { %v1644_v30 = vpop.f32.mrb[100].mxu1  ;;  %1938 = vst [vmem:[%s2977_s15 + $0x378] sm:$0xff] %v2645_v28  ;;  %v1389_v31 = vadd.f32 %v3148_v14, %v1388_v29  ;;  %v1390_v33 = vpop.f32.mrb[101].mxu0 }
 0x1c7   : > { %v1645_v32 = vadd.f32 %v3148_v14, %v1644_v30  ;;  %v1646_v34 = vpop.f32.mrb[101].mxu1  ;;  %v1391_v35 = vpop.f32.mrb[102].mxu0 }
 0x1c8   : > { %v1647_v36 = vpop.f32.mrb[102].mxu1  ;;  %2654 = vtanh.f32 %v1389_v31  ;;  %v1392_v37 = vadd.f32 %v3148_v14, %v1391_v35  ;;  %v1393_v39 = vpop.f32.mrb[103].mxu0 }
 0x1c9   : > { %v1648_v38 = vadd.f32 %v3148_v14, %v1647_v36  ;;  %v1649_v40 = vpop.f32.mrb[103].mxu1  ;;  %2656 = vtanh.f32 %v1645_v32 }
 0x1ca   : > { %v2647_v41 = vpop.eup %2646  ;;  %2658 = vtanh.f32 %v1392_v37 }
 0x1cb   : > { %v2649_v42 = vpop.eup %2648  ;;  %1875 = vst [vmem:[%s2977_s15 + $0x180] sm:$0xff] %v2647_v41  ;;  %2660 = vtanh.f32 %v1648_v38 }
 0x1cc   : > { %v2651_v43 = vpop.eup %2650  ;;  %1939 = vst [vmem:[%s2977_s15 + $0x380] sm:$0xff] %v2649_v42 }
 0x1cd   : > { %v2653_v44 = vpop.eup %2652  ;;  %1876 = vst [vmem:[%s2977_s15 + $0x188] sm:$0xff] %v2651_v43  ;;  %v1396_v45 = vpop.f32.mrb[104].mxu0 }
 0x1ce   : > { %v1652_v46 = vpop.f32.mrb[104].mxu1  ;;  %1940 = vst [vmem:[%s2977_s15 + $0x388] sm:$0xff] %v2653_v44  ;;  %v1397_v47 = vadd.f32 %v3148_v14, %v1396_v45  ;;  %v1398_v49 = vpop.f32.mrb[105].mxu0 }
 0x1cf   : > { %v1653_v48 = vadd.f32 %v3148_v14, %v1652_v46  ;;  %v1654_v50 = vpop.f32.mrb[105].mxu1  ;;  %v1399_v51 = vpop.f32.mrb[106].mxu0 }
 0x1d0   : > { %v1655_v52 = vpop.f32.mrb[106].mxu1  ;;  %2662 = vtanh.f32 %v1397_v47  ;;  %v1400_v53 = vadd.f32 %v3148_v14, %v1399_v51  ;;  %v1401_v55 = vpop.f32.mrb[107].mxu0 }
 0x1d1   : > { %v1656_v54 = vadd.f32 %v3148_v14, %v1655_v52  ;;  %v1657_v57 = vpop.f32.mrb[107].mxu1  ;;  %2664 = vtanh.f32 %v1653_v48 }
 0x1d2   : > { %v2655_v58 = vpop.eup %2654  ;;  %2666 = vtanh.f32 %v1400_v53 }
 0x1d3   : > { %v2657_v59 = vpop.eup %2656  ;;  %1877 = vst [vmem:[%s2977_s15 + $0x190] sm:$0xff] %v2655_v58  ;;  %2668 = vtanh.f32 %v1656_v54 }
 0x1d4   : > { %v2659_v60 = vpop.eup %2658  ;;  %1941 = vst [vmem:[%s2977_s15 + $0x390] sm:$0xff] %v2657_v59 }
 0x1d5   : > { %v2661_v61 = vpop.eup %2660  ;;  %1878 = vst [vmem:[%s2977_s15 + $0x198] sm:$0xff] %v2659_v60  ;;  %v1404_v62 = vpop.f32.mrb[108].mxu0 }
 0x1d6   : > { %v1660_v63 = vpop.f32.mrb[108].mxu1  ;;  %1942 = vst [vmem:[%s2977_s15 + $0x398] sm:$0xff] %v2661_v61  ;;  %v1405_v0 = vadd.f32 %v3148_v14, %v1404_v62  ;;  %v1406_v2 = vpop.f32.mrb[109].mxu0 }
 0x1d7   : > { %v1661_v1 = vadd.f32 %v3148_v14, %v1660_v63  ;;  %v1662_v3 = vpop.f32.mrb[109].mxu1  ;;  %v1407_v4 = vpop.f32.mrb[110].mxu0 }
 0x1d8   : > { %v1663_v5 = vpop.f32.mrb[110].mxu1  ;;  %2670 = vtanh.f32 %v1405_v0  ;;  %v1408_v6 = vadd.f32 %v3148_v14, %v1407_v4  ;;  %v1409_v8 = vpop.f32.mrb[111].mxu0 }
 0x1d9   : > { %v1664_v7 = vadd.f32 %v3148_v14, %v1663_v5  ;;  %v1665_v9 = vpop.f32.mrb[111].mxu1  ;;  %2672 = vtanh.f32 %v1661_v1 }
 0x1da   : > { %v2663_v10 = vpop.eup %2662  ;;  %2674 = vtanh.f32 %v1408_v6 }
 0x1db   : > { %v2665_v11 = vpop.eup %2664  ;;  %1879 = vst [vmem:[%s2977_s15 + $0x1a0] sm:$0xff] %v2663_v10  ;;  %2676 = vtanh.f32 %v1664_v7 }
 0x1dc   : > { %v2667_v12 = vpop.eup %2666  ;;  %1943 = vst [vmem:[%s2977_s15 + $0x3a0] sm:$0xff] %v2665_v11 }
 0x1dd   : > { %v2669_v13 = vpop.eup %2668  ;;  %1880 = vst [vmem:[%s2977_s15 + $0x1a8] sm:$0xff] %v2667_v12  ;;  %v1412_v56 = vpop.f32.mrb[112].mxu0 }
 0x1de   : > { %v1668_v15 = vpop.f32.mrb[112].mxu1  ;;  %1944 = vst [vmem:[%s2977_s15 + $0x3a8] sm:$0xff] %v2669_v13  ;;  %v1413_v16 = vadd.f32 %v3148_v14, %v1412_v56  ;;  %v1414_v18 = vpop.f32.mrb[113].mxu0 }
 0x1df   : > { %v1669_v17 = vadd.f32 %v3148_v14, %v1668_v15  ;;  %v1670_v19 = vpop.f32.mrb[113].mxu1  ;;  %v1415_v20 = vpop.f32.mrb[114].mxu0 }
 0x1e0   : > { %v1671_v21 = vpop.f32.mrb[114].mxu1  ;;  %2678 = vtanh.f32 %v1413_v16  ;;  %v1416_v22 = vadd.f32 %v3148_v14, %v1415_v20  ;;  %v1417_v24 = vpop.f32.mrb[115].mxu0 }
 0x1e1   : > { %v1672_v23 = vadd.f32 %v3148_v14, %v1671_v21  ;;  %v1673_v25 = vpop.f32.mrb[115].mxu1  ;;  %2680 = vtanh.f32 %v1669_v17 }
 0x1e2   : > { %v2671_v26 = vpop.eup %2670  ;;  %2682 = vtanh.f32 %v1416_v22 }
 0x1e3   : > { %v2673_v27 = vpop.eup %2672  ;;  %1881 = vst [vmem:[%s2977_s15 + $0x1b0] sm:$0xff] %v2671_v26  ;;  %2684 = vtanh.f32 %v1672_v23 }
 0x1e4   : > { %v2675_v28 = vpop.eup %2674  ;;  %1945 = vst [vmem:[%s2977_s15 + $0x3b0] sm:$0xff] %v2673_v27 }
 0x1e5   : > { %v2677_v29 = vpop.eup %2676  ;;  %1882 = vst [vmem:[%s2977_s15 + $0x1b8] sm:$0xff] %v2675_v28  ;;  %v1420_v30 = vpop.f32.mrb[116].mxu0 }
 0x1e6   : > { %v1676_v31 = vpop.f32.mrb[116].mxu1  ;;  %1946 = vst [vmem:[%s2977_s15 + $0x3b8] sm:$0xff] %v2677_v29  ;;  %v1421_v32 = vadd.f32 %v3148_v14, %v1420_v30  ;;  %v1422_v34 = vpop.f32.mrb[117].mxu0 }
 0x1e7   : > { %v1677_v33 = vadd.f32 %v3148_v14, %v1676_v31  ;;  %v1678_v35 = vpop.f32.mrb[117].mxu1  ;;  %v1423_v36 = vpop.f32.mrb[118].mxu0 }
 0x1e8   : > { %v1679_v37 = vpop.f32.mrb[118].mxu1  ;;  %2686 = vtanh.f32 %v1421_v32  ;;  %v1424_v38 = vadd.f32 %v3148_v14, %v1423_v36  ;;  %v1425_v40 = vpop.f32.mrb[119].mxu0 }
 0x1e9   : > { %v1680_v39 = vadd.f32 %v3148_v14, %v1679_v37  ;;  %v1681_v41 = vpop.f32.mrb[119].mxu1  ;;  %2688 = vtanh.f32 %v1677_v33 }
 0x1ea   : > { %v2679_v42 = vpop.eup %2678  ;;  %2690 = vtanh.f32 %v1424_v38 }
 0x1eb   : > { %v2681_v43 = vpop.eup %2680  ;;  %1883 = vst [vmem:[%s2977_s15 + $0x1c0] sm:$0xff] %v2679_v42  ;;  %2692 = vtanh.f32 %v1680_v39 }
 0x1ec   : > { %v2683_v44 = vpop.eup %2682  ;;  %1947 = vst [vmem:[%s2977_s15 + $0x3c0] sm:$0xff] %v2681_v43 }
 0x1ed   : > { %v2685_v45 = vpop.eup %2684  ;;  %1884 = vst [vmem:[%s2977_s15 + $0x1c8] sm:$0xff] %v2683_v44  ;;  %v1428_v46 = vpop.f32.mrb[120].mxu0 }
 0x1ee   : > { %v1684_v47 = vpop.f32.mrb[120].mxu1  ;;  %1948 = vst [vmem:[%s2977_s15 + $0x3c8] sm:$0xff] %v2685_v45  ;;  %v1429_v48 = vadd.f32 %v3148_v14, %v1428_v46  ;;  %v1430_v50 = vpop.f32.mrb[121].mxu0 }
 0x1ef   : > { %v1685_v49 = vadd.f32 %v3148_v14, %v1684_v47  ;;  %v1686_v51 = vpop.f32.mrb[121].mxu1  ;;  %v1431_v52 = vpop.f32.mrb[122].mxu0 }
 0x1f0   : > { %v1687_v53 = vpop.f32.mrb[122].mxu1  ;;  %2694 = vtanh.f32 %v1429_v48  ;;  %v1432_v54 = vadd.f32 %v3148_v14, %v1431_v52  ;;  %v1433_v57 = vpop.f32.mrb[123].mxu0 }
 0x1f1   : > { %v1688_v55 = vadd.f32 %v3148_v14, %v1687_v53  ;;  %v1689_v58 = vpop.f32.mrb[123].mxu1  ;;  %2696 = vtanh.f32 %v1685_v49 }
 0x1f2   : > { %v2687_v59 = vpop.eup %2686  ;;  %2698 = vtanh.f32 %v1432_v54 }
 0x1f3   : > { %v2689_v60 = vpop.eup %2688  ;;  %1885 = vst [vmem:[%s2977_s15 + $0x1d0] sm:$0xff] %v2687_v59  ;;  %2700 = vtanh.f32 %v1688_v55 }
 0x1f4   : > { %v2691_v61 = vpop.eup %2690  ;;  %1949 = vst [vmem:[%s2977_s15 + $0x3d0] sm:$0xff] %v2689_v60 }
 0x1f5   : > { %v2693_v62 = vpop.eup %2692  ;;  %1886 = vst [vmem:[%s2977_s15 + $0x1d8] sm:$0xff] %v2691_v61  ;;  %v1436_v63 = vpop.f32.mrb[124].mxu0 }
 0x1f6   : > { %v1692_v0 = vpop.f32.mrb[124].mxu1  ;;  %1950 = vst [vmem:[%s2977_s15 + $0x3d8] sm:$0xff] %v2693_v62  ;;  %v1437_v1 = vadd.f32 %v3148_v14, %v1436_v63  ;;  %v1438_v3 = vpop.f32.mrb[125].mxu0 }
 0x1f7   : > { %v1693_v2 = vadd.f32 %v3148_v14, %v1692_v0  ;;  %v1694_v4 = vpop.f32.mrb[125].mxu1  ;;  %v1439_v5 = vpop.f32.mrb[126].mxu0 }
 0x1f8   : > { %v1695_v6 = vpop.f32.mrb[126].mxu1  ;;  %2702 = vtanh.f32 %v1437_v1  ;;  %v1440_v7 = vadd.f32 %v3148_v14, %v1439_v5  ;;  %v1441_v9 = vpop.f32.mrb[127].mxu0 }
 0x1f9   : > { %v1696_v8 = vadd.f32 %v3148_v14, %v1695_v6  ;;  %v1697_v10 = vpop.f32.mrb[127].mxu1  ;;  %2704 = vtanh.f32 %v1693_v2 }
 0x1fa   : > { %v2695_v11 = vpop.eup %2694  ;;  %2706 = vtanh.f32 %v1440_v7 }
 0x1fb   : > { %v2697_v12 = vpop.eup %2696  ;;  %1887 = vst [vmem:[%s2977_s15 + $0x1e0] sm:$0xff] %v2695_v11  ;;  %2708 = vtanh.f32 %v1696_v8 }
 0x1fc   : > { %v2699_v13 = vpop.eup %2698  ;;  %1951 = vst [vmem:[%s2977_s15 + $0x3e0] sm:$0xff] %v2697_v12 }
 0x1fd   : > { %v2701_v56 = vpop.eup %2700  ;;  %1888 = vst [vmem:[%s2977_s15 + $0x1e8] sm:$0xff] %v2699_v13 }
 0x1fe   : > { %1952 = vst [vmem:[%s2977_s15 + $0x3e8] sm:$0xff] %v2701_v56 }
 0x202   : > { %v2703_v15 = vpop.eup %2702 }
 0x203   : > { %v2705_v16 = vpop.eup %2704  ;;  %1889 = vst [vmem:[%s2977_s15 + $0x1f0] sm:$0xff] %v2703_v15 }
 0x204   : > { %v2707_v14 = vpop.eup %2706  ;;  %1953 = vst [vmem:[%s2977_s15 + $0x3f0] sm:$0xff] %v2705_v16 }
 0x205   : > { %v2709_v17 = vpop.eup %2708  ;;  %1890 = vst [vmem:[%s2977_s15 + $0x1f8] sm:$0xff] %v2707_v14 }
 0x206   : > { %1954 = vst [vmem:[%s2977_s15 + $0x3f8] sm:$0xff] %v2709_v17 }
 0x207 PF: > { %s13_s12 = sadd.s32 1, %s2717_s12  }
 0x208   : > { %p10_p4 = scmp.ge.s32.totalorder %s13_s12, 4  }
 0x20a   :  { %12 = sbr.rel (!%p10_p4) target bundleno = 1 (0x1), region = 62 }

</bundles_post_ra>
